<compile_context>
chip_gen: v6e
topology: v6e:2x2x1
jax: 0.10.0
libtpu: 0.0.40
codegen_flags: <defaults>
</compile_context>

<pallas_src>
import math
import functools

import jax
import jax.numpy as jnp
from jax.experimental import pallas as pl
from jax.experimental.pallas import tpu as pltpu

NEG_INF = jnp.float32(-1e30)   # additive mask value (softmax -> exact 0 weight)
LN_EPS = 1e-5
LEAKY_SLOPE = 0.01             # HANet uses F.leaky_relu as the FFN activation


# ----------------------------------------------------------------------------
# Fused encoder-stack kernel: one grid step == one batch element, all layers
# ----------------------------------------------------------------------------
def _layernorm(x, g, b):
    mu = jnp.mean(x, axis=-1, keepdims=True)
    var = jnp.mean((x - mu) ** 2, axis=-1, keepdims=True)
    return (x - mu) * jax.lax.rsqrt(var + LN_EPS) * g + b


def _encoder_stack_kernel(src_ref, pos_ref, kpm_ref, maskb_ref,
                          ln1_ref, wqk_ref, bqk_ref, wv_ref, bv_ref,
                          wo_ref, bo_ref, ln2_ref,
                          w1_ref, b1_ref, w2_ref, b2_ref, lnf_ref,
                          out_ref,
                          *, nhead, num_layers, apply_final_norm):
    x = src_ref[0]                                   # (L, E) f32 running activation
    pos = pos_ref[0]                                 # (L, E) f32
    # Additive attention bias, built from O(L^2)+O(L) inputs, shared by heads.
    bias = maskb_ref[...] + kpm_ref[0]               # (L, L) f32
    L, E = x.shape
    hd = E // nhead

    # Layer loop is statically unrolled (num_layers is small); all weight-ref
    # indices are static, all weights already VMEM-resident.
    for layer in range(num_layers):
        # ---------------- self-attention block (pre-norm) ----------------
        src2 = _layernorm(x, ln1_ref[layer, 0:1, :], ln1_ref[layer, 1:2, :])
        qk_in = (src2 + pos).astype(jnp.bfloat16)    # q = k = with_pos_embed(src2, pos)

        qk = jnp.dot(qk_in, wqk_ref[layer],
                     preferred_element_type=jnp.float32) + bqk_ref[layer]
        q_b = qk[:, :E].astype(jnp.bfloat16)         # 1/sqrt(hd) pre-folded into wqk/bqk
        k_b = qk[:, E:].astype(jnp.bfloat16)
        v = jnp.dot(src2.astype(jnp.bfloat16), wv_ref[layer],
                    preferred_element_type=jnp.float32) + bv_ref[layer]
        v_b = v.astype(jnp.bfloat16)

        # Per-head attention (static nhead unroll); head outputs are collected
        # and the out-projection is done ONCE as a dense K=128 matmul.
        heads = []
        for h in range(nhead):
            sl = slice(h * hd, (h + 1) * hd)
            s = jax.lax.dot_general(q_b[:, sl], k_b[:, sl],
                                    (((1,), (1,)), ((), ())),
                                    preferred_element_type=jnp.float32) + bias
            m = jnp.max(s, axis=-1, keepdims=True)
            p = jnp.exp(s - m)
            denom = jnp.sum(p, axis=-1, keepdims=True)
            p = p * pl.reciprocal(denom, approx=True)          # EUP slot
            heads.append(jnp.dot(p.astype(jnp.bfloat16), v_b[:, sl],
                                 preferred_element_type=jnp.float32))
        attn = jnp.concatenate(heads, axis=-1).astype(jnp.bfloat16)   # (L, E)
        attn = jnp.dot(attn, wo_ref[layer],
                       preferred_element_type=jnp.float32) + bo_ref[layer]
        x = x + attn                                 # residual (dropout1 = identity)

        # ---------------- feed-forward block (pre-norm) ----------------
        src2 = _layernorm(x, ln2_ref[layer, 0:1, :], ln2_ref[layer, 1:2, :])
        h1 = jnp.dot(src2.astype(jnp.bfloat16), w1_ref[layer],
                     preferred_element_type=jnp.float32) + b1_ref[layer]
        h1 = jnp.where(h1 >= 0, h1, LEAKY_SLOPE * h1)           # leaky_relu
        ff = jnp.dot(h1.astype(jnp.bfloat16), w2_ref[layer],
                     preferred_element_type=jnp.float32) + b2_ref[layer]
        x = x + ff                                   # residual (dropout2 = identity)

    if apply_final_norm:
        x = _layernorm(x, lnf_ref[0:1, :], lnf_ref[1:2, :])
    out_ref[0] = x


# ----------------------------------------------------------------------------
# Wrapper: TransformerEncoder.forward equivalent (eval mode)
# ----------------------------------------------------------------------------
def transformer_encoder(params, src, *, nhead,
                        mask=None, src_key_padding_mask=None, pos=None):
    """src/pos: (L, B, E).  Returns (L, B, E).  `params` must be pack_params output."""
    L, B, E = src.shape
    num_layers = params['wqk'].shape[0]

    if pos is None:
        pos = jnp.zeros_like(src)

    # One-time layout plumbing outside the kernel: batch-major, f32.
    src_b = jnp.transpose(src, (1, 0, 2)).astype(jnp.float32)     # (B, L, E)
    pos_b = jnp.transpose(pos, (1, 0, 2)).astype(jnp.float32)

    # Bias components (no (B, L, L) materialization).
    if mask is not None:
        mask_bias = mask.astype(jnp.float32) * NEG_INF            # (L, L)
    else:
        mask_bias = jnp.zeros((L, L), jnp.float32)
    if src_key_padding_mask is not None:
        kpm_bias = src_key_padding_mask.astype(jnp.float32)[:, None, :] * NEG_INF
    else:
        kpm_bias = jnp.zeros((B, 1, L), jnp.float32)              # (B, 1, L)

    lnf = params.get('final_ln', None)
    apply_final_norm = lnf is not None
    if lnf is None:
        lnf = jnp.zeros((2, E), jnp.float32)

    kernel = functools.partial(_encoder_stack_kernel, nhead=nhead,
                               num_layers=num_layers,
                               apply_final_norm=apply_final_norm)

    def bspec(arr):       # per-batch tensors: indexed by the batch grid axis
        n = arr.ndim
        return pl.BlockSpec((1,) + tuple(arr.shape[1:]),
                            lambda b, _n=n: (b,) + (0,) * (_n - 1))

    def fullspec(arr):    # VMEM-resident: full array, constant block index
        n = arr.ndim
        return pl.BlockSpec(tuple(arr.shape), lambda b, _n=n: (0,) * _n)

    # TODO(synk): at production sizes (large num_layers*E*F) the fully-resident
    # weight layout may exceed v7x's 64 MiB VMEM; fall back to per-layer
    # streaming (layer grid axis + pl.Buffered(2)) on that generation only.
    out = pl.pallas_call(
        kernel,
        grid=(B,),
        in_specs=[
            bspec(src_b), bspec(pos_b), bspec(kpm_bias), fullspec(mask_bias),
            fullspec(params['ln1']),
            fullspec(params['wqk']), fullspec(params['bqk']),
            fullspec(params['wv']), fullspec(params['bv']),
            fullspec(params['wo']), fullspec(params['bo']),
            fullspec(params['ln2']),
            fullspec(params['w1']), fullspec(params['b1']),
            fullspec(params['w2']), fullspec(params['b2']),
            fullspec(lnf),
        ],
        out_specs=pl.BlockSpec((1, L, E), lambda b: (b, 0, 0)),
        out_shape=jax.ShapeDtypeStruct((B, L, E), jnp.float32),
        compiler_params=pltpu.CompilerParams(
            dimension_semantics=("parallel",)),
    )(src_b, pos_b, kpm_bias, mask_bias,
      params['ln1'], params['wqk'], params['bqk'], params['wv'], params['bv'],
      params['wo'], params['bo'], params['ln2'],
      params['w1'], params['b1'], params['w2'], params['b2'], lnf)

    return jnp.transpose(out, (1, 0, 2))             # back to (L, B, E)


# ----------------------------------------------------------------------------
# Parameters: canonical f32 stacks (x @ W layout), plus kernel packing
# ----------------------------------------------------------------------------
def init_encoder_params(key, num_layers, d_model, nhead, dim_feedforward,
                        with_final_norm=True):
    E, F, nl = d_model, dim_feedforward, num_layers

    def xavier(k, shape, fan_in, fan_out):
        a = math.sqrt(6.0 / (fan_in + fan_out))
        return jax.random.uniform(k, shape, jnp.float32, -a, a)

    k_in, k_wo, k_w1, k_w2, k_b, k_ln = jax.random.split(key, 6)

    # attention in-proj (PyTorch stores (3E, E); pre-transpose to x @ W layout)
    w_in = xavier(k_in, (nl, 3 * E, E), E, 3 * E)
    wq = jnp.swapaxes(w_in[:, :E, :], 1, 2)
    wk = jnp.swapaxes(w_in[:, E:2 * E, :], 1, 2)
    wv = jnp.swapaxes(w_in[:, 2 * E:, :], 1, 2)
    wqk = jnp.concatenate([wq, wk], axis=2)                          # (nl, E, 2E)

    wo = jnp.swapaxes(xavier(k_wo, (nl, E, E), E, E), 1, 2)          # (nl, E, E)
    w1 = jnp.swapaxes(xavier(k_w1, (nl, F, E), E, F), 1, 2)          # (nl, E, F)
    w2 = jnp.swapaxes(xavier(k_w2, (nl, E, F), F, E), 1, 2)          # (nl, F, E)

    bks = jax.random.split(k_b, 5)
    small = lambda k, shape: 0.02 * jax.random.normal(k, shape, jnp.float32)

    lnks = jax.random.split(k_ln, 3)

    def ln_pair(k, n):
        kg, kb = jax.random.split(k)
        g = 1.0 + 0.1 * jax.random.normal(kg, (n, 1, E), jnp.float32)
        b = 0.1 * jax.random.normal(kb, (n, 1, E), jnp.float32)
        return jnp.concatenate([g, b], axis=1)                       # (n, 2, E)

    params = dict(
        ln1=ln_pair(lnks[0], nl), ln2=ln_pair(lnks[1], nl),
        wqk=wqk, bqk=small(bks[0], (nl, 1, 2 * E)),
        wv=wv, bv=small(bks[1], (nl, 1, E)),
        wo=wo, bo=small(bks[2], (nl, 1, E)),
        w1=w1, b1=small(bks[3], (nl, 1, F)),
        w2=w2, b2=small(bks[4], (nl, 1, E)),
    )
    if with_final_norm:
        params['final_ln'] = ln_pair(lnks[2], 1)[0]                  # (2, E)
    return params


def pack_params(params, nhead):
    """Fold 1/sqrt(hd) into the q half of the in-proj, cast matmul weights bf16."""
    E = params['wv'].shape[1]
    hd = E // nhead
    scale = 1.0 / math.sqrt(hd)
    qscale = jnp.concatenate([jnp.full((E,), scale, jnp.float32),
                              jnp.ones((E,), jnp.float32)])          # (2E,)
    packed = dict(params)
    packed['wqk'] = (params['wqk'] * qscale).astype(jnp.bfloat16)
    packed['bqk'] = params['bqk'] * qscale                            # bias stays f32
    packed['wv'] = params['wv'].astype(jnp.bfloat16)
    packed['wo'] = params['wo'].astype(jnp.bfloat16)
    packed['w1'] = params['w1'].astype(jnp.bfloat16)
    packed['w2'] = params['w2'].astype(jnp.bfloat16)
    return packed


# ----------------------------------------------------------------------------
# Pure-JAX reference (f32, exact softmax divide) for a sanity check
# ----------------------------------------------------------------------------
def transformer_encoder_ref(params, src, *, nhead, mask=None,
                            src_key_padding_mask=None, pos=None):
    L, B, E = src.shape
    nl = params['wqk'].shape[0]
    hd = E // nhead
    scale = 1.0 / math.sqrt(hd)
    if pos is None:
        pos = jnp.zeros_like(src)

    bias = jnp.zeros((B, L, L), jnp.float32)
    if mask is not None:
        bias = bias + mask[None, :, :] * NEG_INF
    if src_key_padding_mask is not None:
        bias = bias + src_key_padding_mask[:, None, :] * NEG_INF

    def ln(x, g, b):
        mu = x.mean(-1, keepdims=True)
        var = ((x - mu) ** 2).mean(-1, keepdims=True)
        return (x - mu) * jax.lax.rsqrt(var + LN_EPS) * g + b

    x = jnp.transpose(src, (1, 0, 2)).astype(jnp.float32)            # (B, L, E)
    p = jnp.transpose(pos, (1, 0, 2)).astype(jnp.float32)
    for i in range(nl):
        src2 = ln(x, params['ln1'][i, 0], params['ln1'][i, 1])
        qk_in = src2 + p
        qk = qk_in @ params['wqk'][i] + params['bqk'][i]
        q = (qk[..., :E] * scale).reshape(B, L, nhead, hd).transpose(0, 2, 1, 3)
        k = qk[..., E:].reshape(B, L, nhead, hd).transpose(0, 2, 1, 3)
        v = (src2 @ params['wv'][i] + params['bv'][i]).reshape(B, L, nhead, hd)
        v = v.transpose(0, 2, 1, 3)
        s = jnp.einsum('bhld,bhmd->bhlm', q, k) + bias[:, None]
        w = jax.nn.softmax(s, axis=-1)
        o = jnp.einsum('bhlm,bhmd->bhld', w, v).transpose(0, 2, 1, 3).reshape(B, L, E)
        x = x + (o @ params['wo'][i] + params['bo'][i])
        src2 = ln(x, params['ln2'][i, 0], params['ln2'][i, 1])
        h1 = src2 @ params['w1'][i] + params['b1'][i]
        h1 = jnp.where(h1 >= 0, h1, LEAKY_SLOPE * h1)
        x = x + (h1 @ params['w2'][i] + params['b2'][i])
    if 'final_ln' in params:
        x = ln(x, params['final_ln'][0], params['final_ln'][1])
    return jnp.transpose(x, (1, 0, 2))


# ----------------------------------------------------------------------------
if __name__ == "__main__":
    L, B = 16, 2                      # sequence length, batch (B=2 -> both v7x TCs)
    E, nhead, F = 128, 8, 256         # lane-dense hidden / FFN widths
    num_layers = 3

    root = jax.random.PRNGKey(0)
    kp, ks, kpos = jax.random.split(root, 3)

    params = init_encoder_params(kp, num_layers, E, nhead, F, with_final_norm=True)
    packed = pack_params(params, nhead)

    src = jax.random.normal(ks, (L, B, E), jnp.float32)
    pos = 0.1 * jax.random.normal(kpos, (L, B, E), jnp.float32)
    attn_mask = jnp.eye(L, dtype=jnp.float32)                 # HANet-style self-exclusion
    key_padding_mask = jnp.zeros((B, L), jnp.float32).at[1, L - 2:].set(1.0)

    fwd = jax.jit(functools.partial(transformer_encoder, nhead=nhead))
    out = fwd(packed, src, mask=attn_mask,
              src_key_padding_mask=key_padding_mask, pos=pos)
    out = jax.block_until_ready(out)

    assert out.shape == (L, B, E)
    assert bool(jnp.all(jnp.isfinite(out)))

    ref = transformer_encoder_ref(params, src, nhead=nhead, mask=attn_mask,
                                  src_key_padding_mask=key_padding_mask, pos=pos)
    max_err = float(jnp.max(jnp.abs(out - ref)))
    assert max_err < 5e-2, f"mismatch vs reference: max |err| = {max_err}"

    print("KERNEL_OK")
</pallas_src>

<mosaic_0001>
module attributes {stable_mosaic.version = 11 : i64} {
  func.func @_encoder_stack_kernel(%arg0: i32, %arg1: memref<1x16x128xf32, #tpu.memory_space<vmem>>, %arg2: memref<1x16x128xf32, #tpu.memory_space<vmem>>, %arg3: memref<1x1x16xf32, #tpu.memory_space<vmem>>, %arg4: memref<16x16xf32, #tpu.memory_space<vmem>>, %arg5: memref<3x2x128xf32, #tpu.memory_space<vmem>>, %arg6: memref<3x128x256xbf16, #tpu.memory_space<vmem>>, %arg7: memref<3x1x256xf32, #tpu.memory_space<vmem>>, %arg8: memref<3x128x128xbf16, #tpu.memory_space<vmem>>, %arg9: memref<3x1x128xf32, #tpu.memory_space<vmem>>, %arg10: memref<3x128x128xbf16, #tpu.memory_space<vmem>>, %arg11: memref<3x1x128xf32, #tpu.memory_space<vmem>>, %arg12: memref<3x2x128xf32, #tpu.memory_space<vmem>>, %arg13: memref<3x128x256xbf16, #tpu.memory_space<vmem>>, %arg14: memref<3x1x256xf32, #tpu.memory_space<vmem>>, %arg15: memref<3x256x128xbf16, #tpu.memory_space<vmem>>, %arg16: memref<3x1x128xf32, #tpu.memory_space<vmem>>, %arg17: memref<2x128xf32, #tpu.memory_space<vmem>>, %arg18: memref<1x16x128xf32, #tpu.memory_space<vmem>>) attributes {dimension_semantics = [#tpu.dimension_semantics<parallel>], iteration_bounds = array<i64: 2>, scalar_prefetch = 0 : i64, scratch_operands = 0 : i64, tpu.core_type = #tpu.core_type<tc>, window_params = [{transform_indices = @transform_0, window_bounds = array<i64: 1, 16, 128>}, {transform_indices = @transform_1, window_bounds = array<i64: 1, 16, 128>}, {transform_indices = @transform_2, window_bounds = array<i64: 1, 1, 16>}, {pipeline_mode = #tpu.pipeline_mode<synchronous>, transform_indices = @transform_3, window_bounds = array<i64: 16, 16>}, {pipeline_mode = #tpu.pipeline_mode<synchronous>, transform_indices = @transform_4, window_bounds = array<i64: 3, 2, 128>}, {pipeline_mode = #tpu.pipeline_mode<synchronous>, transform_indices = @transform_5, window_bounds = array<i64: 3, 128, 256>}, {pipeline_mode = #tpu.pipeline_mode<synchronous>, transform_indices = @transform_6, window_bounds = array<i64: 3, 1, 256>}, {pipeline_mode = #tpu.pipeline_mode<synchronous>, transform_indices = @transform_7, window_bounds = array<i64: 3, 128, 128>}, {pipeline_mode = #tpu.pipeline_mode<synchronous>, transform_indices = @transform_8, window_bounds = array<i64: 3, 1, 128>}, {pipeline_mode = #tpu.pipeline_mode<synchronous>, transform_indices = @transform_9, window_bounds = array<i64: 3, 128, 128>}, {pipeline_mode = #tpu.pipeline_mode<synchronous>, transform_indices = @transform_10, window_bounds = array<i64: 3, 1, 128>}, {pipeline_mode = #tpu.pipeline_mode<synchronous>, transform_indices = @transform_11, window_bounds = array<i64: 3, 2, 128>}, {pipeline_mode = #tpu.pipeline_mode<synchronous>, transform_indices = @transform_12, window_bounds = array<i64: 3, 128, 256>}, {pipeline_mode = #tpu.pipeline_mode<synchronous>, transform_indices = @transform_13, window_bounds = array<i64: 3, 1, 256>}, {pipeline_mode = #tpu.pipeline_mode<synchronous>, transform_indices = @transform_14, window_bounds = array<i64: 3, 256, 128>}, {pipeline_mode = #tpu.pipeline_mode<synchronous>, transform_indices = @transform_15, window_bounds = array<i64: 3, 1, 128>}, {pipeline_mode = #tpu.pipeline_mode<synchronous>, transform_indices = @transform_16, window_bounds = array<i64: 2, 128>}, {transform_indices = @transform_17, window_bounds = array<i64: 1, 16, 128>}]} {
    %c0 = arith.constant 0 : index
    %c0_0 = arith.constant 0 : index
    %c0_1 = arith.constant 0 : index
    %0 = vector.load %arg1[%c0, %c0_0, %c0_1] : memref<1x16x128xf32, #tpu.memory_space<vmem>>, vector<1x16x128xf32>
    %1 = vector.shape_cast %0 : vector<1x16x128xf32> to vector<16x128xf32>
    %c0_2 = arith.constant 0 : index
    %c0_3 = arith.constant 0 : index
    %c0_4 = arith.constant 0 : index
    %2 = vector.load %arg2[%c0_2, %c0_3, %c0_4] : memref<1x16x128xf32, #tpu.memory_space<vmem>>, vector<1x16x128xf32>
    %3 = vector.shape_cast %2 : vector<1x16x128xf32> to vector<16x128xf32>
    %c0_5 = arith.constant 0 : index
    %c0_6 = arith.constant 0 : index
    %4 = vector.load %arg4[%c0_5, %c0_6] : memref<16x16xf32, #tpu.memory_space<vmem>>, vector<16x16xf32>
    %c0_7 = arith.constant 0 : index
    %c0_8 = arith.constant 0 : index
    %c0_9 = arith.constant 0 : index
    %5 = vector.load %arg3[%c0_7, %c0_8, %c0_9] : memref<1x1x16xf32, #tpu.memory_space<vmem>>, vector<1x1x16xf32>
    %6 = vector.shape_cast %5 : vector<1x1x16xf32> to vector<1x16xf32>
    %7 = vector.broadcast %6 : vector<1x16xf32> to vector<16x16xf32>
    %8 = arith.addf %4, %7 : vector<16x16xf32>
    %c0_10 = arith.constant 0 : index
    %c0_11 = arith.constant 0 : index
    %c0_12 = arith.constant 0 : index
    %9 = vector.load %arg5[%c0_10, %c0_11, %c0_12] : memref<3x2x128xf32, #tpu.memory_space<vmem>>, vector<1x1x128xf32>
    %10 = vector.shape_cast %9 : vector<1x1x128xf32> to vector<1x128xf32>
    %c0_13 = arith.constant 0 : index
    %c1 = arith.constant 1 : index
    %c0_14 = arith.constant 0 : index
    %11 = vector.load %arg5[%c0_13, %c1, %c0_14] : memref<3x2x128xf32, #tpu.memory_space<vmem>>, vector<1x1x128xf32>
    %12 = vector.shape_cast %11 : vector<1x1x128xf32> to vector<1x128xf32>
    %cst = arith.constant dense<0.000000e+00> : vector<16xf32>
    %13 = vector.multi_reduction <add>, %1, %cst [1] : vector<16x128xf32> to vector<16xf32>
    %14 = vector.shape_cast %13 : vector<16xf32> to vector<16x1xf32>
    %cst_15 = arith.constant 1.280000e+02 : f32
    %15 = vector.broadcast %cst_15 : f32 to vector<16x1xf32>
    %16 = arith.divf %14, %15 : vector<16x1xf32>
    %17 = vector.broadcast %16 : vector<16x1xf32> to vector<16x128xf32>
    %18 = arith.subf %1, %17 : vector<16x128xf32>
    %19 = arith.mulf %18, %18 : vector<16x128xf32>
    %cst_16 = arith.constant dense<0.000000e+00> : vector<16xf32>
    %20 = vector.multi_reduction <add>, %19, %cst_16 [1] : vector<16x128xf32> to vector<16xf32>
    %21 = vector.shape_cast %20 : vector<16xf32> to vector<16x1xf32>
    %cst_17 = arith.constant 1.280000e+02 : f32
    %22 = vector.broadcast %cst_17 : f32 to vector<16x1xf32>
    %23 = arith.divf %21, %22 : vector<16x1xf32>
    %24 = vector.broadcast %16 : vector<16x1xf32> to vector<16x128xf32>
    %25 = arith.subf %1, %24 : vector<16x128xf32>
    %cst_18 = arith.constant 9.99999974E-6 : f32
    %26 = vector.broadcast %cst_18 : f32 to vector<16x1xf32>
    %27 = arith.addf %23, %26 : vector<16x1xf32>
    %28 = math.rsqrt %27 : vector<16x1xf32>
    %29 = vector.broadcast %28 : vector<16x1xf32> to vector<16x128xf32>
    %30 = arith.mulf %25, %29 : vector<16x128xf32>
    %31 = vector.broadcast %10 : vector<1x128xf32> to vector<16x128xf32>
    %32 = arith.mulf %30, %31 : vector<16x128xf32>
    %33 = vector.broadcast %12 : vector<1x128xf32> to vector<16x128xf32>
    %34 = arith.addf %32, %33 : vector<16x128xf32>
    %35 = arith.addf %34, %3 : vector<16x128xf32>
    %36 = arith.truncf %35 : vector<16x128xf32> to vector<16x128xbf16>
    %c0_19 = arith.constant 0 : index
    %c0_20 = arith.constant 0 : index
    %c0_21 = arith.constant 0 : index
    %37 = vector.load %arg6[%c0_19, %c0_20, %c0_21] : memref<3x128x256xbf16, #tpu.memory_space<vmem>>, vector<1x128x256xbf16>
    %38 = vector.shape_cast %37 : vector<1x128x256xbf16> to vector<128x256xbf16>
    %cst_22 = arith.constant dense<0.000000e+00> : vector<16x256xf32>
    %39 = tpu.matmul %36, %38, %cst_22 {dimension_numbers = #tpu.dot_dimension_numbers<[1], [0], [0], [1], [0, 0, 1, 1], [], []>} : vector<16x128xbf16>, vector<128x256xbf16>, vector<16x256xf32> -> vector<16x256xf32>
    %c0_23 = arith.constant 0 : index
    %c0_24 = arith.constant 0 : index
    %c0_25 = arith.constant 0 : index
    %40 = vector.load %arg7[%c0_23, %c0_24, %c0_25] : memref<3x1x256xf32, #tpu.memory_space<vmem>>, vector<1x1x256xf32>
    %41 = vector.shape_cast %40 : vector<1x1x256xf32> to vector<1x256xf32>
    %42 = vector.broadcast %41 : vector<1x256xf32> to vector<16x256xf32>
    %43 = arith.addf %39, %42 : vector<16x256xf32>
    %44 = vector.extract_strided_slice %43 {offsets = [0, 0], sizes = [16, 128], strides = [1, 1]} : vector<16x256xf32> to vector<16x128xf32>
    %45 = arith.truncf %44 : vector<16x128xf32> to vector<16x128xbf16>
    %46 = vector.extract_strided_slice %43 {offsets = [0, 128], sizes = [16, 128], strides = [1, 1]} : vector<16x256xf32> to vector<16x128xf32>
    %47 = arith.truncf %46 : vector<16x128xf32> to vector<16x128xbf16>
    %48 = arith.truncf %34 : vector<16x128xf32> to vector<16x128xbf16>
    %c0_26 = arith.constant 0 : index
    %c0_27 = arith.constant 0 : index
    %c0_28 = arith.constant 0 : index
    %49 = vector.load %arg8[%c0_26, %c0_27, %c0_28] : memref<3x128x128xbf16, #tpu.memory_space<vmem>>, vector<1x128x128xbf16>
    %50 = vector.shape_cast %49 : vector<1x128x128xbf16> to vector<128x128xbf16>
    %cst_29 = arith.constant dense<0.000000e+00> : vector<16x128xf32>
    %51 = tpu.matmul %48, %50, %cst_29 {dimension_numbers = #tpu.dot_dimension_numbers<[1], [0], [0], [1], [0, 0, 1, 1], [], []>} : vector<16x128xbf16>, vector<128x128xbf16>, vector<16x128xf32> -> vector<16x128xf32>
    %c0_30 = arith.constant 0 : index
    %c0_31 = arith.constant 0 : index
    %c0_32 = arith.constant 0 : index
    %52 = vector.load %arg9[%c0_30, %c0_31, %c0_32] : memref<3x1x128xf32, #tpu.memory_space<vmem>>, vector<1x1x128xf32>
    %53 = vector.shape_cast %52 : vector<1x1x128xf32> to vector<1x128xf32>
    %54 = vector.broadcast %53 : vector<1x128xf32> to vector<16x128xf32>
    %55 = arith.addf %51, %54 : vector<16x128xf32>
    %56 = arith.truncf %55 : vector<16x128xf32> to vector<16x128xbf16>
    %57 = vector.extract_strided_slice %45 {offsets = [0, 0], sizes = [16, 16], strides = [1, 1]} : vector<16x128xbf16> to vector<16x16xbf16>
    %58 = vector.extract_strided_slice %47 {offsets = [0, 0], sizes = [16, 16], strides = [1, 1]} : vector<16x128xbf16> to vector<16x16xbf16>
    %cst_33 = arith.constant dense<0.000000e+00> : vector<16x16xf32>
    %59 = tpu.matmul %57, %58, %cst_33 {dimension_numbers = #tpu.dot_dimension_numbers<[1], [1], [0], [0], [0, 0, 1, 0], [], []>} : vector<16x16xbf16>, vector<16x16xbf16>, vector<16x16xf32> -> vector<16x16xf32>
    %60 = arith.addf %59, %8 : vector<16x16xf32>
    %cst_34 = arith.constant dense<0xFF800000> : vector<16xf32>
    %61 = vector.multi_reduction <maximumf>, %60, %cst_34 [1] : vector<16x16xf32> to vector<16xf32>
    %62 = vector.shape_cast %61 : vector<16xf32> to vector<16x1xf32>
    %63 = vector.broadcast %62 : vector<16x1xf32> to vector<16x16xf32>
    %64 = arith.subf %60, %63 : vector<16x16xf32>
    %65 = math.exp %64 : vector<16x16xf32>
    %cst_35 = arith.constant dense<0.000000e+00> : vector<16xf32>
    %66 = vector.multi_reduction <add>, %65, %cst_35 [1] : vector<16x16xf32> to vector<16xf32>
    %67 = vector.shape_cast %66 : vector<16xf32> to vector<16x1xf32>
    %68 = tpu.reciprocal %67 {approx = true} : vector<16x1xf32> -> vector<16x1xf32>
    %69 = vector.broadcast %68 : vector<16x1xf32> to vector<16x16xf32>
    %70 = arith.mulf %65, %69 : vector<16x16xf32>
    %71 = arith.truncf %70 : vector<16x16xf32> to vector<16x16xbf16>
    %72 = vector.extract_strided_slice %56 {offsets = [0, 0], sizes = [16, 16], strides = [1, 1]} : vector<16x128xbf16> to vector<16x16xbf16>
    %cst_36 = arith.constant dense<0.000000e+00> : vector<16x16xf32>
    %73 = tpu.matmul %71, %72, %cst_36 {dimension_numbers = #tpu.dot_dimension_numbers<[1], [0], [0], [1], [0, 0, 1, 1], [], []>} : vector<16x16xbf16>, vector<16x16xbf16>, vector<16x16xf32> -> vector<16x16xf32>
    %74 = vector.extract_strided_slice %45 {offsets = [0, 16], sizes = [16, 16], strides = [1, 1]} : vector<16x128xbf16> to vector<16x16xbf16>
    %75 = vector.extract_strided_slice %47 {offsets = [0, 16], sizes = [16, 16], strides = [1, 1]} : vector<16x128xbf16> to vector<16x16xbf16>
    %cst_37 = arith.constant dense<0.000000e+00> : vector<16x16xf32>
    %76 = tpu.matmul %74, %75, %cst_37 {dimension_numbers = #tpu.dot_dimension_numbers<[1], [1], [0], [0], [0, 0, 1, 0], [], []>} : vector<16x16xbf16>, vector<16x16xbf16>, vector<16x16xf32> -> vector<16x16xf32>
    %77 = arith.addf %76, %8 : vector<16x16xf32>
    %cst_38 = arith.constant dense<0xFF800000> : vector<16xf32>
    %78 = vector.multi_reduction <maximumf>, %77, %cst_38 [1] : vector<16x16xf32> to vector<16xf32>
    %79 = vector.shape_cast %78 : vector<16xf32> to vector<16x1xf32>
    %80 = vector.broadcast %79 : vector<16x1xf32> to vector<16x16xf32>
    %81 = arith.subf %77, %80 : vector<16x16xf32>
    %82 = math.exp %81 : vector<16x16xf32>
    %cst_39 = arith.constant dense<0.000000e+00> : vector<16xf32>
    %83 = vector.multi_reduction <add>, %82, %cst_39 [1] : vector<16x16xf32> to vector<16xf32>
    %84 = vector.shape_cast %83 : vector<16xf32> to vector<16x1xf32>
    %85 = tpu.reciprocal %84 {approx = true} : vector<16x1xf32> -> vector<16x1xf32>
    %86 = vector.broadcast %85 : vector<16x1xf32> to vector<16x16xf32>
    %87 = arith.mulf %82, %86 : vector<16x16xf32>
    %88 = arith.truncf %87 : vector<16x16xf32> to vector<16x16xbf16>
    %89 = vector.extract_strided_slice %56 {offsets = [0, 16], sizes = [16, 16], strides = [1, 1]} : vector<16x128xbf16> to vector<16x16xbf16>
    %cst_40 = arith.constant dense<0.000000e+00> : vector<16x16xf32>
    %90 = tpu.matmul %88, %89, %cst_40 {dimension_numbers = #tpu.dot_dimension_numbers<[1], [0], [0], [1], [0, 0, 1, 1], [], []>} : vector<16x16xbf16>, vector<16x16xbf16>, vector<16x16xf32> -> vector<16x16xf32>
    %91 = vector.extract_strided_slice %45 {offsets = [0, 32], sizes = [16, 16], strides = [1, 1]} : vector<16x128xbf16> to vector<16x16xbf16>
    %92 = vector.extract_strided_slice %47 {offsets = [0, 32], sizes = [16, 16], strides = [1, 1]} : vector<16x128xbf16> to vector<16x16xbf16>
    %cst_41 = arith.constant dense<0.000000e+00> : vector<16x16xf32>
    %93 = tpu.matmul %91, %92, %cst_41 {dimension_numbers = #tpu.dot_dimension_numbers<[1], [1], [0], [0], [0, 0, 1, 0], [], []>} : vector<16x16xbf16>, vector<16x16xbf16>, vector<16x16xf32> -> vector<16x16xf32>
    %94 = arith.addf %93, %8 : vector<16x16xf32>
    %cst_42 = arith.constant dense<0xFF800000> : vector<16xf32>
    %95 = vector.multi_reduction <maximumf>, %94, %cst_42 [1] : vector<16x16xf32> to vector<16xf32>
    %96 = vector.shape_cast %95 : vector<16xf32> to vector<16x1xf32>
    %97 = vector.broadcast %96 : vector<16x1xf32> to vector<16x16xf32>
    %98 = arith.subf %94, %97 : vector<16x16xf32>
    %99 = math.exp %98 : vector<16x16xf32>
    %cst_43 = arith.constant dense<0.000000e+00> : vector<16xf32>
    %100 = vector.multi_reduction <add>, %99, %cst_43 [1] : vector<16x16xf32> to vector<16xf32>
    %101 = vector.shape_cast %100 : vector<16xf32> to vector<16x1xf32>
    %102 = tpu.reciprocal %101 {approx = true} : vector<16x1xf32> -> vector<16x1xf32>
    %103 = vector.broadcast %102 : vector<16x1xf32> to vector<16x16xf32>
    %104 = arith.mulf %99, %103 : vector<16x16xf32>
    %105 = arith.truncf %104 : vector<16x16xf32> to vector<16x16xbf16>
    %106 = vector.extract_strided_slice %56 {offsets = [0, 32], sizes = [16, 16], strides = [1, 1]} : vector<16x128xbf16> to vector<16x16xbf16>
    %cst_44 = arith.constant dense<0.000000e+00> : vector<16x16xf32>
    %107 = tpu.matmul %105, %106, %cst_44 {dimension_numbers = #tpu.dot_dimension_numbers<[1], [0], [0], [1], [0, 0, 1, 1], [], []>} : vector<16x16xbf16>, vector<16x16xbf16>, vector<16x16xf32> -> vector<16x16xf32>
    %108 = vector.extract_strided_slice %45 {offsets = [0, 48], sizes = [16, 16], strides = [1, 1]} : vector<16x128xbf16> to vector<16x16xbf16>
    %109 = vector.extract_strided_slice %47 {offsets = [0, 48], sizes = [16, 16], strides = [1, 1]} : vector<16x128xbf16> to vector<16x16xbf16>
    %cst_45 = arith.constant dense<0.000000e+00> : vector<16x16xf32>
    %110 = tpu.matmul %108, %109, %cst_45 {dimension_numbers = #tpu.dot_dimension_numbers<[1], [1], [0], [0], [0, 0, 1, 0], [], []>} : vector<16x16xbf16>, vector<16x16xbf16>, vector<16x16xf32> -> vector<16x16xf32>
    %111 = arith.addf %110, %8 : vector<16x16xf32>
    %cst_46 = arith.constant dense<0xFF800000> : vector<16xf32>
    %112 = vector.multi_reduction <maximumf>, %111, %cst_46 [1] : vector<16x16xf32> to vector<16xf32>
    %113 = vector.shape_cast %112 : vector<16xf32> to vector<16x1xf32>
    %114 = vector.broadcast %113 : vector<16x1xf32> to vector<16x16xf32>
    %115 = arith.subf %111, %114 : vector<16x16xf32>
    %116 = math.exp %115 : vector<16x16xf32>
    %cst_47 = arith.constant dense<0.000000e+00> : vector<16xf32>
    %117 = vector.multi_reduction <add>, %116, %cst_47 [1] : vector<16x16xf32> to vector<16xf32>
    %118 = vector.shape_cast %117 : vector<16xf32> to vector<16x1xf32>
    %119 = tpu.reciprocal %118 {approx = true} : vector<16x1xf32> -> vector<16x1xf32>
    %120 = vector.broadcast %119 : vector<16x1xf32> to vector<16x16xf32>
    %121 = arith.mulf %116, %120 : vector<16x16xf32>
    %122 = arith.truncf %121 : vector<16x16xf32> to vector<16x16xbf16>
    %123 = vector.extract_strided_slice %56 {offsets = [0, 48], sizes = [16, 16], strides = [1, 1]} : vector<16x128xbf16> to vector<16x16xbf16>
    %cst_48 = arith.constant dense<0.000000e+00> : vector<16x16xf32>
    %124 = tpu.matmul %122, %123, %cst_48 {dimension_numbers = #tpu.dot_dimension_numbers<[1], [0], [0], [1], [0, 0, 1, 1], [], []>} : vector<16x16xbf16>, vector<16x16xbf16>, vector<16x16xf32> -> vector<16x16xf32>
    %125 = vector.extract_strided_slice %45 {offsets = [0, 64], sizes = [16, 16], strides = [1, 1]} : vector<16x128xbf16> to vector<16x16xbf16>
    %126 = vector.extract_strided_slice %47 {offsets = [0, 64], sizes = [16, 16], strides = [1, 1]} : vector<16x128xbf16> to vector<16x16xbf16>
    %cst_49 = arith.constant dense<0.000000e+00> : vector<16x16xf32>
    %127 = tpu.matmul %125, %126, %cst_49 {dimension_numbers = #tpu.dot_dimension_numbers<[1], [1], [0], [0], [0, 0, 1, 0], [], []>} : vector<16x16xbf16>, vector<16x16xbf16>, vector<16x16xf32> -> vector<16x16xf32>
    %128 = arith.addf %127, %8 : vector<16x16xf32>
    %cst_50 = arith.constant dense<0xFF800000> : vector<16xf32>
    %129 = vector.multi_reduction <maximumf>, %128, %cst_50 [1] : vector<16x16xf32> to vector<16xf32>
    %130 = vector.shape_cast %129 : vector<16xf32> to vector<16x1xf32>
    %131 = vector.broadcast %130 : vector<16x1xf32> to vector<16x16xf32>
    %132 = arith.subf %128, %131 : vector<16x16xf32>
    %133 = math.exp %132 : vector<16x16xf32>
    %cst_51 = arith.constant dense<0.000000e+00> : vector<16xf32>
    %134 = vector.multi_reduction <add>, %133, %cst_51 [1] : vector<16x16xf32> to vector<16xf32>
    %135 = vector.shape_cast %134 : vector<16xf32> to vector<16x1xf32>
    %136 = tpu.reciprocal %135 {approx = true} : vector<16x1xf32> -> vector<16x1xf32>
    %137 = vector.broadcast %136 : vector<16x1xf32> to vector<16x16xf32>
    %138 = arith.mulf %133, %137 : vector<16x16xf32>
    %139 = arith.truncf %138 : vector<16x16xf32> to vector<16x16xbf16>
    %140 = vector.extract_strided_slice %56 {offsets = [0, 64], sizes = [16, 16], strides = [1, 1]} : vector<16x128xbf16> to vector<16x16xbf16>
    %cst_52 = arith.constant dense<0.000000e+00> : vector<16x16xf32>
    %141 = tpu.matmul %139, %140, %cst_52 {dimension_numbers = #tpu.dot_dimension_numbers<[1], [0], [0], [1], [0, 0, 1, 1], [], []>} : vector<16x16xbf16>, vector<16x16xbf16>, vector<16x16xf32> -> vector<16x16xf32>
    %142 = vector.extract_strided_slice %45 {offsets = [0, 80], sizes = [16, 16], strides = [1, 1]} : vector<16x128xbf16> to vector<16x16xbf16>
    %143 = vector.extract_strided_slice %47 {offsets = [0, 80], sizes = [16, 16], strides = [1, 1]} : vector<16x128xbf16> to vector<16x16xbf16>
    %cst_53 = arith.constant dense<0.000000e+00> : vector<16x16xf32>
    %144 = tpu.matmul %142, %143, %cst_53 {dimension_numbers = #tpu.dot_dimension_numbers<[1], [1], [0], [0], [0, 0, 1, 0], [], []>} : vector<16x16xbf16>, vector<16x16xbf16>, vector<16x16xf32> -> vector<16x16xf32>
    %145 = arith.addf %144, %8 : vector<16x16xf32>
    %cst_54 = arith.constant dense<0xFF800000> : vector<16xf32>
    %146 = vector.multi_reduction <maximumf>, %145, %cst_54 [1] : vector<16x16xf32> to vector<16xf32>
    %147 = vector.shape_cast %146 : vector<16xf32> to vector<16x1xf32>
    %148 = vector.broadcast %147 : vector<16x1xf32> to vector<16x16xf32>
    %149 = arith.subf %145, %148 : vector<16x16xf32>
    %150 = math.exp %149 : vector<16x16xf32>
    %cst_55 = arith.constant dense<0.000000e+00> : vector<16xf32>
    %151 = vector.multi_reduction <add>, %150, %cst_55 [1] : vector<16x16xf32> to vector<16xf32>
    %152 = vector.shape_cast %151 : vector<16xf32> to vector<16x1xf32>
    %153 = tpu.reciprocal %152 {approx = true} : vector<16x1xf32> -> vector<16x1xf32>
    %154 = vector.broadcast %153 : vector<16x1xf32> to vector<16x16xf32>
    %155 = arith.mulf %150, %154 : vector<16x16xf32>
    %156 = arith.truncf %155 : vector<16x16xf32> to vector<16x16xbf16>
    %157 = vector.extract_strided_slice %56 {offsets = [0, 80], sizes = [16, 16], strides = [1, 1]} : vector<16x128xbf16> to vector<16x16xbf16>
    %cst_56 = arith.constant dense<0.000000e+00> : vector<16x16xf32>
    %158 = tpu.matmul %156, %157, %cst_56 {dimension_numbers = #tpu.dot_dimension_numbers<[1], [0], [0], [1], [0, 0, 1, 1], [], []>} : vector<16x16xbf16>, vector<16x16xbf16>, vector<16x16xf32> -> vector<16x16xf32>
    %159 = vector.extract_strided_slice %45 {offsets = [0, 96], sizes = [16, 16], strides = [1, 1]} : vector<16x128xbf16> to vector<16x16xbf16>
    %160 = vector.extract_strided_slice %47 {offsets = [0, 96], sizes = [16, 16], strides = [1, 1]} : vector<16x128xbf16> to vector<16x16xbf16>
    %cst_57 = arith.constant dense<0.000000e+00> : vector<16x16xf32>
    %161 = tpu.matmul %159, %160, %cst_57 {dimension_numbers = #tpu.dot_dimension_numbers<[1], [1], [0], [0], [0, 0, 1, 0], [], []>} : vector<16x16xbf16>, vector<16x16xbf16>, vector<16x16xf32> -> vector<16x16xf32>
    %162 = arith.addf %161, %8 : vector<16x16xf32>
    %cst_58 = arith.constant dense<0xFF800000> : vector<16xf32>
    %163 = vector.multi_reduction <maximumf>, %162, %cst_58 [1] : vector<16x16xf32> to vector<16xf32>
    %164 = vector.shape_cast %163 : vector<16xf32> to vector<16x1xf32>
    %165 = vector.broadcast %164 : vector<16x1xf32> to vector<16x16xf32>
    %166 = arith.subf %162, %165 : vector<16x16xf32>
    %167 = math.exp %166 : vector<16x16xf32>
    %cst_59 = arith.constant dense<0.000000e+00> : vector<16xf32>
    %168 = vector.multi_reduction <add>, %167, %cst_59 [1] : vector<16x16xf32> to vector<16xf32>
    %169 = vector.shape_cast %168 : vector<16xf32> to vector<16x1xf32>
    %170 = tpu.reciprocal %169 {approx = true} : vector<16x1xf32> -> vector<16x1xf32>
    %171 = vector.broadcast %170 : vector<16x1xf32> to vector<16x16xf32>
    %172 = arith.mulf %167, %171 : vector<16x16xf32>
    %173 = arith.truncf %172 : vector<16x16xf32> to vector<16x16xbf16>
    %174 = vector.extract_strided_slice %56 {offsets = [0, 96], sizes = [16, 16], strides = [1, 1]} : vector<16x128xbf16> to vector<16x16xbf16>
    %cst_60 = arith.constant dense<0.000000e+00> : vector<16x16xf32>
    %175 = tpu.matmul %173, %174, %cst_60 {dimension_numbers = #tpu.dot_dimension_numbers<[1], [0], [0], [1], [0, 0, 1, 1], [], []>} : vector<16x16xbf16>, vector<16x16xbf16>, vector<16x16xf32> -> vector<16x16xf32>
    %176 = vector.extract_strided_slice %45 {offsets = [0, 112], sizes = [16, 16], strides = [1, 1]} : vector<16x128xbf16> to vector<16x16xbf16>
    %177 = vector.extract_strided_slice %47 {offsets = [0, 112], sizes = [16, 16], strides = [1, 1]} : vector<16x128xbf16> to vector<16x16xbf16>
    %cst_61 = arith.constant dense<0.000000e+00> : vector<16x16xf32>
    %178 = tpu.matmul %176, %177, %cst_61 {dimension_numbers = #tpu.dot_dimension_numbers<[1], [1], [0], [0], [0, 0, 1, 0], [], []>} : vector<16x16xbf16>, vector<16x16xbf16>, vector<16x16xf32> -> vector<16x16xf32>
    %179 = arith.addf %178, %8 : vector<16x16xf32>
    %cst_62 = arith.constant dense<0xFF800000> : vector<16xf32>
    %180 = vector.multi_reduction <maximumf>, %179, %cst_62 [1] : vector<16x16xf32> to vector<16xf32>
    %181 = vector.shape_cast %180 : vector<16xf32> to vector<16x1xf32>
    %182 = vector.broadcast %181 : vector<16x1xf32> to vector<16x16xf32>
    %183 = arith.subf %179, %182 : vector<16x16xf32>
    %184 = math.exp %183 : vector<16x16xf32>
    %cst_63 = arith.constant dense<0.000000e+00> : vector<16xf32>
    %185 = vector.multi_reduction <add>, %184, %cst_63 [1] : vector<16x16xf32> to vector<16xf32>
    %186 = vector.shape_cast %185 : vector<16xf32> to vector<16x1xf32>
    %187 = tpu.reciprocal %186 {approx = true} : vector<16x1xf32> -> vector<16x1xf32>
    %188 = vector.broadcast %187 : vector<16x1xf32> to vector<16x16xf32>
    %189 = arith.mulf %184, %188 : vector<16x16xf32>
    %190 = arith.truncf %189 : vector<16x16xf32> to vector<16x16xbf16>
    %191 = vector.extract_strided_slice %56 {offsets = [0, 112], sizes = [16, 16], strides = [1, 1]} : vector<16x128xbf16> to vector<16x16xbf16>
    %cst_64 = arith.constant dense<0.000000e+00> : vector<16x16xf32>
    %192 = tpu.matmul %190, %191, %cst_64 {dimension_numbers = #tpu.dot_dimension_numbers<[1], [0], [0], [1], [0, 0, 1, 1], [], []>} : vector<16x16xbf16>, vector<16x16xbf16>, vector<16x16xf32> -> vector<16x16xf32>
    %193 = tpu.concatenate %73, %90, %107, %124, %141, %158, %175, %192 in 1 : vector<16x16xf32>, vector<16x16xf32>, vector<16x16xf32>, vector<16x16xf32>, vector<16x16xf32>, vector<16x16xf32>, vector<16x16xf32>, vector<16x16xf32> -> vector<16x128xf32>
    %194 = arith.truncf %193 : vector<16x128xf32> to vector<16x128xbf16>
    %c0_65 = arith.constant 0 : index
    %c0_66 = arith.constant 0 : index
    %c0_67 = arith.constant 0 : index
    %195 = vector.load %arg10[%c0_65, %c0_66, %c0_67] : memref<3x128x128xbf16, #tpu.memory_space<vmem>>, vector<1x128x128xbf16>
    %196 = vector.shape_cast %195 : vector<1x128x128xbf16> to vector<128x128xbf16>
    %cst_68 = arith.constant dense<0.000000e+00> : vector<16x128xf32>
    %197 = tpu.matmul %194, %196, %cst_68 {dimension_numbers = #tpu.dot_dimension_numbers<[1], [0], [0], [1], [0, 0, 1, 1], [], []>} : vector<16x128xbf16>, vector<128x128xbf16>, vector<16x128xf32> -> vector<16x128xf32>
    %c0_69 = arith.constant 0 : index
    %c0_70 = arith.constant 0 : index
    %c0_71 = arith.constant 0 : index
    %198 = vector.load %arg11[%c0_69, %c0_70, %c0_71] : memref<3x1x128xf32, #tpu.memory_space<vmem>>, vector<1x1x128xf32>
    %199 = vector.shape_cast %198 : vector<1x1x128xf32> to vector<1x128xf32>
    %200 = vector.broadcast %199 : vector<1x128xf32> to vector<16x128xf32>
    %201 = arith.addf %197, %200 : vector<16x128xf32>
    %202 = arith.addf %1, %201 : vector<16x128xf32>
    %c0_72 = arith.constant 0 : index
    %c0_73 = arith.constant 0 : index
    %c0_74 = arith.constant 0 : index
    %203 = vector.load %arg12[%c0_72, %c0_73, %c0_74] : memref<3x2x128xf32, #tpu.memory_space<vmem>>, vector<1x1x128xf32>
    %204 = vector.shape_cast %203 : vector<1x1x128xf32> to vector<1x128xf32>
    %c0_75 = arith.constant 0 : index
    %c1_76 = arith.constant 1 : index
    %c0_77 = arith.constant 0 : index
    %205 = vector.load %arg12[%c0_75, %c1_76, %c0_77] : memref<3x2x128xf32, #tpu.memory_space<vmem>>, vector<1x1x128xf32>
    %206 = vector.shape_cast %205 : vector<1x1x128xf32> to vector<1x128xf32>
    %cst_78 = arith.constant dense<0.000000e+00> : vector<16xf32>
    %207 = vector.multi_reduction <add>, %202, %cst_78 [1] : vector<16x128xf32> to vector<16xf32>
    %208 = vector.shape_cast %207 : vector<16xf32> to vector<16x1xf32>
    %cst_79 = arith.constant 1.280000e+02 : f32
    %209 = vector.broadcast %cst_79 : f32 to vector<16x1xf32>
    %210 = arith.divf %208, %209 : vector<16x1xf32>
    %211 = vector.broadcast %210 : vector<16x1xf32> to vector<16x128xf32>
    %212 = arith.subf %202, %211 : vector<16x128xf32>
    %213 = arith.mulf %212, %212 : vector<16x128xf32>
    %cst_80 = arith.constant dense<0.000000e+00> : vector<16xf32>
    %214 = vector.multi_reduction <add>, %213, %cst_80 [1] : vector<16x128xf32> to vector<16xf32>
    %215 = vector.shape_cast %214 : vector<16xf32> to vector<16x1xf32>
    %cst_81 = arith.constant 1.280000e+02 : f32
    %216 = vector.broadcast %cst_81 : f32 to vector<16x1xf32>
    %217 = arith.divf %215, %216 : vector<16x1xf32>
    %218 = vector.broadcast %210 : vector<16x1xf32> to vector<16x128xf32>
    %219 = arith.subf %202, %218 : vector<16x128xf32>
    %cst_82 = arith.constant 9.99999974E-6 : f32
    %220 = vector.broadcast %cst_82 : f32 to vector<16x1xf32>
    %221 = arith.addf %217, %220 : vector<16x1xf32>
    %222 = math.rsqrt %221 : vector<16x1xf32>
    %223 = vector.broadcast %222 : vector<16x1xf32> to vector<16x128xf32>
    %224 = arith.mulf %219, %223 : vector<16x128xf32>
    %225 = vector.broadcast %204 : vector<1x128xf32> to vector<16x128xf32>
    %226 = arith.mulf %224, %225 : vector<16x128xf32>
    %227 = vector.broadcast %206 : vector<1x128xf32> to vector<16x128xf32>
    %228 = arith.addf %226, %227 : vector<16x128xf32>
    %229 = arith.truncf %228 : vector<16x128xf32> to vector<16x128xbf16>
    %c0_83 = arith.constant 0 : index
    %c0_84 = arith.constant 0 : index
    %c0_85 = arith.constant 0 : index
    %230 = vector.load %arg13[%c0_83, %c0_84, %c0_85] : memref<3x128x256xbf16, #tpu.memory_space<vmem>>, vector<1x128x256xbf16>
    %231 = vector.shape_cast %230 : vector<1x128x256xbf16> to vector<128x256xbf16>
    %cst_86 = arith.constant dense<0.000000e+00> : vector<16x256xf32>
    %232 = tpu.matmul %229, %231, %cst_86 {dimension_numbers = #tpu.dot_dimension_numbers<[1], [0], [0], [1], [0, 0, 1, 1], [], []>} : vector<16x128xbf16>, vector<128x256xbf16>, vector<16x256xf32> -> vector<16x256xf32>
    %c0_87 = arith.constant 0 : index
    %c0_88 = arith.constant 0 : index
    %c0_89 = arith.constant 0 : index
    %233 = vector.load %arg14[%c0_87, %c0_88, %c0_89] : memref<3x1x256xf32, #tpu.memory_space<vmem>>, vector<1x1x256xf32>
    %234 = vector.shape_cast %233 : vector<1x1x256xf32> to vector<1x256xf32>
    %235 = vector.broadcast %234 : vector<1x256xf32> to vector<16x256xf32>
    %236 = arith.addf %232, %235 : vector<16x256xf32>
    %cst_90 = arith.constant 0.000000e+00 : f32
    %237 = vector.broadcast %cst_90 : f32 to vector<16x256xf32>
    %238 = arith.cmpf oge, %236, %237 : vector<16x256xf32>
    %cst_91 = arith.constant 0.00999999977 : f32
    %239 = vector.broadcast %cst_91 : f32 to vector<16x256xf32>
    %240 = arith.mulf %239, %236 : vector<16x256xf32>
    %241 = arith.select %238, %236, %240 : vector<16x256xi1>, vector<16x256xf32>
    %242 = arith.truncf %241 : vector<16x256xf32> to vector<16x256xbf16>
    %c0_92 = arith.constant 0 : index
    %c0_93 = arith.constant 0 : index
    %c0_94 = arith.constant 0 : index
    %243 = vector.load %arg15[%c0_92, %c0_93, %c0_94] : memref<3x256x128xbf16, #tpu.memory_space<vmem>>, vector<1x256x128xbf16>
    %244 = vector.shape_cast %243 : vector<1x256x128xbf16> to vector<256x128xbf16>
    %cst_95 = arith.constant dense<0.000000e+00> : vector<16x128xf32>
    %245 = tpu.matmul %242, %244, %cst_95 {dimension_numbers = #tpu.dot_dimension_numbers<[1], [0], [0], [1], [0, 0, 1, 1], [], []>} : vector<16x256xbf16>, vector<256x128xbf16>, vector<16x128xf32> -> vector<16x128xf32>
    %c0_96 = arith.constant 0 : index
    %c0_97 = arith.constant 0 : index
    %c0_98 = arith.constant 0 : index
    %246 = vector.load %arg16[%c0_96, %c0_97, %c0_98] : memref<3x1x128xf32, #tpu.memory_space<vmem>>, vector<1x1x128xf32>
    %247 = vector.shape_cast %246 : vector<1x1x128xf32> to vector<1x128xf32>
    %248 = vector.broadcast %247 : vector<1x128xf32> to vector<16x128xf32>
    %249 = arith.addf %245, %248 : vector<16x128xf32>
    %250 = arith.addf %202, %249 : vector<16x128xf32>
    %c1_99 = arith.constant 1 : index
    %c0_100 = arith.constant 0 : index
    %c0_101 = arith.constant 0 : index
    %251 = vector.load %arg5[%c1_99, %c0_100, %c0_101] : memref<3x2x128xf32, #tpu.memory_space<vmem>>, vector<1x1x128xf32>
    %252 = vector.shape_cast %251 : vector<1x1x128xf32> to vector<1x128xf32>
    %c1_102 = arith.constant 1 : index
    %c1_103 = arith.constant 1 : index
    %c0_104 = arith.constant 0 : index
    %253 = vector.load %arg5[%c1_102, %c1_103, %c0_104] : memref<3x2x128xf32, #tpu.memory_space<vmem>>, vector<1x1x128xf32>
    %254 = vector.shape_cast %253 : vector<1x1x128xf32> to vector<1x128xf32>
    %cst_105 = arith.constant dense<0.000000e+00> : vector<16xf32>
    %255 = vector.multi_reduction <add>, %250, %cst_105 [1] : vector<16x128xf32> to vector<16xf32>
    %256 = vector.shape_cast %255 : vector<16xf32> to vector<16x1xf32>
    %cst_106 = arith.constant 1.280000e+02 : f32
    %257 = vector.broadcast %cst_106 : f32 to vector<16x1xf32>
    %258 = arith.divf %256, %257 : vector<16x1xf32>
    %259 = vector.broadcast %258 : vector<16x1xf32> to vector<16x128xf32>
    %260 = arith.subf %250, %259 : vector<16x128xf32>
    %261 = arith.mulf %260, %260 : vector<16x128xf32>
    %cst_107 = arith.constant dense<0.000000e+00> : vector<16xf32>
    %262 = vector.multi_reduction <add>, %261, %cst_107 [1] : vector<16x128xf32> to vector<16xf32>
    %263 = vector.shape_cast %262 : vector<16xf32> to vector<16x1xf32>
    %cst_108 = arith.constant 1.280000e+02 : f32
    %264 = vector.broadcast %cst_108 : f32 to vector<16x1xf32>
    %265 = arith.divf %263, %264 : vector<16x1xf32>
    %266 = vector.broadcast %258 : vector<16x1xf32> to vector<16x128xf32>
    %267 = arith.subf %250, %266 : vector<16x128xf32>
    %cst_109 = arith.constant 9.99999974E-6 : f32
    %268 = vector.broadcast %cst_109 : f32 to vector<16x1xf32>
    %269 = arith.addf %265, %268 : vector<16x1xf32>
    %270 = math.rsqrt %269 : vector<16x1xf32>
    %271 = vector.broadcast %270 : vector<16x1xf32> to vector<16x128xf32>
    %272 = arith.mulf %267, %271 : vector<16x128xf32>
    %273 = vector.broadcast %252 : vector<1x128xf32> to vector<16x128xf32>
    %274 = arith.mulf %272, %273 : vector<16x128xf32>
    %275 = vector.broadcast %254 : vector<1x128xf32> to vector<16x128xf32>
    %276 = arith.addf %274, %275 : vector<16x128xf32>
    %277 = arith.addf %276, %3 : vector<16x128xf32>
    %278 = arith.truncf %277 : vector<16x128xf32> to vector<16x128xbf16>
    %c1_110 = arith.constant 1 : index
    %c0_111 = arith.constant 0 : index
    %c0_112 = arith.constant 0 : index
    %279 = vector.load %arg6[%c1_110, %c0_111, %c0_112] : memref<3x128x256xbf16, #tpu.memory_space<vmem>>, vector<1x128x256xbf16>
    %280 = vector.shape_cast %279 : vector<1x128x256xbf16> to vector<128x256xbf16>
    %cst_113 = arith.constant dense<0.000000e+00> : vector<16x256xf32>
    %281 = tpu.matmul %278, %280, %cst_113 {dimension_numbers = #tpu.dot_dimension_numbers<[1], [0], [0], [1], [0, 0, 1, 1], [], []>} : vector<16x128xbf16>, vector<128x256xbf16>, vector<16x256xf32> -> vector<16x256xf32>
    %c1_114 = arith.constant 1 : index
    %c0_115 = arith.constant 0 : index
    %c0_116 = arith.constant 0 : index
    %282 = vector.load %arg7[%c1_114, %c0_115, %c0_116] : memref<3x1x256xf32, #tpu.memory_space<vmem>>, vector<1x1x256xf32>
    %283 = vector.shape_cast %282 : vector<1x1x256xf32> to vector<1x256xf32>
    %284 = vector.broadcast %283 : vector<1x256xf32> to vector<16x256xf32>
    %285 = arith.addf %281, %284 : vector<16x256xf32>
    %286 = vector.extract_strided_slice %285 {offsets = [0, 0], sizes = [16, 128], strides = [1, 1]} : vector<16x256xf32> to vector<16x128xf32>
    %287 = arith.truncf %286 : vector<16x128xf32> to vector<16x128xbf16>
    %288 = vector.extract_strided_slice %285 {offsets = [0, 128], sizes = [16, 128], strides = [1, 1]} : vector<16x256xf32> to vector<16x128xf32>
    %289 = arith.truncf %288 : vector<16x128xf32> to vector<16x128xbf16>
    %290 = arith.truncf %276 : vector<16x128xf32> to vector<16x128xbf16>
    %c1_117 = arith.constant 1 : index
    %c0_118 = arith.constant 0 : index
    %c0_119 = arith.constant 0 : index
    %291 = vector.load %arg8[%c1_117, %c0_118, %c0_119] : memref<3x128x128xbf16, #tpu.memory_space<vmem>>, vector<1x128x128xbf16>
    %292 = vector.shape_cast %291 : vector<1x128x128xbf16> to vector<128x128xbf16>
    %cst_120 = arith.constant dense<0.000000e+00> : vector<16x128xf32>
    %293 = tpu.matmul %290, %292, %cst_120 {dimension_numbers = #tpu.dot_dimension_numbers<[1], [0], [0], [1], [0, 0, 1, 1], [], []>} : vector<16x128xbf16>, vector<128x128xbf16>, vector<16x128xf32> -> vector<16x128xf32>
    %c1_121 = arith.constant 1 : index
    %c0_122 = arith.constant 0 : index
    %c0_123 = arith.constant 0 : index
    %294 = vector.load %arg9[%c1_121, %c0_122, %c0_123] : memref<3x1x128xf32, #tpu.memory_space<vmem>>, vector<1x1x128xf32>
    %295 = vector.shape_cast %294 : vector<1x1x128xf32> to vector<1x128xf32>
    %296 = vector.broadcast %295 : vector<1x128xf32> to vector<16x128xf32>
    %297 = arith.addf %293, %296 : vector<16x128xf32>
    %298 = arith.truncf %297 : vector<16x128xf32> to vector<16x128xbf16>
    %299 = vector.extract_strided_slice %287 {offsets = [0, 0], sizes = [16, 16], strides = [1, 1]} : vector<16x128xbf16> to vector<16x16xbf16>
    %300 = vector.extract_strided_slice %289 {offsets = [0, 0], sizes = [16, 16], strides = [1, 1]} : vector<16x128xbf16> to vector<16x16xbf16>
    %cst_124 = arith.constant dense<0.000000e+00> : vector<16x16xf32>
    %301 = tpu.matmul %299, %300, %cst_124 {dimension_numbers = #tpu.dot_dimension_numbers<[1], [1], [0], [0], [0, 0, 1, 0], [], []>} : vector<16x16xbf16>, vector<16x16xbf16>, vector<16x16xf32> -> vector<16x16xf32>
    %302 = arith.addf %301, %8 : vector<16x16xf32>
    %cst_125 = arith.constant dense<0xFF800000> : vector<16xf32>
    %303 = vector.multi_reduction <maximumf>, %302, %cst_125 [1] : vector<16x16xf32> to vector<16xf32>
    %304 = vector.shape_cast %303 : vector<16xf32> to vector<16x1xf32>
    %305 = vector.broadcast %304 : vector<16x1xf32> to vector<16x16xf32>
    %306 = arith.subf %302, %305 : vector<16x16xf32>
    %307 = math.exp %306 : vector<16x16xf32>
    %cst_126 = arith.constant dense<0.000000e+00> : vector<16xf32>
    %308 = vector.multi_reduction <add>, %307, %cst_126 [1] : vector<16x16xf32> to vector<16xf32>
    %309 = vector.shape_cast %308 : vector<16xf32> to vector<16x1xf32>
    %310 = tpu.reciprocal %309 {approx = true} : vector<16x1xf32> -> vector<16x1xf32>
    %311 = vector.broadcast %310 : vector<16x1xf32> to vector<16x16xf32>
    %312 = arith.mulf %307, %311 : vector<16x16xf32>
    %313 = arith.truncf %312 : vector<16x16xf32> to vector<16x16xbf16>
    %314 = vector.extract_strided_slice %298 {offsets = [0, 0], sizes = [16, 16], strides = [1, 1]} : vector<16x128xbf16> to vector<16x16xbf16>
    %cst_127 = arith.constant dense<0.000000e+00> : vector<16x16xf32>
    %315 = tpu.matmul %313, %314, %cst_127 {dimension_numbers = #tpu.dot_dimension_numbers<[1], [0], [0], [1], [0, 0, 1, 1], [], []>} : vector<16x16xbf16>, vector<16x16xbf16>, vector<16x16xf32> -> vector<16x16xf32>
    %316 = vector.extract_strided_slice %287 {offsets = [0, 16], sizes = [16, 16], strides = [1, 1]} : vector<16x128xbf16> to vector<16x16xbf16>
    %317 = vector.extract_strided_slice %289 {offsets = [0, 16], sizes = [16, 16], strides = [1, 1]} : vector<16x128xbf16> to vector<16x16xbf16>
    %cst_128 = arith.constant dense<0.000000e+00> : vector<16x16xf32>
    %318 = tpu.matmul %316, %317, %cst_128 {dimension_numbers = #tpu.dot_dimension_numbers<[1], [1], [0], [0], [0, 0, 1, 0], [], []>} : vector<16x16xbf16>, vector<16x16xbf16>, vector<16x16xf32> -> vector<16x16xf32>
    %319 = arith.addf %318, %8 : vector<16x16xf32>
    %cst_129 = arith.constant dense<0xFF800000> : vector<16xf32>
    %320 = vector.multi_reduction <maximumf>, %319, %cst_129 [1] : vector<16x16xf32> to vector<16xf32>
    %321 = vector.shape_cast %320 : vector<16xf32> to vector<16x1xf32>
    %322 = vector.broadcast %321 : vector<16x1xf32> to vector<16x16xf32>
    %323 = arith.subf %319, %322 : vector<16x16xf32>
    %324 = math.exp %323 : vector<16x16xf32>
    %cst_130 = arith.constant dense<0.000000e+00> : vector<16xf32>
    %325 = vector.multi_reduction <add>, %324, %cst_130 [1] : vector<16x16xf32> to vector<16xf32>
    %326 = vector.shape_cast %325 : vector<16xf32> to vector<16x1xf32>
    %327 = tpu.reciprocal %326 {approx = true} : vector<16x1xf32> -> vector<16x1xf32>
    %328 = vector.broadcast %327 : vector<16x1xf32> to vector<16x16xf32>
    %329 = arith.mulf %324, %328 : vector<16x16xf32>
    %330 = arith.truncf %329 : vector<16x16xf32> to vector<16x16xbf16>
    %331 = vector.extract_strided_slice %298 {offsets = [0, 16], sizes = [16, 16], strides = [1, 1]} : vector<16x128xbf16> to vector<16x16xbf16>
    %cst_131 = arith.constant dense<0.000000e+00> : vector<16x16xf32>
    %332 = tpu.matmul %330, %331, %cst_131 {dimension_numbers = #tpu.dot_dimension_numbers<[1], [0], [0], [1], [0, 0, 1, 1], [], []>} : vector<16x16xbf16>, vector<16x16xbf16>, vector<16x16xf32> -> vector<16x16xf32>
    %333 = vector.extract_strided_slice %287 {offsets = [0, 32], sizes = [16, 16], strides = [1, 1]} : vector<16x128xbf16> to vector<16x16xbf16>
    %334 = vector.extract_strided_slice %289 {offsets = [0, 32], sizes = [16, 16], strides = [1, 1]} : vector<16x128xbf16> to vector<16x16xbf16>
    %cst_132 = arith.constant dense<0.000000e+00> : vector<16x16xf32>
    %335 = tpu.matmul %333, %334, %cst_132 {dimension_numbers = #tpu.dot_dimension_numbers<[1], [1], [0], [0], [0, 0, 1, 0], [], []>} : vector<16x16xbf16>, vector<16x16xbf16>, vector<16x16xf32> -> vector<16x16xf32>
    %336 = arith.addf %335, %8 : vector<16x16xf32>
    %cst_133 = arith.constant dense<0xFF800000> : vector<16xf32>
    %337 = vector.multi_reduction <maximumf>, %336, %cst_133 [1] : vector<16x16xf32> to vector<16xf32>
    %338 = vector.shape_cast %337 : vector<16xf32> to vector<16x1xf32>
    %339 = vector.broadcast %338 : vector<16x1xf32> to vector<16x16xf32>
    %340 = arith.subf %336, %339 : vector<16x16xf32>
    %341 = math.exp %340 : vector<16x16xf32>
    %cst_134 = arith.constant dense<0.000000e+00> : vector<16xf32>
    %342 = vector.multi_reduction <add>, %341, %cst_134 [1] : vector<16x16xf32> to vector<16xf32>
    %343 = vector.shape_cast %342 : vector<16xf32> to vector<16x1xf32>
    %344 = tpu.reciprocal %343 {approx = true} : vector<16x1xf32> -> vector<16x1xf32>
    %345 = vector.broadcast %344 : vector<16x1xf32> to vector<16x16xf32>
    %346 = arith.mulf %341, %345 : vector<16x16xf32>
    %347 = arith.truncf %346 : vector<16x16xf32> to vector<16x16xbf16>
    %348 = vector.extract_strided_slice %298 {offsets = [0, 32], sizes = [16, 16], strides = [1, 1]} : vector<16x128xbf16> to vector<16x16xbf16>
    %cst_135 = arith.constant dense<0.000000e+00> : vector<16x16xf32>
    %349 = tpu.matmul %347, %348, %cst_135 {dimension_numbers = #tpu.dot_dimension_numbers<[1], [0], [0], [1], [0, 0, 1, 1], [], []>} : vector<16x16xbf16>, vector<16x16xbf16>, vector<16x16xf32> -> vector<16x16xf32>
    %350 = vector.extract_strided_slice %287 {offsets = [0, 48], sizes = [16, 16], strides = [1, 1]} : vector<16x128xbf16> to vector<16x16xbf16>
    %351 = vector.extract_strided_slice %289 {offsets = [0, 48], sizes = [16, 16], strides = [1, 1]} : vector<16x128xbf16> to vector<16x16xbf16>
    %cst_136 = arith.constant dense<0.000000e+00> : vector<16x16xf32>
    %352 = tpu.matmul %350, %351, %cst_136 {dimension_numbers = #tpu.dot_dimension_numbers<[1], [1], [0], [0], [0, 0, 1, 0], [], []>} : vector<16x16xbf16>, vector<16x16xbf16>, vector<16x16xf32> -> vector<16x16xf32>
    %353 = arith.addf %352, %8 : vector<16x16xf32>
    %cst_137 = arith.constant dense<0xFF800000> : vector<16xf32>
    %354 = vector.multi_reduction <maximumf>, %353, %cst_137 [1] : vector<16x16xf32> to vector<16xf32>
    %355 = vector.shape_cast %354 : vector<16xf32> to vector<16x1xf32>
    %356 = vector.broadcast %355 : vector<16x1xf32> to vector<16x16xf32>
    %357 = arith.subf %353, %356 : vector<16x16xf32>
    %358 = math.exp %357 : vector<16x16xf32>
    %cst_138 = arith.constant dense<0.000000e+00> : vector<16xf32>
    %359 = vector.multi_reduction <add>, %358, %cst_138 [1] : vector<16x16xf32> to vector<16xf32>
    %360 = vector.shape_cast %359 : vector<16xf32> to vector<16x1xf32>
    %361 = tpu.reciprocal %360 {approx = true} : vector<16x1xf32> -> vector<16x1xf32>
    %362 = vector.broadcast %361 : vector<16x1xf32> to vector<16x16xf32>
    %363 = arith.mulf %358, %362 : vector<16x16xf32>
    %364 = arith.truncf %363 : vector<16x16xf32> to vector<16x16xbf16>
    %365 = vector.extract_strided_slice %298 {offsets = [0, 48], sizes = [16, 16], strides = [1, 1]} : vector<16x128xbf16> to vector<16x16xbf16>
    %cst_139 = arith.constant dense<0.000000e+00> : vector<16x16xf32>
    %366 = tpu.matmul %364, %365, %cst_139 {dimension_numbers = #tpu.dot_dimension_numbers<[1], [0], [0], [1], [0, 0, 1, 1], [], []>} : vector<16x16xbf16>, vector<16x16xbf16>, vector<16x16xf32> -> vector<16x16xf32>
    %367 = vector.extract_strided_slice %287 {offsets = [0, 64], sizes = [16, 16], strides = [1, 1]} : vector<16x128xbf16> to vector<16x16xbf16>
    %368 = vector.extract_strided_slice %289 {offsets = [0, 64], sizes = [16, 16], strides = [1, 1]} : vector<16x128xbf16> to vector<16x16xbf16>
    %cst_140 = arith.constant dense<0.000000e+00> : vector<16x16xf32>
    %369 = tpu.matmul %367, %368, %cst_140 {dimension_numbers = #tpu.dot_dimension_numbers<[1], [1], [0], [0], [0, 0, 1, 0], [], []>} : vector<16x16xbf16>, vector<16x16xbf16>, vector<16x16xf32> -> vector<16x16xf32>
    %370 = arith.addf %369, %8 : vector<16x16xf32>
    %cst_141 = arith.constant dense<0xFF800000> : vector<16xf32>
    %371 = vector.multi_reduction <maximumf>, %370, %cst_141 [1] : vector<16x16xf32> to vector<16xf32>
    %372 = vector.shape_cast %371 : vector<16xf32> to vector<16x1xf32>
    %373 = vector.broadcast %372 : vector<16x1xf32> to vector<16x16xf32>
    %374 = arith.subf %370, %373 : vector<16x16xf32>
    %375 = math.exp %374 : vector<16x16xf32>
    %cst_142 = arith.constant dense<0.000000e+00> : vector<16xf32>
    %376 = vector.multi_reduction <add>, %375, %cst_142 [1] : vector<16x16xf32> to vector<16xf32>
    %377 = vector.shape_cast %376 : vector<16xf32> to vector<16x1xf32>
    %378 = tpu.reciprocal %377 {approx = true} : vector<16x1xf32> -> vector<16x1xf32>
    %379 = vector.broadcast %378 : vector<16x1xf32> to vector<16x16xf32>
    %380 = arith.mulf %375, %379 : vector<16x16xf32>
    %381 = arith.truncf %380 : vector<16x16xf32> to vector<16x16xbf16>
    %382 = vector.extract_strided_slice %298 {offsets = [0, 64], sizes = [16, 16], strides = [1, 1]} : vector<16x128xbf16> to vector<16x16xbf16>
    %cst_143 = arith.constant dense<0.000000e+00> : vector<16x16xf32>
    %383 = tpu.matmul %381, %382, %cst_143 {dimension_numbers = #tpu.dot_dimension_numbers<[1], [0], [0], [1], [0, 0, 1, 1], [], []>} : vector<16x16xbf16>, vector<16x16xbf16>, vector<16x16xf32> -> vector<16x16xf32>
    %384 = vector.extract_strided_slice %287 {offsets = [0, 80], sizes = [16, 16], strides = [1, 1]} : vector<16x128xbf16> to vector<16x16xbf16>
    %385 = vector.extract_strided_slice %289 {offsets = [0, 80], sizes = [16, 16], strides = [1, 1]} : vector<16x128xbf16> to vector<16x16xbf16>
    %cst_144 = arith.constant dense<0.000000e+00> : vector<16x16xf32>
    %386 = tpu.matmul %384, %385, %cst_144 {dimension_numbers = #tpu.dot_dimension_numbers<[1], [1], [0], [0], [0, 0, 1, 0], [], []>} : vector<16x16xbf16>, vector<16x16xbf16>, vector<16x16xf32> -> vector<16x16xf32>
    %387 = arith.addf %386, %8 : vector<16x16xf32>
    %cst_145 = arith.constant dense<0xFF800000> : vector<16xf32>
    %388 = vector.multi_reduction <maximumf>, %387, %cst_145 [1] : vector<16x16xf32> to vector<16xf32>
    %389 = vector.shape_cast %388 : vector<16xf32> to vector<16x1xf32>
    %390 = vector.broadcast %389 : vector<16x1xf32> to vector<16x16xf32>
    %391 = arith.subf %387, %390 : vector<16x16xf32>
    %392 = math.exp %391 : vector<16x16xf32>
    %cst_146 = arith.constant dense<0.000000e+00> : vector<16xf32>
    %393 = vector.multi_reduction <add>, %392, %cst_146 [1] : vector<16x16xf32> to vector<16xf32>
    %394 = vector.shape_cast %393 : vector<16xf32> to vector<16x1xf32>
    %395 = tpu.reciprocal %394 {approx = true} : vector<16x1xf32> -> vector<16x1xf32>
    %396 = vector.broadcast %395 : vector<16x1xf32> to vector<16x16xf32>
    %397 = arith.mulf %392, %396 : vector<16x16xf32>
    %398 = arith.truncf %397 : vector<16x16xf32> to vector<16x16xbf16>
    %399 = vector.extract_strided_slice %298 {offsets = [0, 80], sizes = [16, 16], strides = [1, 1]} : vector<16x128xbf16> to vector<16x16xbf16>
    %cst_147 = arith.constant dense<0.000000e+00> : vector<16x16xf32>
    %400 = tpu.matmul %398, %399, %cst_147 {dimension_numbers = #tpu.dot_dimension_numbers<[1], [0], [0], [1], [0, 0, 1, 1], [], []>} : vector<16x16xbf16>, vector<16x16xbf16>, vector<16x16xf32> -> vector<16x16xf32>
    %401 = vector.extract_strided_slice %287 {offsets = [0, 96], sizes = [16, 16], strides = [1, 1]} : vector<16x128xbf16> to vector<16x16xbf16>
    %402 = vector.extract_strided_slice %289 {offsets = [0, 96], sizes = [16, 16], strides = [1, 1]} : vector<16x128xbf16> to vector<16x16xbf16>
    %cst_148 = arith.constant dense<0.000000e+00> : vector<16x16xf32>
    %403 = tpu.matmul %401, %402, %cst_148 {dimension_numbers = #tpu.dot_dimension_numbers<[1], [1], [0], [0], [0, 0, 1, 0], [], []>} : vector<16x16xbf16>, vector<16x16xbf16>, vector<16x16xf32> -> vector<16x16xf32>
    %404 = arith.addf %403, %8 : vector<16x16xf32>
    %cst_149 = arith.constant dense<0xFF800000> : vector<16xf32>
    %405 = vector.multi_reduction <maximumf>, %404, %cst_149 [1] : vector<16x16xf32> to vector<16xf32>
    %406 = vector.shape_cast %405 : vector<16xf32> to vector<16x1xf32>
    %407 = vector.broadcast %406 : vector<16x1xf32> to vector<16x16xf32>
    %408 = arith.subf %404, %407 : vector<16x16xf32>
    %409 = math.exp %408 : vector<16x16xf32>
    %cst_150 = arith.constant dense<0.000000e+00> : vector<16xf32>
    %410 = vector.multi_reduction <add>, %409, %cst_150 [1] : vector<16x16xf32> to vector<16xf32>
    %411 = vector.shape_cast %410 : vector<16xf32> to vector<16x1xf32>
    %412 = tpu.reciprocal %411 {approx = true} : vector<16x1xf32> -> vector<16x1xf32>
    %413 = vector.broadcast %412 : vector<16x1xf32> to vector<16x16xf32>
    %414 = arith.mulf %409, %413 : vector<16x16xf32>
    %415 = arith.truncf %414 : vector<16x16xf32> to vector<16x16xbf16>
    %416 = vector.extract_strided_slice %298 {offsets = [0, 96], sizes = [16, 16], strides = [1, 1]} : vector<16x128xbf16> to vector<16x16xbf16>
    %cst_151 = arith.constant dense<0.000000e+00> : vector<16x16xf32>
    %417 = tpu.matmul %415, %416, %cst_151 {dimension_numbers = #tpu.dot_dimension_numbers<[1], [0], [0], [1], [0, 0, 1, 1], [], []>} : vector<16x16xbf16>, vector<16x16xbf16>, vector<16x16xf32> -> vector<16x16xf32>
    %418 = vector.extract_strided_slice %287 {offsets = [0, 112], sizes = [16, 16], strides = [1, 1]} : vector<16x128xbf16> to vector<16x16xbf16>
    %419 = vector.extract_strided_slice %289 {offsets = [0, 112], sizes = [16, 16], strides = [1, 1]} : vector<16x128xbf16> to vector<16x16xbf16>
    %cst_152 = arith.constant dense<0.000000e+00> : vector<16x16xf32>
    %420 = tpu.matmul %418, %419, %cst_152 {dimension_numbers = #tpu.dot_dimension_numbers<[1], [1], [0], [0], [0, 0, 1, 0], [], []>} : vector<16x16xbf16>, vector<16x16xbf16>, vector<16x16xf32> -> vector<16x16xf32>
    %421 = arith.addf %420, %8 : vector<16x16xf32>
    %cst_153 = arith.constant dense<0xFF800000> : vector<16xf32>
    %422 = vector.multi_reduction <maximumf>, %421, %cst_153 [1] : vector<16x16xf32> to vector<16xf32>
    %423 = vector.shape_cast %422 : vector<16xf32> to vector<16x1xf32>
    %424 = vector.broadcast %423 : vector<16x1xf32> to vector<16x16xf32>
    %425 = arith.subf %421, %424 : vector<16x16xf32>
    %426 = math.exp %425 : vector<16x16xf32>
    %cst_154 = arith.constant dense<0.000000e+00> : vector<16xf32>
    %427 = vector.multi_reduction <add>, %426, %cst_154 [1] : vector<16x16xf32> to vector<16xf32>
    %428 = vector.shape_cast %427 : vector<16xf32> to vector<16x1xf32>
    %429 = tpu.reciprocal %428 {approx = true} : vector<16x1xf32> -> vector<16x1xf32>
    %430 = vector.broadcast %429 : vector<16x1xf32> to vector<16x16xf32>
    %431 = arith.mulf %426, %430 : vector<16x16xf32>
    %432 = arith.truncf %431 : vector<16x16xf32> to vector<16x16xbf16>
    %433 = vector.extract_strided_slice %298 {offsets = [0, 112], sizes = [16, 16], strides = [1, 1]} : vector<16x128xbf16> to vector<16x16xbf16>
    %cst_155 = arith.constant dense<0.000000e+00> : vector<16x16xf32>
    %434 = tpu.matmul %432, %433, %cst_155 {dimension_numbers = #tpu.dot_dimension_numbers<[1], [0], [0], [1], [0, 0, 1, 1], [], []>} : vector<16x16xbf16>, vector<16x16xbf16>, vector<16x16xf32> -> vector<16x16xf32>
    %435 = tpu.concatenate %315, %332, %349, %366, %383, %400, %417, %434 in 1 : vector<16x16xf32>, vector<16x16xf32>, vector<16x16xf32>, vector<16x16xf32>, vector<16x16xf32>, vector<16x16xf32>, vector<16x16xf32>, vector<16x16xf32> -> vector<16x128xf32>
    %436 = arith.truncf %435 : vector<16x128xf32> to vector<16x128xbf16>
    %c1_156 = arith.constant 1 : index
    %c0_157 = arith.constant 0 : index
    %c0_158 = arith.constant 0 : index
    %437 = vector.load %arg10[%c1_156, %c0_157, %c0_158] : memref<3x128x128xbf16, #tpu.memory_space<vmem>>, vector<1x128x128xbf16>
    %438 = vector.shape_cast %437 : vector<1x128x128xbf16> to vector<128x128xbf16>
    %cst_159 = arith.constant dense<0.000000e+00> : vector<16x128xf32>
    %439 = tpu.matmul %436, %438, %cst_159 {dimension_numbers = #tpu.dot_dimension_numbers<[1], [0], [0], [1], [0, 0, 1, 1], [], []>} : vector<16x128xbf16>, vector<128x128xbf16>, vector<16x128xf32> -> vector<16x128xf32>
    %c1_160 = arith.constant 1 : index
    %c0_161 = arith.constant 0 : index
    %c0_162 = arith.constant 0 : index
    %440 = vector.load %arg11[%c1_160, %c0_161, %c0_162] : memref<3x1x128xf32, #tpu.memory_space<vmem>>, vector<1x1x128xf32>
    %441 = vector.shape_cast %440 : vector<1x1x128xf32> to vector<1x128xf32>
    %442 = vector.broadcast %441 : vector<1x128xf32> to vector<16x128xf32>
    %443 = arith.addf %439, %442 : vector<16x128xf32>
    %444 = arith.addf %250, %443 : vector<16x128xf32>
    %c1_163 = arith.constant 1 : index
    %c0_164 = arith.constant 0 : index
    %c0_165 = arith.constant 0 : index
    %445 = vector.load %arg12[%c1_163, %c0_164, %c0_165] : memref<3x2x128xf32, #tpu.memory_space<vmem>>, vector<1x1x128xf32>
    %446 = vector.shape_cast %445 : vector<1x1x128xf32> to vector<1x128xf32>
    %c1_166 = arith.constant 1 : index
    %c1_167 = arith.constant 1 : index
    %c0_168 = arith.constant 0 : index
    %447 = vector.load %arg12[%c1_166, %c1_167, %c0_168] : memref<3x2x128xf32, #tpu.memory_space<vmem>>, vector<1x1x128xf32>
    %448 = vector.shape_cast %447 : vector<1x1x128xf32> to vector<1x128xf32>
    %cst_169 = arith.constant dense<0.000000e+00> : vector<16xf32>
    %449 = vector.multi_reduction <add>, %444, %cst_169 [1] : vector<16x128xf32> to vector<16xf32>
    %450 = vector.shape_cast %449 : vector<16xf32> to vector<16x1xf32>
    %cst_170 = arith.constant 1.280000e+02 : f32
    %451 = vector.broadcast %cst_170 : f32 to vector<16x1xf32>
    %452 = arith.divf %450, %451 : vector<16x1xf32>
    %453 = vector.broadcast %452 : vector<16x1xf32> to vector<16x128xf32>
    %454 = arith.subf %444, %453 : vector<16x128xf32>
    %455 = arith.mulf %454, %454 : vector<16x128xf32>
    %cst_171 = arith.constant dense<0.000000e+00> : vector<16xf32>
    %456 = vector.multi_reduction <add>, %455, %cst_171 [1] : vector<16x128xf32> to vector<16xf32>
    %457 = vector.shape_cast %456 : vector<16xf32> to vector<16x1xf32>
    %cst_172 = arith.constant 1.280000e+02 : f32
    %458 = vector.broadcast %cst_172 : f32 to vector<16x1xf32>
    %459 = arith.divf %457, %458 : vector<16x1xf32>
    %460 = vector.broadcast %452 : vector<16x1xf32> to vector<16x128xf32>
    %461 = arith.subf %444, %460 : vector<16x128xf32>
    %cst_173 = arith.constant 9.99999974E-6 : f32
    %462 = vector.broadcast %cst_173 : f32 to vector<16x1xf32>
    %463 = arith.addf %459, %462 : vector<16x1xf32>
    %464 = math.rsqrt %463 : vector<16x1xf32>
    %465 = vector.broadcast %464 : vector<16x1xf32> to vector<16x128xf32>
    %466 = arith.mulf %461, %465 : vector<16x128xf32>
    %467 = vector.broadcast %446 : vector<1x128xf32> to vector<16x128xf32>
    %468 = arith.mulf %466, %467 : vector<16x128xf32>
    %469 = vector.broadcast %448 : vector<1x128xf32> to vector<16x128xf32>
    %470 = arith.addf %468, %469 : vector<16x128xf32>
    %471 = arith.truncf %470 : vector<16x128xf32> to vector<16x128xbf16>
    %c1_174 = arith.constant 1 : index
    %c0_175 = arith.constant 0 : index
    %c0_176 = arith.constant 0 : index
    %472 = vector.load %arg13[%c1_174, %c0_175, %c0_176] : memref<3x128x256xbf16, #tpu.memory_space<vmem>>, vector<1x128x256xbf16>
    %473 = vector.shape_cast %472 : vector<1x128x256xbf16> to vector<128x256xbf16>
    %cst_177 = arith.constant dense<0.000000e+00> : vector<16x256xf32>
    %474 = tpu.matmul %471, %473, %cst_177 {dimension_numbers = #tpu.dot_dimension_numbers<[1], [0], [0], [1], [0, 0, 1, 1], [], []>} : vector<16x128xbf16>, vector<128x256xbf16>, vector<16x256xf32> -> vector<16x256xf32>
    %c1_178 = arith.constant 1 : index
    %c0_179 = arith.constant 0 : index
    %c0_180 = arith.constant 0 : index
    %475 = vector.load %arg14[%c1_178, %c0_179, %c0_180] : memref<3x1x256xf32, #tpu.memory_space<vmem>>, vector<1x1x256xf32>
    %476 = vector.shape_cast %475 : vector<1x1x256xf32> to vector<1x256xf32>
    %477 = vector.broadcast %476 : vector<1x256xf32> to vector<16x256xf32>
    %478 = arith.addf %474, %477 : vector<16x256xf32>
    %cst_181 = arith.constant 0.000000e+00 : f32
    %479 = vector.broadcast %cst_181 : f32 to vector<16x256xf32>
    %480 = arith.cmpf oge, %478, %479 : vector<16x256xf32>
    %cst_182 = arith.constant 0.00999999977 : f32
    %481 = vector.broadcast %cst_182 : f32 to vector<16x256xf32>
    %482 = arith.mulf %481, %478 : vector<16x256xf32>
    %483 = arith.select %480, %478, %482 : vector<16x256xi1>, vector<16x256xf32>
    %484 = arith.truncf %483 : vector<16x256xf32> to vector<16x256xbf16>
    %c1_183 = arith.constant 1 : index
    %c0_184 = arith.constant 0 : index
    %c0_185 = arith.constant 0 : index
    %485 = vector.load %arg15[%c1_183, %c0_184, %c0_185] : memref<3x256x128xbf16, #tpu.memory_space<vmem>>, vector<1x256x128xbf16>
    %486 = vector.shape_cast %485 : vector<1x256x128xbf16> to vector<256x128xbf16>
    %cst_186 = arith.constant dense<0.000000e+00> : vector<16x128xf32>
    %487 = tpu.matmul %484, %486, %cst_186 {dimension_numbers = #tpu.dot_dimension_numbers<[1], [0], [0], [1], [0, 0, 1, 1], [], []>} : vector<16x256xbf16>, vector<256x128xbf16>, vector<16x128xf32> -> vector<16x128xf32>
    %c1_187 = arith.constant 1 : index
    %c0_188 = arith.constant 0 : index
    %c0_189 = arith.constant 0 : index
    %488 = vector.load %arg16[%c1_187, %c0_188, %c0_189] : memref<3x1x128xf32, #tpu.memory_space<vmem>>, vector<1x1x128xf32>
    %489 = vector.shape_cast %488 : vector<1x1x128xf32> to vector<1x128xf32>
    %490 = vector.broadcast %489 : vector<1x128xf32> to vector<16x128xf32>
    %491 = arith.addf %487, %490 : vector<16x128xf32>
    %492 = arith.addf %444, %491 : vector<16x128xf32>
    %c2 = arith.constant 2 : index
    %c0_190 = arith.constant 0 : index
    %c0_191 = arith.constant 0 : index
    %493 = vector.load %arg5[%c2, %c0_190, %c0_191] : memref<3x2x128xf32, #tpu.memory_space<vmem>>, vector<1x1x128xf32>
    %494 = vector.shape_cast %493 : vector<1x1x128xf32> to vector<1x128xf32>
    %c2_192 = arith.constant 2 : index
    %c1_193 = arith.constant 1 : index
    %c0_194 = arith.constant 0 : index
    %495 = vector.load %arg5[%c2_192, %c1_193, %c0_194] : memref<3x2x128xf32, #tpu.memory_space<vmem>>, vector<1x1x128xf32>
    %496 = vector.shape_cast %495 : vector<1x1x128xf32> to vector<1x128xf32>
    %cst_195 = arith.constant dense<0.000000e+00> : vector<16xf32>
    %497 = vector.multi_reduction <add>, %492, %cst_195 [1] : vector<16x128xf32> to vector<16xf32>
    %498 = vector.shape_cast %497 : vector<16xf32> to vector<16x1xf32>
    %cst_196 = arith.constant 1.280000e+02 : f32
    %499 = vector.broadcast %cst_196 : f32 to vector<16x1xf32>
    %500 = arith.divf %498, %499 : vector<16x1xf32>
    %501 = vector.broadcast %500 : vector<16x1xf32> to vector<16x128xf32>
    %502 = arith.subf %492, %501 : vector<16x128xf32>
    %503 = arith.mulf %502, %502 : vector<16x128xf32>
    %cst_197 = arith.constant dense<0.000000e+00> : vector<16xf32>
    %504 = vector.multi_reduction <add>, %503, %cst_197 [1] : vector<16x128xf32> to vector<16xf32>
    %505 = vector.shape_cast %504 : vector<16xf32> to vector<16x1xf32>
    %cst_198 = arith.constant 1.280000e+02 : f32
    %506 = vector.broadcast %cst_198 : f32 to vector<16x1xf32>
    %507 = arith.divf %505, %506 : vector<16x1xf32>
    %508 = vector.broadcast %500 : vector<16x1xf32> to vector<16x128xf32>
    %509 = arith.subf %492, %508 : vector<16x128xf32>
    %cst_199 = arith.constant 9.99999974E-6 : f32
    %510 = vector.broadcast %cst_199 : f32 to vector<16x1xf32>
    %511 = arith.addf %507, %510 : vector<16x1xf32>
    %512 = math.rsqrt %511 : vector<16x1xf32>
    %513 = vector.broadcast %512 : vector<16x1xf32> to vector<16x128xf32>
    %514 = arith.mulf %509, %513 : vector<16x128xf32>
    %515 = vector.broadcast %494 : vector<1x128xf32> to vector<16x128xf32>
    %516 = arith.mulf %514, %515 : vector<16x128xf32>
    %517 = vector.broadcast %496 : vector<1x128xf32> to vector<16x128xf32>
    %518 = arith.addf %516, %517 : vector<16x128xf32>
    %519 = arith.addf %518, %3 : vector<16x128xf32>
    %520 = arith.truncf %519 : vector<16x128xf32> to vector<16x128xbf16>
    %c2_200 = arith.constant 2 : index
    %c0_201 = arith.constant 0 : index
    %c0_202 = arith.constant 0 : index
    %521 = vector.load %arg6[%c2_200, %c0_201, %c0_202] : memref<3x128x256xbf16, #tpu.memory_space<vmem>>, vector<1x128x256xbf16>
    %522 = vector.shape_cast %521 : vector<1x128x256xbf16> to vector<128x256xbf16>
    %cst_203 = arith.constant dense<0.000000e+00> : vector<16x256xf32>
    %523 = tpu.matmul %520, %522, %cst_203 {dimension_numbers = #tpu.dot_dimension_numbers<[1], [0], [0], [1], [0, 0, 1, 1], [], []>} : vector<16x128xbf16>, vector<128x256xbf16>, vector<16x256xf32> -> vector<16x256xf32>
    %c2_204 = arith.constant 2 : index
    %c0_205 = arith.constant 0 : index
    %c0_206 = arith.constant 0 : index
    %524 = vector.load %arg7[%c2_204, %c0_205, %c0_206] : memref<3x1x256xf32, #tpu.memory_space<vmem>>, vector<1x1x256xf32>
    %525 = vector.shape_cast %524 : vector<1x1x256xf32> to vector<1x256xf32>
    %526 = vector.broadcast %525 : vector<1x256xf32> to vector<16x256xf32>
    %527 = arith.addf %523, %526 : vector<16x256xf32>
    %528 = vector.extract_strided_slice %527 {offsets = [0, 0], sizes = [16, 128], strides = [1, 1]} : vector<16x256xf32> to vector<16x128xf32>
    %529 = arith.truncf %528 : vector<16x128xf32> to vector<16x128xbf16>
    %530 = vector.extract_strided_slice %527 {offsets = [0, 128], sizes = [16, 128], strides = [1, 1]} : vector<16x256xf32> to vector<16x128xf32>
    %531 = arith.truncf %530 : vector<16x128xf32> to vector<16x128xbf16>
    %532 = arith.truncf %518 : vector<16x128xf32> to vector<16x128xbf16>
    %c2_207 = arith.constant 2 : index
    %c0_208 = arith.constant 0 : index
    %c0_209 = arith.constant 0 : index
    %533 = vector.load %arg8[%c2_207, %c0_208, %c0_209] : memref<3x128x128xbf16, #tpu.memory_space<vmem>>, vector<1x128x128xbf16>
    %534 = vector.shape_cast %533 : vector<1x128x128xbf16> to vector<128x128xbf16>
    %cst_210 = arith.constant dense<0.000000e+00> : vector<16x128xf32>
    %535 = tpu.matmul %532, %534, %cst_210 {dimension_numbers = #tpu.dot_dimension_numbers<[1], [0], [0], [1], [0, 0, 1, 1], [], []>} : vector<16x128xbf16>, vector<128x128xbf16>, vector<16x128xf32> -> vector<16x128xf32>
    %c2_211 = arith.constant 2 : index
    %c0_212 = arith.constant 0 : index
    %c0_213 = arith.constant 0 : index
    %536 = vector.load %arg9[%c2_211, %c0_212, %c0_213] : memref<3x1x128xf32, #tpu.memory_space<vmem>>, vector<1x1x128xf32>
    %537 = vector.shape_cast %536 : vector<1x1x128xf32> to vector<1x128xf32>
    %538 = vector.broadcast %537 : vector<1x128xf32> to vector<16x128xf32>
    %539 = arith.addf %535, %538 : vector<16x128xf32>
    %540 = arith.truncf %539 : vector<16x128xf32> to vector<16x128xbf16>
    %541 = vector.extract_strided_slice %529 {offsets = [0, 0], sizes = [16, 16], strides = [1, 1]} : vector<16x128xbf16> to vector<16x16xbf16>
    %542 = vector.extract_strided_slice %531 {offsets = [0, 0], sizes = [16, 16], strides = [1, 1]} : vector<16x128xbf16> to vector<16x16xbf16>
    %cst_214 = arith.constant dense<0.000000e+00> : vector<16x16xf32>
    %543 = tpu.matmul %541, %542, %cst_214 {dimension_numbers = #tpu.dot_dimension_numbers<[1], [1], [0], [0], [0, 0, 1, 0], [], []>} : vector<16x16xbf16>, vector<16x16xbf16>, vector<16x16xf32> -> vector<16x16xf32>
    %544 = arith.addf %543, %8 : vector<16x16xf32>
    %cst_215 = arith.constant dense<0xFF800000> : vector<16xf32>
    %545 = vector.multi_reduction <maximumf>, %544, %cst_215 [1] : vector<16x16xf32> to vector<16xf32>
    %546 = vector.shape_cast %545 : vector<16xf32> to vector<16x1xf32>
    %547 = vector.broadcast %546 : vector<16x1xf32> to vector<16x16xf32>
    %548 = arith.subf %544, %547 : vector<16x16xf32>
    %549 = math.exp %548 : vector<16x16xf32>
    %cst_216 = arith.constant dense<0.000000e+00> : vector<16xf32>
    %550 = vector.multi_reduction <add>, %549, %cst_216 [1] : vector<16x16xf32> to vector<16xf32>
    %551 = vector.shape_cast %550 : vector<16xf32> to vector<16x1xf32>
    %552 = tpu.reciprocal %551 {approx = true} : vector<16x1xf32> -> vector<16x1xf32>
    %553 = vector.broadcast %552 : vector<16x1xf32> to vector<16x16xf32>
    %554 = arith.mulf %549, %553 : vector<16x16xf32>
    %555 = arith.truncf %554 : vector<16x16xf32> to vector<16x16xbf16>
    %556 = vector.extract_strided_slice %540 {offsets = [0, 0], sizes = [16, 16], strides = [1, 1]} : vector<16x128xbf16> to vector<16x16xbf16>
    %cst_217 = arith.constant dense<0.000000e+00> : vector<16x16xf32>
    %557 = tpu.matmul %555, %556, %cst_217 {dimension_numbers = #tpu.dot_dimension_numbers<[1], [0], [0], [1], [0, 0, 1, 1], [], []>} : vector<16x16xbf16>, vector<16x16xbf16>, vector<16x16xf32> -> vector<16x16xf32>
    %558 = vector.extract_strided_slice %529 {offsets = [0, 16], sizes = [16, 16], strides = [1, 1]} : vector<16x128xbf16> to vector<16x16xbf16>
    %559 = vector.extract_strided_slice %531 {offsets = [0, 16], sizes = [16, 16], strides = [1, 1]} : vector<16x128xbf16> to vector<16x16xbf16>
    %cst_218 = arith.constant dense<0.000000e+00> : vector<16x16xf32>
    %560 = tpu.matmul %558, %559, %cst_218 {dimension_numbers = #tpu.dot_dimension_numbers<[1], [1], [0], [0], [0, 0, 1, 0], [], []>} : vector<16x16xbf16>, vector<16x16xbf16>, vector<16x16xf32> -> vector<16x16xf32>
    %561 = arith.addf %560, %8 : vector<16x16xf32>
    %cst_219 = arith.constant dense<0xFF800000> : vector<16xf32>
    %562 = vector.multi_reduction <maximumf>, %561, %cst_219 [1] : vector<16x16xf32> to vector<16xf32>
    %563 = vector.shape_cast %562 : vector<16xf32> to vector<16x1xf32>
    %564 = vector.broadcast %563 : vector<16x1xf32> to vector<16x16xf32>
    %565 = arith.subf %561, %564 : vector<16x16xf32>
    %566 = math.exp %565 : vector<16x16xf32>
    %cst_220 = arith.constant dense<0.000000e+00> : vector<16xf32>
    %567 = vector.multi_reduction <add>, %566, %cst_220 [1] : vector<16x16xf32> to vector<16xf32>
    %568 = vector.shape_cast %567 : vector<16xf32> to vector<16x1xf32>
    %569 = tpu.reciprocal %568 {approx = true} : vector<16x1xf32> -> vector<16x1xf32>
    %570 = vector.broadcast %569 : vector<16x1xf32> to vector<16x16xf32>
    %571 = arith.mulf %566, %570 : vector<16x16xf32>
    %572 = arith.truncf %571 : vector<16x16xf32> to vector<16x16xbf16>
    %573 = vector.extract_strided_slice %540 {offsets = [0, 16], sizes = [16, 16], strides = [1, 1]} : vector<16x128xbf16> to vector<16x16xbf16>
    %cst_221 = arith.constant dense<0.000000e+00> : vector<16x16xf32>
    %574 = tpu.matmul %572, %573, %cst_221 {dimension_numbers = #tpu.dot_dimension_numbers<[1], [0], [0], [1], [0, 0, 1, 1], [], []>} : vector<16x16xbf16>, vector<16x16xbf16>, vector<16x16xf32> -> vector<16x16xf32>
    %575 = vector.extract_strided_slice %529 {offsets = [0, 32], sizes = [16, 16], strides = [1, 1]} : vector<16x128xbf16> to vector<16x16xbf16>
    %576 = vector.extract_strided_slice %531 {offsets = [0, 32], sizes = [16, 16], strides = [1, 1]} : vector<16x128xbf16> to vector<16x16xbf16>
    %cst_222 = arith.constant dense<0.000000e+00> : vector<16x16xf32>
    %577 = tpu.matmul %575, %576, %cst_222 {dimension_numbers = #tpu.dot_dimension_numbers<[1], [1], [0], [0], [0, 0, 1, 0], [], []>} : vector<16x16xbf16>, vector<16x16xbf16>, vector<16x16xf32> -> vector<16x16xf32>
    %578 = arith.addf %577, %8 : vector<16x16xf32>
    %cst_223 = arith.constant dense<0xFF800000> : vector<16xf32>
    %579 = vector.multi_reduction <maximumf>, %578, %cst_223 [1] : vector<16x16xf32> to vector<16xf32>
    %580 = vector.shape_cast %579 : vector<16xf32> to vector<16x1xf32>
    %581 = vector.broadcast %580 : vector<16x1xf32> to vector<16x16xf32>
    %582 = arith.subf %578, %581 : vector<16x16xf32>
    %583 = math.exp %582 : vector<16x16xf32>
    %cst_224 = arith.constant dense<0.000000e+00> : vector<16xf32>
    %584 = vector.multi_reduction <add>, %583, %cst_224 [1] : vector<16x16xf32> to vector<16xf32>
    %585 = vector.shape_cast %584 : vector<16xf32> to vector<16x1xf32>
    %586 = tpu.reciprocal %585 {approx = true} : vector<16x1xf32> -> vector<16x1xf32>
    %587 = vector.broadcast %586 : vector<16x1xf32> to vector<16x16xf32>
    %588 = arith.mulf %583, %587 : vector<16x16xf32>
    %589 = arith.truncf %588 : vector<16x16xf32> to vector<16x16xbf16>
    %590 = vector.extract_strided_slice %540 {offsets = [0, 32], sizes = [16, 16], strides = [1, 1]} : vector<16x128xbf16> to vector<16x16xbf16>
    %cst_225 = arith.constant dense<0.000000e+00> : vector<16x16xf32>
    %591 = tpu.matmul %589, %590, %cst_225 {dimension_numbers = #tpu.dot_dimension_numbers<[1], [0], [0], [1], [0, 0, 1, 1], [], []>} : vector<16x16xbf16>, vector<16x16xbf16>, vector<16x16xf32> -> vector<16x16xf32>
    %592 = vector.extract_strided_slice %529 {offsets = [0, 48], sizes = [16, 16], strides = [1, 1]} : vector<16x128xbf16> to vector<16x16xbf16>
    %593 = vector.extract_strided_slice %531 {offsets = [0, 48], sizes = [16, 16], strides = [1, 1]} : vector<16x128xbf16> to vector<16x16xbf16>
    %cst_226 = arith.constant dense<0.000000e+00> : vector<16x16xf32>
    %594 = tpu.matmul %592, %593, %cst_226 {dimension_numbers = #tpu.dot_dimension_numbers<[1], [1], [0], [0], [0, 0, 1, 0], [], []>} : vector<16x16xbf16>, vector<16x16xbf16>, vector<16x16xf32> -> vector<16x16xf32>
    %595 = arith.addf %594, %8 : vector<16x16xf32>
    %cst_227 = arith.constant dense<0xFF800000> : vector<16xf32>
    %596 = vector.multi_reduction <maximumf>, %595, %cst_227 [1] : vector<16x16xf32> to vector<16xf32>
    %597 = vector.shape_cast %596 : vector<16xf32> to vector<16x1xf32>
    %598 = vector.broadcast %597 : vector<16x1xf32> to vector<16x16xf32>
    %599 = arith.subf %595, %598 : vector<16x16xf32>
    %600 = math.exp %599 : vector<16x16xf32>
    %cst_228 = arith.constant dense<0.000000e+00> : vector<16xf32>
    %601 = vector.multi_reduction <add>, %600, %cst_228 [1] : vector<16x16xf32> to vector<16xf32>
    %602 = vector.shape_cast %601 : vector<16xf32> to vector<16x1xf32>
    %603 = tpu.reciprocal %602 {approx = true} : vector<16x1xf32> -> vector<16x1xf32>
    %604 = vector.broadcast %603 : vector<16x1xf32> to vector<16x16xf32>
    %605 = arith.mulf %600, %604 : vector<16x16xf32>
    %606 = arith.truncf %605 : vector<16x16xf32> to vector<16x16xbf16>
    %607 = vector.extract_strided_slice %540 {offsets = [0, 48], sizes = [16, 16], strides = [1, 1]} : vector<16x128xbf16> to vector<16x16xbf16>
    %cst_229 = arith.constant dense<0.000000e+00> : vector<16x16xf32>
    %608 = tpu.matmul %606, %607, %cst_229 {dimension_numbers = #tpu.dot_dimension_numbers<[1], [0], [0], [1], [0, 0, 1, 1], [], []>} : vector<16x16xbf16>, vector<16x16xbf16>, vector<16x16xf32> -> vector<16x16xf32>
    %609 = vector.extract_strided_slice %529 {offsets = [0, 64], sizes = [16, 16], strides = [1, 1]} : vector<16x128xbf16> to vector<16x16xbf16>
    %610 = vector.extract_strided_slice %531 {offsets = [0, 64], sizes = [16, 16], strides = [1, 1]} : vector<16x128xbf16> to vector<16x16xbf16>
    %cst_230 = arith.constant dense<0.000000e+00> : vector<16x16xf32>
    %611 = tpu.matmul %609, %610, %cst_230 {dimension_numbers = #tpu.dot_dimension_numbers<[1], [1], [0], [0], [0, 0, 1, 0], [], []>} : vector<16x16xbf16>, vector<16x16xbf16>, vector<16x16xf32> -> vector<16x16xf32>
    %612 = arith.addf %611, %8 : vector<16x16xf32>
    %cst_231 = arith.constant dense<0xFF800000> : vector<16xf32>
    %613 = vector.multi_reduction <maximumf>, %612, %cst_231 [1] : vector<16x16xf32> to vector<16xf32>
    %614 = vector.shape_cast %613 : vector<16xf32> to vector<16x1xf32>
    %615 = vector.broadcast %614 : vector<16x1xf32> to vector<16x16xf32>
    %616 = arith.subf %612, %615 : vector<16x16xf32>
    %617 = math.exp %616 : vector<16x16xf32>
    %cst_232 = arith.constant dense<0.000000e+00> : vector<16xf32>
    %618 = vector.multi_reduction <add>, %617, %cst_232 [1] : vector<16x16xf32> to vector<16xf32>
    %619 = vector.shape_cast %618 : vector<16xf32> to vector<16x1xf32>
    %620 = tpu.reciprocal %619 {approx = true} : vector<16x1xf32> -> vector<16x1xf32>
    %621 = vector.broadcast %620 : vector<16x1xf32> to vector<16x16xf32>
    %622 = arith.mulf %617, %621 : vector<16x16xf32>
    %623 = arith.truncf %622 : vector<16x16xf32> to vector<16x16xbf16>
    %624 = vector.extract_strided_slice %540 {offsets = [0, 64], sizes = [16, 16], strides = [1, 1]} : vector<16x128xbf16> to vector<16x16xbf16>
    %cst_233 = arith.constant dense<0.000000e+00> : vector<16x16xf32>
    %625 = tpu.matmul %623, %624, %cst_233 {dimension_numbers = #tpu.dot_dimension_numbers<[1], [0], [0], [1], [0, 0, 1, 1], [], []>} : vector<16x16xbf16>, vector<16x16xbf16>, vector<16x16xf32> -> vector<16x16xf32>
    %626 = vector.extract_strided_slice %529 {offsets = [0, 80], sizes = [16, 16], strides = [1, 1]} : vector<16x128xbf16> to vector<16x16xbf16>
    %627 = vector.extract_strided_slice %531 {offsets = [0, 80], sizes = [16, 16], strides = [1, 1]} : vector<16x128xbf16> to vector<16x16xbf16>
    %cst_234 = arith.constant dense<0.000000e+00> : vector<16x16xf32>
    %628 = tpu.matmul %626, %627, %cst_234 {dimension_numbers = #tpu.dot_dimension_numbers<[1], [1], [0], [0], [0, 0, 1, 0], [], []>} : vector<16x16xbf16>, vector<16x16xbf16>, vector<16x16xf32> -> vector<16x16xf32>
    %629 = arith.addf %628, %8 : vector<16x16xf32>
    %cst_235 = arith.constant dense<0xFF800000> : vector<16xf32>
    %630 = vector.multi_reduction <maximumf>, %629, %cst_235 [1] : vector<16x16xf32> to vector<16xf32>
    %631 = vector.shape_cast %630 : vector<16xf32> to vector<16x1xf32>
    %632 = vector.broadcast %631 : vector<16x1xf32> to vector<16x16xf32>
    %633 = arith.subf %629, %632 : vector<16x16xf32>
    %634 = math.exp %633 : vector<16x16xf32>
    %cst_236 = arith.constant dense<0.000000e+00> : vector<16xf32>
    %635 = vector.multi_reduction <add>, %634, %cst_236 [1] : vector<16x16xf32> to vector<16xf32>
    %636 = vector.shape_cast %635 : vector<16xf32> to vector<16x1xf32>
    %637 = tpu.reciprocal %636 {approx = true} : vector<16x1xf32> -> vector<16x1xf32>
    %638 = vector.broadcast %637 : vector<16x1xf32> to vector<16x16xf32>
    %639 = arith.mulf %634, %638 : vector<16x16xf32>
    %640 = arith.truncf %639 : vector<16x16xf32> to vector<16x16xbf16>
    %641 = vector.extract_strided_slice %540 {offsets = [0, 80], sizes = [16, 16], strides = [1, 1]} : vector<16x128xbf16> to vector<16x16xbf16>
    %cst_237 = arith.constant dense<0.000000e+00> : vector<16x16xf32>
    %642 = tpu.matmul %640, %641, %cst_237 {dimension_numbers = #tpu.dot_dimension_numbers<[1], [0], [0], [1], [0, 0, 1, 1], [], []>} : vector<16x16xbf16>, vector<16x16xbf16>, vector<16x16xf32> -> vector<16x16xf32>
    %643 = vector.extract_strided_slice %529 {offsets = [0, 96], sizes = [16, 16], strides = [1, 1]} : vector<16x128xbf16> to vector<16x16xbf16>
    %644 = vector.extract_strided_slice %531 {offsets = [0, 96], sizes = [16, 16], strides = [1, 1]} : vector<16x128xbf16> to vector<16x16xbf16>
    %cst_238 = arith.constant dense<0.000000e+00> : vector<16x16xf32>
    %645 = tpu.matmul %643, %644, %cst_238 {dimension_numbers = #tpu.dot_dimension_numbers<[1], [1], [0], [0], [0, 0, 1, 0], [], []>} : vector<16x16xbf16>, vector<16x16xbf16>, vector<16x16xf32> -> vector<16x16xf32>
    %646 = arith.addf %645, %8 : vector<16x16xf32>
    %cst_239 = arith.constant dense<0xFF800000> : vector<16xf32>
    %647 = vector.multi_reduction <maximumf>, %646, %cst_239 [1] : vector<16x16xf32> to vector<16xf32>
    %648 = vector.shape_cast %647 : vector<16xf32> to vector<16x1xf32>
    %649 = vector.broadcast %648 : vector<16x1xf32> to vector<16x16xf32>
    %650 = arith.subf %646, %649 : vector<16x16xf32>
    %651 = math.exp %650 : vector<16x16xf32>
    %cst_240 = arith.constant dense<0.000000e+00> : vector<16xf32>
    %652 = vector.multi_reduction <add>, %651, %cst_240 [1] : vector<16x16xf32> to vector<16xf32>
    %653 = vector.shape_cast %652 : vector<16xf32> to vector<16x1xf32>
    %654 = tpu.reciprocal %653 {approx = true} : vector<16x1xf32> -> vector<16x1xf32>
    %655 = vector.broadcast %654 : vector<16x1xf32> to vector<16x16xf32>
    %656 = arith.mulf %651, %655 : vector<16x16xf32>
    %657 = arith.truncf %656 : vector<16x16xf32> to vector<16x16xbf16>
    %658 = vector.extract_strided_slice %540 {offsets = [0, 96], sizes = [16, 16], strides = [1, 1]} : vector<16x128xbf16> to vector<16x16xbf16>
    %cst_241 = arith.constant dense<0.000000e+00> : vector<16x16xf32>
    %659 = tpu.matmul %657, %658, %cst_241 {dimension_numbers = #tpu.dot_dimension_numbers<[1], [0], [0], [1], [0, 0, 1, 1], [], []>} : vector<16x16xbf16>, vector<16x16xbf16>, vector<16x16xf32> -> vector<16x16xf32>
    %660 = vector.extract_strided_slice %529 {offsets = [0, 112], sizes = [16, 16], strides = [1, 1]} : vector<16x128xbf16> to vector<16x16xbf16>
    %661 = vector.extract_strided_slice %531 {offsets = [0, 112], sizes = [16, 16], strides = [1, 1]} : vector<16x128xbf16> to vector<16x16xbf16>
    %cst_242 = arith.constant dense<0.000000e+00> : vector<16x16xf32>
    %662 = tpu.matmul %660, %661, %cst_242 {dimension_numbers = #tpu.dot_dimension_numbers<[1], [1], [0], [0], [0, 0, 1, 0], [], []>} : vector<16x16xbf16>, vector<16x16xbf16>, vector<16x16xf32> -> vector<16x16xf32>
    %663 = arith.addf %662, %8 : vector<16x16xf32>
    %cst_243 = arith.constant dense<0xFF800000> : vector<16xf32>
    %664 = vector.multi_reduction <maximumf>, %663, %cst_243 [1] : vector<16x16xf32> to vector<16xf32>
    %665 = vector.shape_cast %664 : vector<16xf32> to vector<16x1xf32>
    %666 = vector.broadcast %665 : vector<16x1xf32> to vector<16x16xf32>
    %667 = arith.subf %663, %666 : vector<16x16xf32>
    %668 = math.exp %667 : vector<16x16xf32>
    %cst_244 = arith.constant dense<0.000000e+00> : vector<16xf32>
    %669 = vector.multi_reduction <add>, %668, %cst_244 [1] : vector<16x16xf32> to vector<16xf32>
    %670 = vector.shape_cast %669 : vector<16xf32> to vector<16x1xf32>
    %671 = tpu.reciprocal %670 {approx = true} : vector<16x1xf32> -> vector<16x1xf32>
    %672 = vector.broadcast %671 : vector<16x1xf32> to vector<16x16xf32>
    %673 = arith.mulf %668, %672 : vector<16x16xf32>
    %674 = arith.truncf %673 : vector<16x16xf32> to vector<16x16xbf16>
    %675 = vector.extract_strided_slice %540 {offsets = [0, 112], sizes = [16, 16], strides = [1, 1]} : vector<16x128xbf16> to vector<16x16xbf16>
    %cst_245 = arith.constant dense<0.000000e+00> : vector<16x16xf32>
    %676 = tpu.matmul %674, %675, %cst_245 {dimension_numbers = #tpu.dot_dimension_numbers<[1], [0], [0], [1], [0, 0, 1, 1], [], []>} : vector<16x16xbf16>, vector<16x16xbf16>, vector<16x16xf32> -> vector<16x16xf32>
    %677 = tpu.concatenate %557, %574, %591, %608, %625, %642, %659, %676 in 1 : vector<16x16xf32>, vector<16x16xf32>, vector<16x16xf32>, vector<16x16xf32>, vector<16x16xf32>, vector<16x16xf32>, vector<16x16xf32>, vector<16x16xf32> -> vector<16x128xf32>
    %678 = arith.truncf %677 : vector<16x128xf32> to vector<16x128xbf16>
    %c2_246 = arith.constant 2 : index
    %c0_247 = arith.constant 0 : index
    %c0_248 = arith.constant 0 : index
    %679 = vector.load %arg10[%c2_246, %c0_247, %c0_248] : memref<3x128x128xbf16, #tpu.memory_space<vmem>>, vector<1x128x128xbf16>
    %680 = vector.shape_cast %679 : vector<1x128x128xbf16> to vector<128x128xbf16>
    %cst_249 = arith.constant dense<0.000000e+00> : vector<16x128xf32>
    %681 = tpu.matmul %678, %680, %cst_249 {dimension_numbers = #tpu.dot_dimension_numbers<[1], [0], [0], [1], [0, 0, 1, 1], [], []>} : vector<16x128xbf16>, vector<128x128xbf16>, vector<16x128xf32> -> vector<16x128xf32>
    %c2_250 = arith.constant 2 : index
    %c0_251 = arith.constant 0 : index
    %c0_252 = arith.constant 0 : index
    %682 = vector.load %arg11[%c2_250, %c0_251, %c0_252] : memref<3x1x128xf32, #tpu.memory_space<vmem>>, vector<1x1x128xf32>
    %683 = vector.shape_cast %682 : vector<1x1x128xf32> to vector<1x128xf32>
    %684 = vector.broadcast %683 : vector<1x128xf32> to vector<16x128xf32>
    %685 = arith.addf %681, %684 : vector<16x128xf32>
    %686 = arith.addf %492, %685 : vector<16x128xf32>
    %c2_253 = arith.constant 2 : index
    %c0_254 = arith.constant 0 : index
    %c0_255 = arith.constant 0 : index
    %687 = vector.load %arg12[%c2_253, %c0_254, %c0_255] : memref<3x2x128xf32, #tpu.memory_space<vmem>>, vector<1x1x128xf32>
    %688 = vector.shape_cast %687 : vector<1x1x128xf32> to vector<1x128xf32>
    %c2_256 = arith.constant 2 : index
    %c1_257 = arith.constant 1 : index
    %c0_258 = arith.constant 0 : index
    %689 = vector.load %arg12[%c2_256, %c1_257, %c0_258] : memref<3x2x128xf32, #tpu.memory_space<vmem>>, vector<1x1x128xf32>
    %690 = vector.shape_cast %689 : vector<1x1x128xf32> to vector<1x128xf32>
    %cst_259 = arith.constant dense<0.000000e+00> : vector<16xf32>
    %691 = vector.multi_reduction <add>, %686, %cst_259 [1] : vector<16x128xf32> to vector<16xf32>
    %692 = vector.shape_cast %691 : vector<16xf32> to vector<16x1xf32>
    %cst_260 = arith.constant 1.280000e+02 : f32
    %693 = vector.broadcast %cst_260 : f32 to vector<16x1xf32>
    %694 = arith.divf %692, %693 : vector<16x1xf32>
    %695 = vector.broadcast %694 : vector<16x1xf32> to vector<16x128xf32>
    %696 = arith.subf %686, %695 : vector<16x128xf32>
    %697 = arith.mulf %696, %696 : vector<16x128xf32>
    %cst_261 = arith.constant dense<0.000000e+00> : vector<16xf32>
    %698 = vector.multi_reduction <add>, %697, %cst_261 [1] : vector<16x128xf32> to vector<16xf32>
    %699 = vector.shape_cast %698 : vector<16xf32> to vector<16x1xf32>
    %cst_262 = arith.constant 1.280000e+02 : f32
    %700 = vector.broadcast %cst_262 : f32 to vector<16x1xf32>
    %701 = arith.divf %699, %700 : vector<16x1xf32>
    %702 = vector.broadcast %694 : vector<16x1xf32> to vector<16x128xf32>
    %703 = arith.subf %686, %702 : vector<16x128xf32>
    %cst_263 = arith.constant 9.99999974E-6 : f32
    %704 = vector.broadcast %cst_263 : f32 to vector<16x1xf32>
    %705 = arith.addf %701, %704 : vector<16x1xf32>
    %706 = math.rsqrt %705 : vector<16x1xf32>
    %707 = vector.broadcast %706 : vector<16x1xf32> to vector<16x128xf32>
    %708 = arith.mulf %703, %707 : vector<16x128xf32>
    %709 = vector.broadcast %688 : vector<1x128xf32> to vector<16x128xf32>
    %710 = arith.mulf %708, %709 : vector<16x128xf32>
    %711 = vector.broadcast %690 : vector<1x128xf32> to vector<16x128xf32>
    %712 = arith.addf %710, %711 : vector<16x128xf32>
    %713 = arith.truncf %712 : vector<16x128xf32> to vector<16x128xbf16>
    %c2_264 = arith.constant 2 : index
    %c0_265 = arith.constant 0 : index
    %c0_266 = arith.constant 0 : index
    %714 = vector.load %arg13[%c2_264, %c0_265, %c0_266] : memref<3x128x256xbf16, #tpu.memory_space<vmem>>, vector<1x128x256xbf16>
    %715 = vector.shape_cast %714 : vector<1x128x256xbf16> to vector<128x256xbf16>
    %cst_267 = arith.constant dense<0.000000e+00> : vector<16x256xf32>
    %716 = tpu.matmul %713, %715, %cst_267 {dimension_numbers = #tpu.dot_dimension_numbers<[1], [0], [0], [1], [0, 0, 1, 1], [], []>} : vector<16x128xbf16>, vector<128x256xbf16>, vector<16x256xf32> -> vector<16x256xf32>
    %c2_268 = arith.constant 2 : index
    %c0_269 = arith.constant 0 : index
    %c0_270 = arith.constant 0 : index
    %717 = vector.load %arg14[%c2_268, %c0_269, %c0_270] : memref<3x1x256xf32, #tpu.memory_space<vmem>>, vector<1x1x256xf32>
    %718 = vector.shape_cast %717 : vector<1x1x256xf32> to vector<1x256xf32>
    %719 = vector.broadcast %718 : vector<1x256xf32> to vector<16x256xf32>
    %720 = arith.addf %716, %719 : vector<16x256xf32>
    %cst_271 = arith.constant 0.000000e+00 : f32
    %721 = vector.broadcast %cst_271 : f32 to vector<16x256xf32>
    %722 = arith.cmpf oge, %720, %721 : vector<16x256xf32>
    %cst_272 = arith.constant 0.00999999977 : f32
    %723 = vector.broadcast %cst_272 : f32 to vector<16x256xf32>
    %724 = arith.mulf %723, %720 : vector<16x256xf32>
    %725 = arith.select %722, %720, %724 : vector<16x256xi1>, vector<16x256xf32>
    %726 = arith.truncf %725 : vector<16x256xf32> to vector<16x256xbf16>
    %c2_273 = arith.constant 2 : index
    %c0_274 = arith.constant 0 : index
    %c0_275 = arith.constant 0 : index
    %727 = vector.load %arg15[%c2_273, %c0_274, %c0_275] : memref<3x256x128xbf16, #tpu.memory_space<vmem>>, vector<1x256x128xbf16>
    %728 = vector.shape_cast %727 : vector<1x256x128xbf16> to vector<256x128xbf16>
    %cst_276 = arith.constant dense<0.000000e+00> : vector<16x128xf32>
    %729 = tpu.matmul %726, %728, %cst_276 {dimension_numbers = #tpu.dot_dimension_numbers<[1], [0], [0], [1], [0, 0, 1, 1], [], []>} : vector<16x256xbf16>, vector<256x128xbf16>, vector<16x128xf32> -> vector<16x128xf32>
    %c2_277 = arith.constant 2 : index
    %c0_278 = arith.constant 0 : index
    %c0_279 = arith.constant 0 : index
    %730 = vector.load %arg16[%c2_277, %c0_278, %c0_279] : memref<3x1x128xf32, #tpu.memory_space<vmem>>, vector<1x1x128xf32>
    %731 = vector.shape_cast %730 : vector<1x1x128xf32> to vector<1x128xf32>
    %732 = vector.broadcast %731 : vector<1x128xf32> to vector<16x128xf32>
    %733 = arith.addf %729, %732 : vector<16x128xf32>
    %734 = arith.addf %686, %733 : vector<16x128xf32>
    %c0_280 = arith.constant 0 : index
    %c0_281 = arith.constant 0 : index
    %735 = vector.load %arg17[%c0_280, %c0_281] : memref<2x128xf32, #tpu.memory_space<vmem>>, vector<1x128xf32>
    %c1_282 = arith.constant 1 : index
    %c0_283 = arith.constant 0 : index
    %736 = vector.load %arg17[%c1_282, %c0_283] : memref<2x128xf32, #tpu.memory_space<vmem>>, vector<1x128xf32>
    %cst_284 = arith.constant dense<0.000000e+00> : vector<16xf32>
    %737 = vector.multi_reduction <add>, %734, %cst_284 [1] : vector<16x128xf32> to vector<16xf32>
    %738 = vector.shape_cast %737 : vector<16xf32> to vector<16x1xf32>
    %cst_285 = arith.constant 1.280000e+02 : f32
    %739 = vector.broadcast %cst_285 : f32 to vector<16x1xf32>
    %740 = arith.divf %738, %739 : vector<16x1xf32>
    %741 = vector.broadcast %740 : vector<16x1xf32> to vector<16x128xf32>
    %742 = arith.subf %734, %741 : vector<16x128xf32>
    %743 = arith.mulf %742, %742 : vector<16x128xf32>
    %cst_286 = arith.constant dense<0.000000e+00> : vector<16xf32>
    %744 = vector.multi_reduction <add>, %743, %cst_286 [1] : vector<16x128xf32> to vector<16xf32>
    %745 = vector.shape_cast %744 : vector<16xf32> to vector<16x1xf32>
    %cst_287 = arith.constant 1.280000e+02 : f32
    %746 = vector.broadcast %cst_287 : f32 to vector<16x1xf32>
    %747 = arith.divf %745, %746 : vector<16x1xf32>
    %748 = vector.broadcast %740 : vector<16x1xf32> to vector<16x128xf32>
    %749 = arith.subf %734, %748 : vector<16x128xf32>
    %cst_288 = arith.constant 9.99999974E-6 : f32
    %750 = vector.broadcast %cst_288 : f32 to vector<16x1xf32>
    %751 = arith.addf %747, %750 : vector<16x1xf32>
    %752 = math.rsqrt %751 : vector<16x1xf32>
    %753 = vector.broadcast %752 : vector<16x1xf32> to vector<16x128xf32>
    %754 = arith.mulf %749, %753 : vector<16x128xf32>
    %755 = vector.broadcast %735 : vector<1x128xf32> to vector<16x128xf32>
    %756 = arith.mulf %754, %755 : vector<16x128xf32>
    %757 = vector.broadcast %736 : vector<1x128xf32> to vector<16x128xf32>
    %758 = arith.addf %756, %757 : vector<16x128xf32>
    %c0_289 = arith.constant 0 : index
    %c0_290 = arith.constant 0 : index
    %c0_291 = arith.constant 0 : index
    %759 = vector.load %arg18[%c0_289, %c0_290, %c0_291] : memref<1x16x128xf32, #tpu.memory_space<vmem>>, vector<1x16x128xf32>
    %760 = vector.shape_cast %759 : vector<1x16x128xf32> to vector<16x128xf32>
    %761 = vector.shape_cast %758 : vector<16x128xf32> to vector<1x16x128xf32>
    tpu.vector_store %arg18[%c0_289, %c0_290, %c0_291], %761 {strides = array<i32>} : memref<1x16x128xf32, #tpu.memory_space<vmem>>, vector<1x16x128xf32>,
    return
  }
  func.func @transform_0(%arg0: i32) -> (i32, i32, i32) {
    %c0_i32 = arith.constant 0 : i32
    %c0_i32_0 = arith.constant 0 : i32
    %c0_i32_1 = arith.constant 0 : i32
    return %arg0, %c0_i32, %c0_i32_0 : i32, i32, i32
  }
  func.func @transform_1(%arg0: i32) -> (i32, i32, i32) {
    %c0_i32 = arith.constant 0 : i32
    %c0_i32_0 = arith.constant 0 : i32
    %c0_i32_1 = arith.constant 0 : i32
    return %arg0, %c0_i32, %c0_i32_0 : i32, i32, i32
  }
  func.func @transform_2(%arg0: i32) -> (i32, i32, i32) {
    %c0_i32 = arith.constant 0 : i32
    %c0_i32_0 = arith.constant 0 : i32
    %c0_i32_1 = arith.constant 0 : i32
    return %arg0, %c0_i32, %c0_i32_0 : i32, i32, i32
  }
  func.func @transform_3(%arg0: i32) -> (i32, i32) {
    %c0_i32 = arith.constant 0 : i32
    %c0_i32_0 = arith.constant 0 : i32
    %c0_i32_1 = arith.constant 0 : i32
    return %c0_i32, %c0_i32_0 : i32, i32
  }
  func.func @transform_4(%arg0: i32) -> (i32, i32, i32) {
    %c0_i32 = arith.constant 0 : i32
    %c0_i32_0 = arith.constant 0 : i32
    %c0_i32_1 = arith.constant 0 : i32
    %c0_i32_2 = arith.constant 0 : i32
    return %c0_i32, %c0_i32_0, %c0_i32_1 : i32, i32, i32
  }
  func.func @transform_5(%arg0: i32) -> (i32, i32, i32) {
    %c0_i32 = arith.constant 0 : i32
    %c0_i32_0 = arith.constant 0 : i32
    %c0_i32_1 = arith.constant 0 : i32
    %c0_i32_2 = arith.constant 0 : i32
    return %c0_i32, %c0_i32_0, %c0_i32_1 : i32, i32, i32
  }
  func.func @transform_6(%arg0: i32) -> (i32, i32, i32) {
    %c0_i32 = arith.constant 0 : i32
    %c0_i32_0 = arith.constant 0 : i32
    %c0_i32_1 = arith.constant 0 : i32
    %c0_i32_2 = arith.constant 0 : i32
    return %c0_i32, %c0_i32_0, %c0_i32_1 : i32, i32, i32
  }
  func.func @transform_7(%arg0: i32) -> (i32, i32, i32) {
    %c0_i32 = arith.constant 0 : i32
    %c0_i32_0 = arith.constant 0 : i32
    %c0_i32_1 = arith.constant 0 : i32
    %c0_i32_2 = arith.constant 0 : i32
    return %c0_i32, %c0_i32_0, %c0_i32_1 : i32, i32, i32
  }
  func.func @transform_8(%arg0: i32) -> (i32, i32, i32) {
    %c0_i32 = arith.constant 0 : i32
    %c0_i32_0 = arith.constant 0 : i32
    %c0_i32_1 = arith.constant 0 : i32
    %c0_i32_2 = arith.constant 0 : i32
    return %c0_i32, %c0_i32_0, %c0_i32_1 : i32, i32, i32
  }
  func.func @transform_9(%arg0: i32) -> (i32, i32, i32) {
    %c0_i32 = arith.constant 0 : i32
    %c0_i32_0 = arith.constant 0 : i32
    %c0_i32_1 = arith.constant 0 : i32
    %c0_i32_2 = arith.constant 0 : i32
    return %c0_i32, %c0_i32_0, %c0_i32_1 : i32, i32, i32
  }
  func.func @transform_10(%arg0: i32) -> (i32, i32, i32) {
    %c0_i32 = arith.constant 0 : i32
    %c0_i32_0 = arith.constant 0 : i32
    %c0_i32_1 = arith.constant 0 : i32
    %c0_i32_2 = arith.constant 0 : i32
    return %c0_i32, %c0_i32_0, %c0_i32_1 : i32, i32, i32
  }
  func.func @transform_11(%arg0: i32) -> (i32, i32, i32) {
    %c0_i32 = arith.constant 0 : i32
    %c0_i32_0 = arith.constant 0 : i32
    %c0_i32_1 = arith.constant 0 : i32
    %c0_i32_2 = arith.constant 0 : i32
    return %c0_i32, %c0_i32_0, %c0_i32_1 : i32, i32, i32
  }
  func.func @transform_12(%arg0: i32) -> (i32, i32, i32) {
    %c0_i32 = arith.constant 0 : i32
    %c0_i32_0 = arith.constant 0 : i32
    %c0_i32_1 = arith.constant 0 : i32
    %c0_i32_2 = arith.constant 0 : i32
    return %c0_i32, %c0_i32_0, %c0_i32_1 : i32, i32, i32
  }
  func.func @transform_13(%arg0: i32) -> (i32, i32, i32) {
    %c0_i32 = arith.constant 0 : i32
    %c0_i32_0 = arith.constant 0 : i32
    %c0_i32_1 = arith.constant 0 : i32
    %c0_i32_2 = arith.constant 0 : i32
    return %c0_i32, %c0_i32_0, %c0_i32_1 : i32, i32, i32
  }
  func.func @transform_14(%arg0: i32) -> (i32, i32, i32) {
    %c0_i32 = arith.constant 0 : i32
    %c0_i32_0 = arith.constant 0 : i32
    %c0_i32_1 = arith.constant 0 : i32
    %c0_i32_2 = arith.constant 0 : i32
    return %c0_i32, %c0_i32_0, %c0_i32_1 : i32, i32, i32
  }
  func.func @transform_15(%arg0: i32) -> (i32, i32, i32) {
    %c0_i32 = arith.constant 0 : i32
    %c0_i32_0 = arith.constant 0 : i32
    %c0_i32_1 = arith.constant 0 : i32
    %c0_i32_2 = arith.constant 0 : i32
    return %c0_i32, %c0_i32_0, %c0_i32_1 : i32, i32, i32
  }
  func.func @transform_16(%arg0: i32) -> (i32, i32) {
    %c0_i32 = arith.constant 0 : i32
    %c0_i32_0 = arith.constant 0 : i32
    %c0_i32_1 = arith.constant 0 : i32
    return %c0_i32, %c0_i32_0 : i32, i32
  }
  func.func @transform_17(%arg0: i32) -> (i32, i32, i32) {
    %c0_i32 = arith.constant 0 : i32
    %c0_i32_0 = arith.constant 0 : i32
    %c0_i32_1 = arith.constant 0 : i32
    return %arg0, %c0_i32, %c0_i32_0 : i32, i32, i32
  }
}

</mosaic_0001>

<bundles_post_ra>
// kernel: transformer_encoder.1
= control target key start
LH: loop header
LB: loop body
LE: loop exit
PB: predicated region body
PF: predicated region fallthrough
CT: control target
= control target key end

     0   :  { %s9467_s0 = inlined_call_operand.vmem [shape: f32[2,16,128], index: 0, kind: input, shape index: {}]   ;;  %s9468_s1 = inlined_call_operand.vmem [shape: f32[2,16,128], index: 1, kind: input, shape index: {}]   ;;  %s9469_s2 = inlined_call_operand.vmem [shape: f32[2,1,16], index: 2, kind: input, shape index: {}]   ;;  %s9470_s3 = inlined_call_operand.vmem [shape: f32[16,16], index: 3, kind: input, shape index: {}]   ;;  %s9471_s4 = inlined_call_operand.vmem [shape: f32[3,2,128], index: 4, kind: input, shape index: {}]   ;;  %s9472_s5 = inlined_call_operand.hbm [shape: bf16[3,128,256], index: 5, kind: input, shape index: {}]   ;;  %s9473_s6 = inlined_call_operand.vmem [shape: f32[3,1,256], index: 6, kind: input, shape index: {}]   ;;  %s9474_s7 = inlined_call_operand.hbm [shape: bf16[3,128,128], index: 7, kind: input, shape index: {}]   ;;  %s9475_s8 = inlined_call_operand.vmem [shape: f32[3,1,128], index: 8, kind: input, shape index: {}]   ;;  %s9476_s9 = inlined_call_operand.hbm [shape: bf16[3,128,128], index: 9, kind: input, shape index: {}]   ;;  %s9477_s10 = inlined_call_operand.vmem [shape: f32[3,1,128], index: 10, kind: input, shape index: {}]   ;;  %s9478_s11 = inlined_call_operand.vmem [shape: f32[3,2,128], index: 11, kind: input, shape index: {}]   ;;  %s9479_s12 = inlined_call_operand.hbm [shape: bf16[3,128,256], index: 12, kind: input, shape index: {}]   ;;  %s9480_s13 = inlined_call_operand.vmem [shape: f32[3,1,256], index: 13, kind: input, shape index: {}]   ;;  %s9481_s14 = inlined_call_operand.hbm [shape: bf16[3,256,128], index: 14, kind: input, shape index: {}]   ;;  %s9482_s15 = inlined_call_operand.vmem [shape: f32[3,1,128], index: 15, kind: input, shape index: {}]   ;;  %s9483_s16 = inlined_call_operand.vmem [shape: f32[2,128], index: 16, kind: input, shape index: {}]   ;;  %s9484_s17 = inlined_call_operand.vmem [shape: f32[2,16,128], index: 17, kind: output, shape index: {}]  }
   0x1   :  { %9489 = sst [smem:[#allocation13_spill]] %s9467_s0 }
   0x2   :  { %9490 = sst [smem:[#allocation14_spill]] %s9468_s1 }
   0x3   :  { %9491 = sst [smem:[#allocation15_spill]] %s9474_s7 }
   0x4   :  { %22 = vsyncpa [#allocation3], 0 }
   0x5   :  { %23 = vsyncpa [#allocation5], 0 }
   0x6   :  { %24 = vsyncpa [#allocation8], 0  ;;  %s8208_s24 = smov 0  }
   0x7 LB: > { %s8099_s25 = smov [#allocation4]   ;;  %s8214_s27 = sadd.s32 4294967295, %s8097_s24   ;;  %s8097_s24 = sphi %s8208_s24, %s30_s24  }
   0x8   : > { %s467_s26 = sshll.u32 %s8099_s25, 4  ;;  %p6375_p0 = scmp.ge.s32.totalorder %s8097_s24, 1  ;;  %s468_s26 = int_to_ptr.vmem [resolvable:$true] %s467_s26 }
   0x9   : > { %p433_p1 = scmp.lt.s32.totalorder %s8097_s24, 3  ;;  %p7341_p2 = scmp.eq.s32.totalorder %s8214_s27, 0 }
   0xa   : > { %s8100_s0 = smov [#allocation7]   ;;  %s8101_s18 = smov [#allocation2]  }
   0xb   : > { %p8219_p3 = pnand %p6375_p0, %p433_p1  ;;  %s502_s30 = sshll.u32 %s8100_s0, 4  ;;  %s8231_s30 = int_to_ptr.vmem [resolvable:$true] %s502_s30 }
   0xc   : > { %s451_s19 = sshll.u32 %s8101_s18, 4  ;;  %s7960_s20 = scalar_lea.vmem %s468_s26, 3072  ;;  %s8233_s19 = int_to_ptr.vmem [resolvable:$true] %s451_s19 }
   0xd   : > { %p7325_p4 = pneg %p8219_p3  ;;  %p7961_p7 = scmp.ne.s32.totalorder %s468_s26, %s7960_s20 }
   0xe   : > { %p7968_p10 = scmp.lt.s32.totalorder %s468_s26, %s468_s26  ;;  %p7969_p11 = scmp.lt.s32.totalorder %s7960_s20, %s7960_s20 }
   0xf   : > { %p8227_p5 = pnand %p7341_p2, %p7325_p4 }
  0x10   : > { %p7970_p12 = por %p7969_p11, %p7968_p10 }
  0x11   : > { %p8237_p6 = pneg %p8227_p5 }
  0x13   : > { %p7963_p8 = pnand %p7961_p7, %p8237_p6 }
  0x15   : > { %p7964_p9 = pneg %p7963_p8 }
  0x17   : > { %p7971_p13 = pnand %p7970_p12, %p7964_p9 }
  0x19   : > { %7974 = shalt.err (!%p7971_p13)
}
  0x1a   : > { %s9485_s21 = smov 64   ;;  %s9487_s22 = smov 4  }
  0x1b   : > { %s9495_s7 = sld [smem:[#allocation15_spill]]  ;;  %s7986_s0 = scalar_lea.vmem %s8231_s30, 6144 }
  0x1c   : > { %p7987_p0 = scmp.ne.s32.totalorder %s8231_s30, %s7986_s0  ;;  %p7994_p7 = scmp.lt.s32.totalorder %s8231_s30, %s8231_s30 }
  0x1d   : > { %p7995_p8 = scmp.lt.s32.totalorder %s7986_s0, %s7986_s0 }
  0x1e   : > { %p7989_p1 = pnand %p7987_p0, %p8237_p6 }
  0x1f   : > { %p7996_p9 = por %p7995_p8, %p7994_p7 }
  0x20   : > { %p7990_p4 = pneg %p7989_p1 }
  0x21   : > { %7331 = dma.hbm_to_vmem [thread:$0]  (!%p8227_p5), %s9495_s7, 3072, %s468_s26, [#allocation5], %s9485_s21, %s9485_s21, %s9487_s22  }
  0x22   : > { %p7997_p10 = pnand %p7996_p9, %p7990_p4 }
  0x24   : > { %8000 = shalt.err (!%p7997_p10)
}
  0x25   : > { %s8104_s18 = smov 128   ;;  %s8105_s20 = smov 8  }
  0x26   : > { %7337 = dma.hbm_to_vmem [thread:$0]  (!%p8227_p5), %s9479_s12, 6144, %s8231_s30, [#allocation8], %s8104_s18, %s8104_s18, %s8105_s20  }
  0x27   : > { %s8012_s25 = scalar_lea.vmem %s8233_s19, 6144  ;;  %p8020_p0 = scmp.lt.s32.totalorder %s8233_s19, %s8233_s19 }
  0x28   : > { %p8013_p11 = scmp.ne.s32.totalorder %s8233_s19, %s8012_s25  ;;  %p8021_p1 = scmp.lt.s32.totalorder %s8012_s25, %s8012_s25 }
  0x2a   : > { %p8015_p12 = pnand %p8013_p11, %p8237_p6  ;;  %p8022_p4 = por %p8021_p1, %p8020_p0 }
  0x2c   : > { %p8016_p13 = pneg %p8015_p12 }
  0x2e   : > { %p8023_p7 = pnand %p8022_p4, %p8016_p13 }
  0x30   : > { %8026 = shalt.err (!%p8023_p7)
}
  0x31   : > { %7328 = dma.hbm_to_vmem [thread:$0]  (!%p8227_p5), %s9472_s5, 6144, %s8233_s19, [#allocation3], %s8104_s18, %s8104_s18, %s8105_s20  }
  0x32   : > { %s8106_s30 = smov [#allocation6]   ;;  %s8107_s23 = smov [#allocation9]  }
  0x33   : > { %s483_s26 = sshll.u32 %s8106_s30, 4  ;;  %s518_s22 = sshll.u32 %s8107_s23, 4  ;;  %s484_s26 = int_to_ptr.vmem [resolvable:$true] %s483_s26  ;;  %s519_s22 = int_to_ptr.vmem [resolvable:$true] %s518_s22 }
  0x34   : > { %s8038_s7 = scalar_lea.vmem %s484_s26, 3072  ;;  %p8046_p11 = scmp.lt.s32.totalorder %s484_s26, %s484_s26 }
  0x35   : > { %p8039_p8 = scmp.ne.s32.totalorder %s484_s26, %s8038_s7  ;;  %p8047_p12 = scmp.lt.s32.totalorder %s8038_s7, %s8038_s7 }
  0x37   : > { %p8041_p9 = pnand %p8039_p8, %p8237_p6  ;;  %p8048_p13 = por %p8047_p12, %p8046_p11 }
  0x39   : > { %p8042_p10 = pneg %p8041_p9 }
  0x3b   : > { %p8049_p0 = pnand %p8048_p13, %p8042_p10 }
  0x3d   : > { %8052 = shalt.err (!%p8049_p0)
}
  0x3e   : > { %s9496_s21 = smov 4   ;;  %s9497_s19 = smov 64  }
  0x3f   : > { %7334 = dma.hbm_to_vmem [thread:$0]  (!%p8227_p5), %s9476_s9, 3072, %s484_s26, [#allocation5], %s9497_s19, %s9497_s19, %s9496_s21  }
  0x40   : > { %s8064_s25 = scalar_lea.vmem %s519_s22, 6144  ;;  %p8072_p8 = scmp.lt.s32.totalorder %s519_s22, %s519_s22 }
  0x41   : > { %p8065_p1 = scmp.ne.s32.totalorder %s519_s22, %s8064_s25  ;;  %p8073_p9 = scmp.lt.s32.totalorder %s8064_s25, %s8064_s25 }
  0x43   : > { %p8067_p4 = pnand %p8065_p1, %p8237_p6  ;;  %p8074_p11 = por %p8073_p9, %p8072_p8 }
  0x45   : > { %p8068_p7 = pneg %p8067_p4 }
  0x47   : > { %p8075_p10 = pnand %p8074_p11, %p8068_p7 }
  0x49   : > { %8078 = shalt.err (!%p8075_p10)
}
  0x4a   : > { %7340 = dma.hbm_to_vmem [thread:$0]  (!%p8227_p5), %s9481_s14, 6144, %s519_s22, [#allocation8], %s9497_s19, %s9497_s19, %s9496_s21  }
  0x4b   : > { %562 = sbr.rel (%p8219_p3) target bundleno = 9083 (0x237b), region = 88 }
  0x50   : > { %8084 = dma.done.wait (%p7341_p2), [#allocation3], 6144  }
  0x51   : > { %8086 = vsyncadd (%p7341_p2), [#allocation3], 4294961152 }
  0x52   : > { %8088 = dma.done.wait (%p7341_p2), [#allocation5], 6144  }
  0x53   : > { %8090 = vsyncadd (%p7341_p2), [#allocation5], 4294961152 }
  0x54   : > { %8092 = dma.done.wait (%p7341_p2), [#allocation8], 12288  }
  0x55   : > { %8094 = vsyncadd (%p7341_p2), [#allocation8], 4294955008  ;;  %p638_p3 = scmp.lt.s32.totalorder %s8214_s27, 1  ;;  %s9498_s22 = sld [smem:[#allocation13_spill]]  ;;  %v7483_v2 = vld [vmem:[#allocation4 + $0x38] sm:$0xff]   ;;  %v8108_v3 = vmov 0.0   ;;  %v730_v58 = vlaneseq }
  0x56   : > { %6897 = vmatprep.subr.bf16.mxu1 %v8108_v3  ;;  %v7484_v12 = vld [vmem:[#allocation2 + $0x74] ss:$8 sps:$4 sm:$0xff]   ;;  %v7486_v13 = vld [vmem:[#allocation2 + $0x70] ss:$8 sps:$4 sm:$0xff]   ;;  %v7488_v15 = vld [vmem:[#allocation2 + $0x64] ss:$8 sps:$4 sm:$0xff]  }
  0x57   : > { %s9501_s27 = smov (!%p638_p3, %s8214_s27), 1  ;;  %6898 = vmatpush3.bf16.msra.mxu1 %v7483_v2  ;;  %820 = vmatprep.subr.bf16.mxu0 %v7484_v12  ;;  %v7487_v14 = vld [vmem:[#allocation4 + $0x30] sm:$0xff]   ;;  %v7490_v16 = vld [vmem:[#allocation2 + $0x60] ss:$8 sps:$4 sm:$0xff]   ;;  %v7496_v21 = vld [vmem:[#allocation2 + $0x44] ss:$8 sps:$4 sm:$0xff]  }
  0x58   : > { %s8314_s28 = sshll.u32 %s9501_s27, 4  ;;  %6899 = vmatprep.subr.bf16.mxu1 %v8108_v3  ;;  %821 = vmatpush1.bf16.msra.mxu0 %v7486_v13  ;;  %v7491_v17 = vld [vmem:[#allocation4 + $0x28] sm:$0xff]   ;;  %v7492_v18 = vld [vmem:[#allocation2 + $0x54] ss:$8 sps:$4 sm:$0xff]   ;;  %v7494_v19 = vld [vmem:[#allocation2 + $0x50] ss:$8 sps:$4 sm:$0xff]   ;;  %s650_s21 = scalar_lea.vmem %s9469_s2, %s9501_s27 }
  0x59   : > { %822 = vmatprep.subr.bf16.mxu0 %v7488_v15  ;;  %v7495_v20 = vld [vmem:[#allocation4 + $0x20] sm:$0xff]   ;;  %vm8109_vm0 = vmmov 0   ;;  %v7500_v23 = vld [vmem:[#allocation2 + $0x34] ss:$8 sps:$4 sm:$0xff]   ;;  %v7502_v25 = vld [vmem:[#allocation2 + $0x30] ss:$8 sps:$4 sm:$0xff]  }
  0x5a   : > { %v7498_v22 = vld [vmem:[#allocation2 + $0x40] ss:$8 sps:$4 sm:$0xff]   ;;  %6913 = vmatprep.mubr.msk.bf16.mxu1 %vm8109_vm0, %v8108_v3  ;;  %v7499_v24 = vld [vmem:[#allocation4 + $0x18] sm:$0xff]   ;;  %v7504_v26 = vld [vmem:[#allocation2 + $0x24] ss:$8 sps:$4 sm:$0xff]   ;;  %v8110_v35 = vmov 0  }
  0x5b   : > { %s8320_s30 = scalar_lea.vmem %s9498_s22, %s8314_s28  ;;  %6900 = vmatpush3.bf16.msra.mxu1 %v7487_v14  ;;  %v7503_v27 = vld [vmem:[#allocation4 + $0x10] sm:$0xff]   ;;  %v7506_v28 = vld [vmem:[#allocation2 + $0x20] ss:$8 sps:$4 sm:$0xff]   ;;  %v7512_v32 = vld [vmem:[#allocation2 + $0x4] ss:$8 sps:$4 sm:$0xff]   ;;  %852 = vmatprep.mubr.bf16.mxu0 %v8110_v35  ;;  %s9499_s25 = sld [smem:[#allocation14_spill]] }
  0x5c   : > { %v657_v0 = vld [vmem:[%s8320_s30] sm:$0xff]  ;;  %v658_v1 = vld [vmem:[%s8320_s30 + $0x8] sm:$0xff]  ;;  %6901 = vmatprep.subr.bf16.mxu1 %v8108_v3  ;;  %823 = vmatpush1.bf16.msra.mxu0 %v7490_v16  ;;  %v7508_v29 = vld [vmem:[#allocation2 + $0x14] ss:$8 sps:$4 sm:$0xff]   ;;  %v731_v59 = vshrl.u32 %v730_v58, 7  ;;  %vm979_vm1 = vcmask 130048  }
  0x5d   : > { %674 = vadd.xlane.f32.xlu0 %v657_v0  ;;  %824 = vmatprep.subr.bf16.mxu0 %v7492_v18  ;;  %v7507_v30 = vld [vmem:[#allocation4 + $0x8] sm:$0xff]   ;;  %v7510_v31 = vld [vmem:[#allocation2 + $0x10] ss:$8 sps:$4 sm:$0xff]   ;;  %v7511_v33 = vld [vmem:[#allocation4] sm:$0xff]   ;;  %s8111_s27 = smov 112   ;;  %s8112_s0 = smov 96  }
  0x5e   : > { %v7514_v34 = vld [vmem:[#allocation2] ss:$8 sps:$4 sm:$0xff]   ;;  %v8365_v61 = vsub.s32 1, %v731_v59  ;;  %s8113_s29 = smov 80   ;;  %s8114_s1 = smov 64   ;;  %vm2002_vm2 = vcmask 261120  }
  0x5f   : > { %6902 = vmatpush3.bf16.msra.mxu1 %v7491_v17  ;;  %v6395_v43 = vld [vmem:[%s9471_s4] ss:$0 sm:$0xff]  ;;  %v6396_v47 = vld [vmem:[%s9471_s4 + $0x1] ss:$0 sm:$0xff]  ;;  %s8115_s22 = smov 48   ;;  %s8116_s26 = smov 32  }
  0x60   : > { %6903 = vmatprep.subr.bf16.mxu1 %v8108_v3  ;;  %825 = vmatpush1.bf16.msra.mxu0 %v7494_v19  ;;  %v6413_v14 = vld [vmem:[%s9475_s8] ss:$0 sm:$0xff]  ;;  %s8117_s23 = smov 16   ;;  %vm2005_vm3 = vcmask 392192   ;;  %vm2008_vm4 = vcmask 523264   ;;  %vm2011_vm5 = vcmask 654336  }
  0x61   : > { %676 = vadd.xlane.f32.xlu0 %v658_v1  ;;  %826 = vmatprep.subr.bf16.mxu0 %v7496_v21  ;;  %s8356_s7 = scalar_lea.vmem %s9499_s25, %s8314_s28  ;;  %v661_v21 = vld [vmem:[%s9470_s3] sm:$0xff]  ;;  %vm2014_vm6 = vcmask 785408   ;;  %vm2017_vm7 = vcmask 916480  }
  0x62   : > { %v659_v51 = vld [vmem:[%s8356_s7] sm:$0xff]  ;;  %v660_v52 = vld [vmem:[%s8356_s7 + $0x8] sm:$0xff] }
  0x63   : > { %6904 = vmatpush3.bf16.msra.mxu1 %v7495_v20 }
  0x64   : > { %6905 = vmatprep.subr.bf16.mxu1 %v8108_v3  ;;  %827 = vmatpush1.bf16.msra.mxu0 %v7498_v22  ;;  %v6394_v22 = vld [vmem:[%s650_s21] ss:$0 sm:$0xff] }
  0x65   : > { %828 = vmatprep.subr.bf16.mxu0 %v7500_v23  ;;  %v8396_v23 = vadd.f32 %v6394_v22, %v661_v21 }
  0x67   : > { %6906 = vmatpush3.bf16.msra.mxu1 %v7499_v24  ;;  %v662_v24 = vld [vmem:[%s9470_s3 + $0x8] sm:$0xff] }
  0x68   : > { %6907 = vmatprep.subr.bf16.mxu1 %v8108_v3  ;;  %829 = vmatpush1.bf16.msra.mxu0 %v7502_v25 }
  0x69   : > { %830 = vmatprep.subr.bf16.mxu0 %v7504_v26  ;;  %v8401_v26 = vadd.f32 %v6394_v22, %v662_v24 }
  0x6b   : > { %6908 = vmatpush3.bf16.msra.mxu1 %v7503_v27 }
  0x6c   : > { %6909 = vmatprep.subr.bf16.mxu1 %v8108_v3  ;;  %831 = vmatpush1.bf16.msra.mxu0 %v7506_v28 }
  0x6d   : > { %832 = vmatprep.subr.bf16.mxu0 %v7508_v29 }
  0x6f   : > { %6910 = vmatpush3.bf16.msra.mxu1 %v7507_v30 }
  0x70   : > { %6911 = vmatprep.subr.bf16.mxu1 %v8108_v3  ;;  %833 = vmatpush1.bf16.msra.mxu0 %v7510_v31 }
  0x71   : > { %834 = vmatprep.subr.bf16.mxu0 %v7512_v32 }
  0x73   : > { %6912 = vmatpush3.bf16.msra.mxu1 %v7511_v33 }
  0x74   : > { %6917 = vmatprep.subr.bf16.mxu1 %v8108_v3  ;;  %835 = vmatpush1.bf16.msra.mxu0 %v7514_v34 }
  0x75   : > { %6941 = vmatprep.subr.bf16.mxu0 %v8108_v3 }
  0xe6   : > { %v675_v4 = vpop.xlane.xlu0 %674 }
  0xe7   : > { %v679_v5 = vmul.f32 0.0078125, %v675_v4 }
  0xe9   : > { %v8326_v6 = vsub.f32 %v657_v0, %v679_v5  ;;  %v728_v0 = vld [vmem:[%s9473_s6] sm:$0x3] }
  0xea   : > { %v677_v7 = vpop.xlane.xlu0 %676  ;;  %v737_v4 = vrot.slane %v728_v0, %v8365_v61 }
  0xeb   : > { %v680_v8 = vmul.f32 0.0078125, %v677_v7  ;;  %v683_v9 = vmul.f32 %v8326_v6, %v8326_v6 }
  0xed   : > { %685 = vadd.xlane.f32.xlu1 %v683_v9  ;;  %v8330_v10 = vsub.f32 %v658_v1, %v680_v8  ;;  %v8371_v8 = vsub.s32 0, %v731_v59 }
  0xef   : > { %v684_v11 = vmul.f32 %v8330_v10, %v8330_v10  ;;  %v733_v12 = vrot.slane %v728_v0, %v8371_v8 }
  0xf1   : > { %687 = vadd.xlane.f32.xlu1 %v684_v11 }
 0x176   : > { %v686_v36 = vpop.xlane.xlu1 %685 }
 0x177   : > { %v689_v37 = vmul.f32 0.0078125, %v686_v36 }
 0x179   : > { %v691_v38 = vadd.f32 1e-05, %v689_v37 }
 0x17a   : > { %v688_v39 = vpop.xlane.xlu1 %687 }
 0x17b   : > { %7723 = vrsqrt.f32 %v691_v38  ;;  %v690_v40 = vmul.f32 0.0078125, %v688_v39 }
 0x17d   : > { %v692_v41 = vadd.f32 1e-05, %v690_v40 }
 0x17f   : > { %7725 = vrsqrt.f32 %v692_v41 }
 0x188   : > { %v7724_v42 = vpop.eup %7723 }
 0x189   : > { %v695_v44 = vmul.f32 %v7724_v42, %v8326_v6 }
 0x18b   : > { %v701_v45 = vmul.f32 %v6395_v43, %v695_v44 }
 0x18c   : > { %v7726_v46 = vpop.eup %7725 }
 0x18d   : > { %v696_v48 = vmul.f32 %v7726_v46, %v8330_v10  ;;  %v707_v50 = vadd.f32 %v6396_v47, %v701_v45 }
 0x18f   : > { %v702_v49 = vmul.f32 %v6395_v43, %v696_v48  ;;  %v709_v55 = vadd.f32 %v707_v50, %v659_v51 }
 0x191   : > { %v708_v53 = vadd.f32 %v6396_v47, %v702_v49 }
 0x193   : > { %v865_v54 = vpack.c.bf16 %v708_v53, %v707_v50  ;;  %v710_v56 = vadd.f32 %v708_v53, %v660_v52 }
 0x195   : > { %6914 = vmatmul.mubr.bf16.vlgmr.msra.gmra.mxu1 %v865_v54  ;;  %v711_v57 = vpack.c.bf16 %v710_v56, %v709_v55 }
 0x196   : > { %6919 = vmatprep.mubr.msk.bf16.mxu1 %vm8109_vm0, %v8108_v3 }
 0x197   : > { %853 = vmatmul.mubr.bf16.vlgmr.msra.gmra.mxu0 %v711_v57 }
 0x198   : > { %6943 = vmatprep.mubr.msk.bf16.mxu0 %vm8109_vm0, %v8108_v3 }
 0x255   : > { %v971_v60 = vpop.f32.mrf.mxu1 }
 0x256   : > { %v972_v18 = vadd.f32 %v6413_v14, %v971_v60 }
 0x257   : > { %v854_v62 = vpop.f32.mrf.mxu0  ;;  %v6915_v63 = vpop.f32.mrf.mxu1 }
 0x258   : > { %v855_v17 = vadd.f32 %v854_v62, %v733_v12 }
 0x259   : > { %v856_v1 = vpop.f32.mrf.mxu0  ;;  %v974_v2 = vpop.f32.mrf.mxu1 }
 0x25a   : > { %v857_v9 = vadd.f32 %v856_v1, %v737_v4  ;;  %v975_v16 = vadd.f32 %v6413_v14, %v974_v2 }
 0x25b   : > { %v858_v5 = vpop.f32.mrf.mxu0  ;;  %v6916_v6 = vpop.f32.mrf.mxu1 }
 0x25c   : > { %v859_v15 = vadd.f32 %v858_v5, %v733_v12  ;;  %v8382_v20 = vpack.c.bf16 %v975_v16, %v972_v18 }
 0x25d   : > { %v860_v7 = vpop.f32.mrf.mxu0 }
 0x25e   : > { %v861_v10 = vadd.f32 %v860_v7, %v737_v4  ;;  %v863_v19 = vpack.c.bf16 %v859_v15, %v855_v17 }
 0x260   : > { %v8373_v11 = vpack.c.bf16 %v861_v10, %v857_v9 }
 0x262   : > { %v984_v13 = vsel %vm979_vm1, %v8373_v11, 0 }
 0x263   : > { %6918 = vmatpush3.bf16.xpose.msra.mxu1 %v984_v13 }
 0x264   : > { %6923 = vmatprep.subr.bf16.mxu1 %v8108_v3 }
 0x26a   : > { %6920 = vmatmul.mubr.msk.bf16.vlgmr.msra.gmra.mxu1 %vm979_vm1, %v863_v19 }
 0x26b   : > { %6924 = vmatpush3.bf16.msra.mxu1 %v8382_v20  ;;  %6925 = vmatprep.mubr.msk.bf16.mxu1 %vm8109_vm0, %v8108_v3 }
 0x26c   : > { %6929 = vmatprep.subr.bf16.mxu1 %v8108_v3 }
 0x32a   : > { %v1020_v25 = vpop.f32.mrf.mxu1 }
 0x32b   : > { %v1021_v27 = vadd.f32 %v1020_v25, %v8396_v23 }
 0x32c   : > { %v6921_v28 = vpop.f32.mrf.mxu1 }
 0x32d   : > { %v1027_v29 = vsel %vm979_vm1, %v1021_v27, -inf }
 0x32e   : > { %1028 = vmax.xlane.f32.xlu0 %v1027_v29  ;;  %v1023_v30 = vpop.f32.mrf.mxu1 }
 0x32f   : > { %v1024_v31 = vadd.f32 %v1023_v30, %v8401_v26 }
 0x330   : > { %v6922_v32 = vpop.f32.mrf.mxu1 }
 0x331   : > { %v1030_v33 = vsel %vm979_vm1, %v1024_v31, -inf }
 0x332   : > { %1031 = vmax.xlane.f32.xlu1 %v1030_v33 }
 0x3b7   : > { %v1029_v34 = vpop.xlane.xlu0 %1028 }
 0x3b8   : > { %v1033_v36 = vsub.f32 %v1021_v27, %v1029_v34 }
 0x3ba   : > { %v1035_v37 = vmul.f32 1.442695, %v1033_v36 }
 0x3bb   : > { %v1032_v38 = vpop.xlane.xlu1 %1031 }
 0x3bc   : > { %7727 = vpow2.f32 %v1035_v37  ;;  %v1034_v39 = vsub.f32 %v1024_v31, %v1032_v38 }
 0x3be   : > { %v1037_v40 = vmul.f32 1.442695, %v1034_v39 }
 0x3c0   : > { %7729 = vpow2.f32 %v1037_v40 }
 0x3c9   : > { %v7728_v41 = vpop.eup %7727 }
 0x3ca   : > { %v1039_v42 = vsel %vm979_vm1, %v7728_v41, 0.0 }
 0x3cb   : > { %1040 = vadd.xlane.f32.xlu0 %v1039_v42 }
 0x3cd   : > { %v7730_v43 = vpop.eup %7729 }
 0x3ce   : > { %v1042_v44 = vsel %vm979_vm1, %v7730_v43, 0.0 }
 0x3cf   : > { %1043 = vadd.xlane.f32.xlu1 %v1042_v44 }
 0x3e0   : > { %1095 = vrot.lane.b32.xlu1 %v863_v19, %s8111_s27 }
 0x3e1   : > { %1098 = vrot.lane.b32.xlu0 %v8373_v11, %s8111_s27 }
 0x3e4   : > { %1220 = vrot.lane.b32.xlu1 %v8373_v11, %s8112_s0 }
 0x3e5   : > { %1341 = vrot.lane.b32.xlu0 %v8373_v11, %s8113_s29 }
 0x3e8   : > { %1218 = vrot.lane.b32.xlu1 %v863_v19, %s8112_s0 }
 0x3e9   : > { %1462 = vrot.lane.b32.xlu0 %v8373_v11, %s8114_s1 }
 0x3ec   : > { %1339 = vrot.lane.b32.xlu1 %v863_v19, %s8113_s29 }
 0x3ed   : > { %1583 = vrot.lane.b32.xlu0 %v8373_v11, %s8115_s22 }
 0x3f0   : > { %1460 = vrot.lane.b32.xlu1 %v863_v19, %s8114_s1 }
 0x3f1   : > { %1704 = vrot.lane.b32.xlu0 %v8373_v11, %s8116_s26 }
 0x3f4   : > { %1581 = vrot.lane.b32.xlu1 %v863_v19, %s8115_s22 }
 0x3f5   : > { %1825 = vrot.lane.b32.xlu0 %v8373_v11, %s8117_s23 }
 0x3f8   : > { %1702 = vrot.lane.b32.xlu1 %v863_v19, %s8116_s26 }
 0x3fc   : > { %1823 = vrot.lane.b32.xlu1 %v863_v19, %s8117_s23 }
 0x454   : > { %v1041_v45 = vpop.xlane.xlu0 %1040 }
 0x455   : > { %7731 = vrcp.f32 %v1041_v45 }
 0x458   : > { %v1044_v46 = vpop.xlane.xlu1 %1043  ;;  %v1099_v48 = vpop.permute.xlu0 %1098 }
 0x459   : > { %7733 = vrcp.f32 %v1044_v46  ;;  %v1104_v59 = vsel %vm979_vm1, %v1099_v48, 0 }
 0x45c   : > { %v1096_v47 = vpop.permute.xlu1 %1095  ;;  %v1342_v53 = vpop.permute.xlu0 %1341 }
 0x45d   : > { %v1347_v57 = vsel %vm979_vm1, %v1342_v53, 0 }
 0x460   : > { %v1221_v49 = vpop.permute.xlu1 %1220  ;;  %v1463_v60 = vpop.permute.xlu0 %1462 }
 0x461   : > { %v1226_v50 = vsel %vm979_vm1, %v1221_v49, 0  ;;  %v1468_v63 = vsel %vm979_vm1, %v1463_v60, 0 }
 0x462   : > { %6942 = vmatpush3.bf16.xpose.msra.mxu0 %v1226_v50  ;;  %v7732_v51 = vpop.eup %7731 }
 0x463   : > { %6953 = vmatprep.subr.bf16.mxu0 %v8108_v3  ;;  %v1047_v54 = vmul.f32 %v7732_v51, %v7728_v41 }
 0x464   : > { %v1219_v56 = vpop.permute.xlu1 %1218  ;;  %v1584_v0 = vpop.permute.xlu0 %1583 }
 0x465   : > { %v1589_v2 = vsel %vm979_vm1, %v1584_v0, 0 }
 0x466   : > { %v7734_v52 = vpop.eup %7733 }
 0x467   : > { %v1048_v55 = vmul.f32 %v7734_v52, %v7730_v43 }
 0x468   : > { %v1340_v62 = vpop.permute.xlu1 %1339  ;;  %v1705_v4 = vpop.permute.xlu0 %1704 }
 0x469   : > { %6944 = vmatmul.mubr.msk.bf16.vlgmr.msra.gmra.mxu0 %vm979_vm1, %v1219_v56  ;;  %v1049_v58 = vpack.c.bf16 %v1048_v55, %v1047_v54  ;;  %v1710_v6 = vsel %vm979_vm1, %v1705_v4, 0 }
 0x46a   : > { %6954 = vmatpush3.bf16.xpose.msra.mxu0 %v1347_v57  ;;  %6955 = vmatprep.mubr.msk.bf16.mxu0 %vm8109_vm0, %v8108_v3 }
 0x46b   : > { %6926 = vmatmul.mubr.msk.bf16.vlgmr.msra.gmra.mxu1 %vm979_vm1, %v1049_v58  ;;  %6965 = vmatprep.subr.bf16.mxu0 %v8108_v3 }
 0x46c   : > { %6930 = vmatpush3.bf16.xpose.msra.mxu1 %v1104_v59  ;;  %6931 = vmatprep.mubr.msk.bf16.mxu1 %vm8109_vm0, %v8108_v3  ;;  %v1461_v1 = vpop.permute.xlu1 %1460  ;;  %v1826_v7 = vpop.permute.xlu0 %1825 }
 0x46d   : > { %6935 = vmatprep.subr.bf16.mxu1 %v8108_v3  ;;  %v1831_v10 = vsel %vm979_vm1, %v1826_v7, 0 }
 0x470   : > { %v1582_v5 = vpop.permute.xlu1 %1581 }
 0x471   : > { %6956 = vmatmul.mubr.msk.bf16.vlgmr.msra.gmra.mxu0 %vm979_vm1, %v1340_v62 }
 0x472   : > { %6966 = vmatpush3.bf16.xpose.msra.mxu0 %v1468_v63  ;;  %6967 = vmatprep.mubr.msk.bf16.mxu0 %vm8109_vm0, %v8108_v3 }
 0x473   : > { %6932 = vmatmul.mubr.msk.bf16.vlgmr.msra.gmra.mxu1 %vm979_vm1, %v1096_v47  ;;  %6977 = vmatprep.subr.bf16.mxu0 %v8108_v3 }
 0x474   : > { %6937 = vmatprep.mubr.msk.bf16.mxu1 %vm8109_vm0, %v8108_v3  ;;  %v1703_v9 = vpop.permute.xlu1 %1702 }
 0x478   : > { %v1824_v11 = vpop.permute.xlu1 %1823 }
 0x479   : > { %6968 = vmatmul.mubr.msk.bf16.vlgmr.msra.gmra.mxu0 %vm979_vm1, %v1461_v1 }
 0x47a   : > { %6978 = vmatpush3.bf16.xpose.msra.mxu0 %v1589_v2  ;;  %6979 = vmatprep.mubr.msk.bf16.mxu0 %vm8109_vm0, %v8108_v3 }
 0x47b   : > { %6989 = vmatprep.subr.bf16.mxu0 %v8108_v3 }
 0x481   : > { %6980 = vmatmul.mubr.msk.bf16.vlgmr.msra.gmra.mxu0 %vm979_vm1, %v1582_v5 }
 0x482   : > { %6990 = vmatpush3.bf16.xpose.msra.mxu0 %v1710_v6  ;;  %6991 = vmatprep.mubr.msk.bf16.mxu0 %vm8109_vm0, %v8108_v3 }
 0x483   : > { %7001 = vmatprep.subr.bf16.mxu0 %v8108_v3 }
 0x489   : > { %6992 = vmatmul.mubr.msk.bf16.vlgmr.msra.gmra.mxu0 %vm979_vm1, %v1703_v9 }
 0x48a   : > { %7002 = vmatpush3.bf16.xpose.msra.mxu0 %v1831_v10  ;;  %7003 = vmatprep.mubr.msk.bf16.mxu0 %vm8109_vm0, %v8108_v3 }
 0x48b   : > { %7013 = vmatprep.subr.bf16.mxu0 %v8108_v3 }
 0x491   : > { %7004 = vmatmul.mubr.msk.bf16.vlgmr.msra.gmra.mxu0 %vm979_vm1, %v1824_v11 }
 0x492   : > { %7029 = vmatprep.mubr.msk.bf16.mxu0 %vm8109_vm0, %v8108_v3 }
 0x529   : > { %v1262_v12 = vpop.f32.mrf.mxu0 }
 0x52a   : > { %v8476_v29 = vadd.f32 %v1262_v12, %v8396_v23 }
 0x52b   : > { %v8468_v13 = vpop.f32.mrf.mxu1  ;;  %v6945_v14 = vpop.f32.mrf.mxu0 }
 0x52c   : > { %v1269_v39 = vsel %vm979_vm1, %v8476_v29, -inf }
 0x52d   : > { %v6927_v15 = vpop.f32.mrf.mxu1  ;;  %v1265_v16 = vpop.f32.mrf.mxu0 }
 0x52e   : > { %v1266_v37 = vadd.f32 %v1265_v16, %v8401_v26 }
 0x52f   : > { %v8470_v17 = vpop.f32.mrf.mxu1  ;;  %v6946_v18 = vpop.f32.mrf.mxu0 }
 0x530   : > { %v1272_v45 = vsel %vm979_vm1, %v1266_v37, -inf }
 0x531   : > { %v6928_v19 = vpop.f32.mrf.mxu1  ;;  %v1383_v21 = vpop.f32.mrf.mxu0 }
 0x532   : > { %v8490_v43 = vadd.f32 %v1383_v21, %v8396_v23 }
 0x533   : > { %v1140_v22 = vpop.f32.mrf.mxu1  ;;  %v6957_v24 = vpop.f32.mrf.mxu0 }
 0x534   : > { %v8473_v25 = vadd.f32 %v1140_v22, %v8396_v23  ;;  %v1390_v50 = vsel %vm979_vm1, %v8490_v43, -inf }
 0x535   : > { %v6933_v27 = vpop.f32.mrf.mxu1  ;;  %v1386_v28 = vpop.f32.mrf.mxu0 }
 0x536   : > { %v1147_v30 = vsel %vm979_vm1, %v8473_v25, -inf  ;;  %v1387_v38 = vadd.f32 %v1386_v28, %v8401_v26 }
 0x537   : > { %v6958_v31 = vpop.f32.mrf.mxu0  ;;  %1148 = vmax.xlane.f32.xlu0 %v1147_v30  ;;  %v1143_v32 = vpop.f32.mrf.mxu1 }
 0x538   : > { %v8481_v33 = vadd.f32 %v1143_v32, %v8401_v26  ;;  %v1393_v46 = vsel %vm979_vm1, %v1387_v38, -inf }
 0x539   : > { %v6934_v34 = vpop.f32.mrf.mxu1  ;;  %v1504_v36 = vpop.f32.mrf.mxu0 }
 0x53a   : > { %v1150_v40 = vsel %vm979_vm1, %v8481_v33, -inf  ;;  %v8498_v49 = vadd.f32 %v1504_v36, %v8396_v23 }
 0x53b   : > { %v6969_v41 = vpop.f32.mrf.mxu0  ;;  %1270 = vmax.xlane.f32.xlu0 %v1269_v39  ;;  %1151 = vmax.xlane.f32.xlu1 %v1150_v40 }
 0x53c   : > { %v1511_v56 = vsel %vm979_vm1, %v8498_v49, -inf }
 0x53d   : > { %v1507_v42 = vpop.f32.mrf.mxu0 }
 0x53e   : > { %v8493_v44 = vadd.f32 %v1507_v42, %v8401_v26 }
 0x53f   : > { %v6970_v47 = vpop.f32.mrf.mxu0  ;;  %1273 = vmax.xlane.f32.xlu0 %v1272_v45  ;;  %1394 = vmax.xlane.f32.xlu1 %v1393_v46 }
 0x540   : > { %v1514_v51 = vsel %vm979_vm1, %v8493_v44, -inf }
 0x541   : > { %v1625_v48 = vpop.f32.mrf.mxu0 }
 0x542   : > { %v8505_v54 = vadd.f32 %v1625_v48, %v8396_v23 }
 0x543   : > { %v6981_v52 = vpop.f32.mrf.mxu0  ;;  %1391 = vmax.xlane.f32.xlu0 %v1390_v50  ;;  %1515 = vmax.xlane.f32.xlu1 %v1514_v51 }
 0x544   : > { %v1632_v62 = vsel %vm979_vm1, %v8505_v54, -inf }
 0x545   : > { %v1628_v53 = vpop.f32.mrf.mxu0 }
 0x546   : > { %v8508_v55 = vadd.f32 %v1628_v53, %v8401_v26 }
 0x547   : > { %v6982_v57 = vpop.f32.mrf.mxu0  ;;  %1512 = vmax.xlane.f32.xlu0 %v1511_v56 }
 0x548   : > { %v1635_v58 = vsel %vm979_vm1, %v8508_v55, -inf }
 0x549   : > { %v1746_v59 = vpop.f32.mrf.mxu0  ;;  %1636 = vmax.xlane.f32.xlu1 %v1635_v58 }
 0x54a   : > { %v8515_v60 = vadd.f32 %v1746_v59, %v8396_v23 }
 0x54b   : > { %v6993_v63 = vpop.f32.mrf.mxu0  ;;  %1633 = vmax.xlane.f32.xlu0 %v1632_v62 }
 0x54c   : > { %v1753_v2 = vsel %vm979_vm1, %v8515_v60, -inf }
 0x54d   : > { %v1749_v0 = vpop.f32.mrf.mxu0 }
 0x54e   : > { %v8520_v1 = vadd.f32 %v1749_v0, %v8401_v26 }
 0x54f   : > { %v6994_v4 = vpop.f32.mrf.mxu0  ;;  %1754 = vmax.xlane.f32.xlu0 %v1753_v2 }
 0x550   : > { %v1756_v5 = vsel %vm979_vm1, %v8520_v1, -inf }
 0x551   : > { %v1867_v6 = vpop.f32.mrf.mxu0  ;;  %1757 = vmax.xlane.f32.xlu1 %v1756_v5 }
 0x552   : > { %v8527_v7 = vadd.f32 %v1867_v6, %v8396_v23 }
 0x553   : > { %v7005_v9 = vpop.f32.mrf.mxu0 }
 0x554   : > { %v1874_v10 = vsel %vm979_vm1, %v8527_v7, -inf }
 0x555   : > { %v1870_v11 = vpop.f32.mrf.mxu0  ;;  %1875 = vmax.xlane.f32.xlu0 %v1874_v10 }
 0x556   : > { %v8532_v12 = vadd.f32 %v1870_v11, %v8401_v26 }
 0x557   : > { %v7006_v14 = vpop.f32.mrf.mxu0 }
 0x558   : > { %v1877_v15 = vsel %vm979_vm1, %v8532_v12, -inf }
 0x559   : > { %1878 = vmax.xlane.f32.xlu1 %v1877_v15 }
 0x5c0   : > { %v1149_v16 = vpop.xlane.xlu0 %1148 }
 0x5c1   : > { %v1153_v41 = vsub.f32 %v8473_v25, %v1149_v16 }
 0x5c4   : > { %v1271_v18 = vpop.xlane.xlu0 %1270  ;;  %v1152_v19 = vpop.xlane.xlu1 %1151 }
 0x5c5   : > { %v1275_v21 = vsub.f32 %v8476_v29, %v1271_v18  ;;  %v1154_v25 = vsub.f32 %v8481_v33, %v1152_v19 }
 0x5c7   : > { %v1277_v22 = vmul.f32 1.442695, %v1275_v21  ;;  %v1157_v56 = vmul.f32 1.442695, %v1154_v25 }
 0x5c8   : > { %v1274_v24 = vpop.xlane.xlu0 %1273  ;;  %v1395_v27 = vpop.xlane.xlu1 %1394 }
 0x5c9   : > { %7735 = vpow2.f32 %v1277_v22  ;;  %v1276_v28 = vsub.f32 %v1266_v37, %v1274_v24  ;;  %v1397_v30 = vsub.f32 %v1387_v38, %v1395_v27  ;;  %v1155_v37 = vmul.f32 1.442695, %v1153_v41 }
 0x5cb   : > { %v1279_v31 = vmul.f32 1.442695, %v1276_v28  ;;  %v1400_v32 = vmul.f32 1.442695, %v1397_v30 }
 0x5cc   : > { %v1392_v34 = vpop.xlane.xlu0 %1391  ;;  %v1516_v36 = vpop.xlane.xlu1 %1515 }
 0x5cd   : > { %7737 = vpow2.f32 %v1279_v31  ;;  %v1396_v39 = vsub.f32 %v8490_v43, %v1392_v34  ;;  %v1518_v40 = vsub.f32 %v8493_v44, %v1516_v36 }
 0x5ce   : > { %7739 = vpow2.f32 %v1400_v32 }
 0x5cf   : > { %v1398_v42 = vmul.f32 1.442695, %v1396_v39  ;;  %v1521_v29 = vmul.f32 1.442695, %v1518_v40 }
 0x5d0   : > { %v1513_v45 = vpop.xlane.xlu0 %1512 }
 0x5d1   : > { %7741 = vpow2.f32 %v1398_v42  ;;  %v1517_v46 = vsub.f32 %v8498_v49, %v1513_v45 }
 0x5d2   : > { %v1637_v38 = vpop.xlane.xlu1 %1636  ;;  %7743 = vpow2.f32 %v1521_v29 }
 0x5d3   : > { %v1519_v47 = vmul.f32 1.442695, %v1517_v46  ;;  %v1639_v48 = vsub.f32 %v8508_v55, %v1637_v38 }
 0x5d4   : > { %v1634_v50 = vpop.xlane.xlu0 %1633 }
 0x5d5   : > { %7745 = vpow2.f32 %v1519_v47  ;;  %v1638_v43 = vsub.f32 %v8505_v54, %v1634_v50  ;;  %v1642_v51 = vmul.f32 1.442695, %v1639_v48 }
 0x5d6   : > { %v8543_v44 = vpop.eup %7735  ;;  %7747 = vpow2.f32 %v1155_v37 }
 0x5d7   : > { %v1640_v52 = vmul.f32 1.442695, %v1638_v43  ;;  %v1281_v49 = vsel %vm979_vm1, %v8543_v44, 0.0 }
 0x5d8   : > { %1282 = vadd.xlane.f32.xlu0 %v1281_v49  ;;  %v1755_v15 = vpop.xlane.xlu0 %1754 }
 0x5d9   : > { %7749 = vpow2.f32 %v1640_v52  ;;  %v1759_v16 = vsub.f32 %v8515_v60, %v1755_v15 }
 0x5da   : > { %v8548_v53 = vpop.eup %7737  ;;  %7751 = vpow2.f32 %v1642_v51  ;;  %v1758_v19 = vpop.xlane.xlu1 %1757 }
 0x5db   : > { %v1284_v55 = vsel %vm979_vm1, %v8548_v53, 0.0  ;;  %v8552_v54 = vpop.eup %7739  ;;  %7753 = vpow2.f32 %v1157_v56  ;;  %v1761_v18 = vmul.f32 1.442695, %v1759_v16  ;;  %v1760_v21 = vsub.f32 %v8520_v1, %v1758_v19 }
 0x5dc   : > { %1285 = vadd.xlane.f32.xlu1 %v1284_v55  ;;  %v1405_v58 = vsel %vm979_vm1, %v8552_v54, 0.0 }
 0x5dd   : > { %7755 = vpow2.f32 %v1761_v18  ;;  %v1763_v24 = vmul.f32 1.442695, %v1760_v21 }
 0x5de   : > { %v8554_v57 = vpop.eup %7741  ;;  %v1876_v22 = vpop.xlane.xlu0 %1875 }
 0x5df   : > { %v1402_v33 = vsel %vm979_vm1, %v8554_v57, 0.0  ;;  %v8560_v59 = vpop.eup %7743  ;;  %v1880_v27 = vsub.f32 %v8527_v7, %v1876_v22  ;;  %7757 = vpow2.f32 %v1763_v24 }
 0x5e0   : > { %1403 = vadd.xlane.f32.xlu0 %v1402_v33  ;;  %1406 = vadd.xlane.f32.xlu1 %v1405_v58  ;;  %v1526_v2 = vsel %vm979_vm1, %v8560_v59, 0.0 }
 0x5e1   : > { %v1882_v30 = vmul.f32 1.442695, %v1880_v27 }
 0x5e2   : > { %v8562_v62 = vpop.eup %7745  ;;  %v1879_v28 = vpop.xlane.xlu1 %1878 }
 0x5e3   : > { %v8564_v63 = vpop.eup %7747  ;;  %v1523_v0 = vsel %vm979_vm1, %v8562_v62, 0.0  ;;  %v1881_v31 = vsub.f32 %v8532_v12, %v1879_v28  ;;  %7759 = vpow2.f32 %v1882_v30 }
 0x5e4   : > { %1524 = vadd.xlane.f32.xlu0 %v1523_v0  ;;  %1527 = vadd.xlane.f32.xlu1 %v1526_v2  ;;  %v1159_v5 = vsel %vm979_vm1, %v8564_v63, 0.0 }
 0x5e5   : > { %v1884_v32 = vmul.f32 1.442695, %v1881_v31 }
 0x5e6   : > { %v8570_v4 = vpop.eup %7749 }
 0x5e7   : > { %v1644_v6 = vsel %vm979_vm1, %v8570_v4, 0.0  ;;  %v8576_v9 = vpop.eup %7751  ;;  %7761 = vpow2.f32 %v1884_v32 }
 0x5e8   : > { %1160 = vadd.xlane.f32.xlu0 %v1159_v5  ;;  %1645 = vadd.xlane.f32.xlu1 %v1644_v6  ;;  %v1647_v10 = vsel %vm979_vm1, %v8576_v9, 0.0  ;;  %v7754_v11 = vpop.eup %7753 }
 0x5e9   : > { %v1162_v14 = vsel %vm979_vm1, %v7754_v11, 0.0 }
 0x5ea   : > { %v8589_v34 = vpop.eup %7755 }
 0x5eb   : > { %v1765_v60 = vsel %vm979_vm1, %v8589_v34, 0.0 }
 0x5ec   : > { %1648 = vadd.xlane.f32.xlu1 %v1647_v10  ;;  %v8593_v36 = vpop.eup %7757 }
 0x5ed   : > { %v1768_v1 = vsel %vm979_vm1, %v8593_v36, 0.0 }
 0x5f0   : > { %1163 = vadd.xlane.f32.xlu1 %v1162_v14  ;;  %v8597_v7 = vpop.eup %7759 }
 0x5f1   : > { %v1886_v12 = vsel %vm979_vm1, %v8597_v7, 0.0 }
 0x5f4   : > { %v8601_v39 = vpop.eup %7761 }
 0x5f5   : > { %v1889_v40 = vsel %vm979_vm1, %v8601_v39, 0.0 }
 0x5fe   : > { %1171 = vrot.lane.b32.xlu0 %v8382_v20, %s8111_s27 }
 0x601   : > { %1292 = vrot.lane.b32.xlu1 %v8382_v20, %s8112_s0 }
 0x61d   : > { %1766 = vadd.xlane.f32.xlu0 %v1765_v60 }
 0x625   : > { %1769 = vadd.xlane.f32.xlu1 %v1768_v1 }
 0x629   : > { %1887 = vadd.xlane.f32.xlu1 %v1886_v12 }
 0x62d   : > { %1890 = vadd.xlane.f32.xlu1 %v1889_v40 }
 0x633   : > { %1413 = vrot.lane.b32.xlu0 %v8382_v20, %s8113_s29 }
 0x637   : > { %1655 = vrot.lane.b32.xlu0 %v8382_v20, %s8115_s22 }
 0x63b   : > { %1776 = vrot.lane.b32.xlu0 %v8382_v20, %s8116_s26 }
 0x63e   : > { %1534 = vrot.lane.b32.xlu1 %v8382_v20, %s8114_s1 }
 0x63f   : > { %1897 = vrot.lane.b32.xlu0 %v8382_v20, %s8117_s23 }
 0x661   : > { %v1283_v41 = vpop.xlane.xlu0 %1282 }
 0x665   : > { %v1286_v42 = vpop.xlane.xlu1 %1285 }
 0x669   : > { %v1404_v29 = vpop.xlane.xlu0 %1403  ;;  %v1407_v45 = vpop.xlane.xlu1 %1406 }
 0x66d   : > { %v1525_v46 = vpop.xlane.xlu0 %1524  ;;  %v1528_v37 = vpop.xlane.xlu1 %1527 }
 0x671   : > { %v1161_v38 = vpop.xlane.xlu0 %1160  ;;  %v1646_v47 = vpop.xlane.xlu1 %1645 }
 0x672   : > { %7763 = vrcp.f32 %v1161_v38 }
 0x675   : > { %v1172_v48 = vpop.permute.xlu0 %1171  ;;  %v1649_v50 = vpop.xlane.xlu1 %1648 }
 0x676   : > { %6936 = vmatpush3.bf16.msra.mxu1 %v1172_v48 }
 0x677   : > { %6947 = vmatprep.subr.bf16.mxu1 %v8108_v3 }
 0x679   : > { %v1164_v43 = vpop.xlane.xlu1 %1163 }
 0x67a   : > { %7765 = vrcp.f32 %v1164_v43 }
 0x67b   : > { %7767 = vrcp.f32 %v1286_v42 }
 0x67c   : > { %7769 = vrcp.f32 %v1283_v41 }
 0x67d   : > { %v1293_v55 = vpop.permute.xlu1 %1292  ;;  %7771 = vrcp.f32 %v1404_v29 }
 0x67e   : > { %7773 = vrcp.f32 %v1407_v45 }
 0x67f   : > { %v7764_v25 = vpop.eup %7763  ;;  %7775 = vrcp.f32 %v1525_v46 }
 0x680   : > { %v1167_v51 = vmul.f32 %v7764_v25, %v8564_v63  ;;  %7777 = vrcp.f32 %v1528_v37 }
 0x681   : > { %7779 = vrcp.f32 %v1649_v50 }
 0x682   : > { %7781 = vrcp.f32 %v1646_v47 }
 0x687   : > { %v7766_v20 = vpop.eup %7765 }
 0x688   : > { %v1168_v52 = vmul.f32 %v7766_v20, %v7754_v11  ;;  %v7768_v56 = vpop.eup %7767 }
 0x689   : > { %v7770_v33 = vpop.eup %7769  ;;  %v1290_v58 = vmul.f32 %v7768_v56, %v8548_v53  ;;  %v7516_v56 = vld [vmem:[#allocation6 + $0x30] sm:$0xff]  }
 0x68a   : > { %v1169_v49 = vpack.c.bf16 %v1168_v52, %v1167_v51  ;;  %v1289_v0 = vmul.f32 %v7770_v33, %v8543_v44  ;;  %v7772_v63 = vpop.eup %7771 }
 0x68b   : > { %v7774_v5 = vpop.eup %7773  ;;  %v1410_v10 = vmul.f32 %v7772_v63, %v8554_v57 }
 0x68c   : > { %6938 = vmatmul.mubr.msk.bf16.vlgmr.msra.gmra.mxu1 %vm979_vm1, %v1169_v49  ;;  %v1291_v2 = vpack.c.bf16 %v1290_v58, %v1289_v0  ;;  %v1411_v53 = vmul.f32 %v7774_v5, %v8552_v54  ;;  %v7776_v16 = vpop.eup %7775  ;;  %v7518_v0 = vld [vmem:[#allocation6 + $0x20] sm:$0xff]   ;;  %v7519_v5 = vld [vmem:[#allocation6 + $0x18] sm:$0xff]  }
 0x68d   : > { %6948 = vmatpush3.bf16.msra.mxu1 %v1293_v55  ;;  %6949 = vmatprep.mubr.msk.bf16.mxu1 %vm8109_vm0, %v8108_v3  ;;  %v7778_v18 = vpop.eup %7777  ;;  %v1531_v54 = vmul.f32 %v7776_v16, %v8562_v62  ;;  %v7517_v55 = vld [vmem:[#allocation6 + $0x28] sm:$0xff]  }
 0x68e   : > { %6959 = vmatprep.subr.bf16.mxu1 %v8108_v3  ;;  %v1412_v44 = vpack.c.bf16 %v1411_v53, %v1410_v10  ;;  %v1532_v57 = vmul.f32 %v7778_v18, %v8560_v59  ;;  %v7780_v24 = vpop.eup %7779 }
 0x68f   : > { %v7782_v28 = vpop.eup %7781  ;;  %v1653_v59 = vmul.f32 %v7780_v24, %v8576_v9 }
 0x690   : > { %v1533_v22 = vpack.c.bf16 %v1532_v57, %v1531_v54  ;;  %v1652_v62 = vmul.f32 %v7782_v28, %v8570_v4  ;;  %v7522_v54 = vld [vmem:[#allocation6] sm:$0xff]  }
 0x692   : > { %v1654_v30 = vpack.c.bf16 %v1653_v59, %v1652_v62 }
 0x694   : > { %6950 = vmatmul.mubr.msk.bf16.vlgmr.msra.gmra.mxu1 %vm979_vm1, %v1291_v2 }
 0x695   : > { %6961 = vmatprep.mubr.msk.bf16.mxu1 %vm8109_vm0, %v8108_v3 }
 0x6a6   : > { %v1767_v6 = vpop.xlane.xlu0 %1766 }
 0x6aa   : > { %v1414_v11 = vpop.permute.xlu0 %1413 }
 0x6ab   : > { %6960 = vmatpush3.bf16.msra.mxu1 %v1414_v11  ;;  %v7520_v11 = vld [vmem:[#allocation6 + $0x10] sm:$0xff]  }
 0x6ac   : > { %6971 = vmatprep.subr.bf16.mxu1 %v8108_v3 }
 0x6ae   : > { %6962 = vmatmul.mubr.msk.bf16.vlgmr.msra.gmra.mxu1 %vm979_vm1, %v1412_v44  ;;  %v1770_v14 = vpop.xlane.xlu1 %1769  ;;  %v1656_v27 = vpop.permute.xlu0 %1655 }
 0x6af   : > { %6973 = vmatprep.mubr.msk.bf16.mxu1 %vm8109_vm0, %v8108_v3  ;;  %7783 = vrcp.f32 %v1770_v14 }
 0x6b0   : > { %7785 = vrcp.f32 %v1767_v6 }
 0x6b2   : > { %v1888_v15 = vpop.xlane.xlu1 %1887  ;;  %v1777_v32 = vpop.permute.xlu0 %1776 }
 0x6b6   : > { %v1891_v19 = vpop.xlane.xlu1 %1890  ;;  %v1898_v41 = vpop.permute.xlu0 %1897 }
 0x6b7   : > { %7787 = vrcp.f32 %v1891_v19 }
 0x6b8   : > { %7789 = vrcp.f32 %v1888_v15  ;;  %v7521_v15 = vld [vmem:[#allocation6 + $0x8] sm:$0xff]  }
 0x6ba   : > { %v1535_v21 = vpop.permute.xlu1 %1534 }
 0x6bb   : > { %6972 = vmatpush3.bf16.msra.mxu1 %v1535_v21 }
 0x6bc   : > { %6983 = vmatprep.subr.bf16.mxu1 %v8108_v3  ;;  %v7784_v31 = vpop.eup %7783 }
 0x6bd   : > { %v7786_v60 = vpop.eup %7785  ;;  %v1774_v1 = vmul.f32 %v7784_v31, %v8593_v36 }
 0x6be   : > { %6974 = vmatmul.mubr.msk.bf16.vlgmr.msra.gmra.mxu1 %vm979_vm1, %v1533_v22  ;;  %v1773_v12 = vmul.f32 %v7786_v60, %v8589_v34 }
 0x6bf   : > { %6984 = vmatpush3.bf16.msra.mxu1 %v1656_v27  ;;  %6985 = vmatprep.mubr.msk.bf16.mxu1 %vm8109_vm0, %v8108_v3 }
 0x6c0   : > { %6995 = vmatprep.subr.bf16.mxu1 %v8108_v3  ;;  %v1775_v9 = vpack.c.bf16 %v1774_v1, %v1773_v12 }
 0x6c4   : > { %v7788_v40 = vpop.eup %7787 }
 0x6c5   : > { %v7790_v4 = vpop.eup %7789  ;;  %v1895_v42 = vmul.f32 %v7788_v40, %v8601_v39 }
 0x6c6   : > { %6986 = vmatmul.mubr.msk.bf16.vlgmr.msra.gmra.mxu1 %vm979_vm1, %v1654_v30  ;;  %v1894_v29 = vmul.f32 %v7790_v4, %v8597_v7  ;;  %v7515_v7 = vld [vmem:[#allocation6 + $0x38] sm:$0xff]  }
 0x6c7   : > { %6996 = vmatpush3.bf16.msra.mxu1 %v1777_v32  ;;  %6997 = vmatprep.mubr.msk.bf16.mxu1 %vm8109_vm0, %v8108_v3 }
 0x6c8   : > { %7007 = vmatprep.subr.bf16.mxu1 %v8108_v3  ;;  %v1896_v45 = vpack.c.bf16 %v1895_v42, %v1894_v29  ;;  %7014 = vmatpush3.bf16.msra.mxu0 %v7515_v7 }
 0x6c9   : > { %7015 = vmatprep.subr.bf16.mxu0 %v8108_v3 }
 0x6cc   : > { %7016 = vmatpush3.bf16.msra.mxu0 %v7516_v56 }
 0x6cd   : > { %7017 = vmatprep.subr.bf16.mxu0 %v8108_v3 }
 0x6ce   : > { %6998 = vmatmul.mubr.msk.bf16.vlgmr.msra.gmra.mxu1 %vm979_vm1, %v1775_v9 }
 0x6cf   : > { %7008 = vmatpush3.bf16.msra.mxu1 %v1898_v41  ;;  %7009 = vmatprep.mubr.msk.bf16.mxu1 %vm8109_vm0, %v8108_v3 }
 0x6d0   : > { %7018 = vmatpush3.bf16.msra.mxu0 %v7517_v55 }
 0x6d1   : > { %7019 = vmatprep.subr.bf16.mxu0 %v8108_v3 }
 0x6d4   : > { %7020 = vmatpush3.bf16.msra.mxu0 %v7518_v0 }
 0x6d5   : > { %7021 = vmatprep.subr.bf16.mxu0 %v8108_v3 }
 0x6d6   : > { %7010 = vmatmul.mubr.msk.bf16.vlgmr.msra.gmra.mxu1 %vm979_vm1, %v1896_v45 }
 0x6d7   : > { %2312 = vmatprep.mubr.bf16.mxu1 %v8110_v35 }
 0x6d8   : > { %7022 = vmatpush3.bf16.msra.mxu0 %v7519_v5 }
 0x6d9   : > { %7023 = vmatprep.subr.bf16.mxu0 %v8108_v3 }
 0x6dc   : > { %7024 = vmatpush3.bf16.msra.mxu0 %v7520_v11 }
 0x6dd   : > { %7025 = vmatprep.subr.bf16.mxu0 %v8108_v3 }
 0x6e0   : > { %7026 = vmatpush3.bf16.msra.mxu0 %v7521_v15  ;;  %v7944_v15 = vld [vmem:[%s8320_s30 + $0x8] sm:$0xff] }
 0x6e1   : > { %7027 = vmatprep.subr.bf16.mxu0 %v8108_v3 }
 0x6e4   : > { %7028 = vmatpush3.bf16.msra.mxu0 %v7522_v54 }
 0x74c   : > { %v1211_v34 = vpop.f32.mrf.mxu1 }
 0x74e   : > { %v6939_v36 = vpop.f32.mrf.mxu1 }
 0x750   : > { %v1214_v46 = vpop.f32.mrf.mxu1 }
 0x751   : > { %v7378_v37 = vpack.i.bf16 %v1214_v46, %v1211_v34 }
 0x752   : > { %v6940_v38 = vpop.f32.mrf.mxu1 }
 0x753   : > { %7379 = vrot.lane.b32.xlu1 %v7378_v37, %s8117_s23 }
 0x754   : > { %v1332_v47 = vpop.f32.mrf.mxu1 }
 0x756   : > { %v6951_v48 = vpop.f32.mrf.mxu1 }
 0x758   : > { %v1335_v50 = vpop.f32.mrf.mxu1 }
 0x759   : > { %v7383_v43 = vpack.i.bf16 %v1335_v50, %v1332_v47 }
 0x75a   : > { %v6952_v25 = vpop.f32.mrf.mxu1 }
 0x75b   : > { %7384 = vrot.lane.b32.xlu0 %v7383_v43, %s8116_s26 }
 0x76e   : > { %v1453_v39 = vpop.f32.mrf.mxu1 }
 0x770   : > { %v6963_v20 = vpop.f32.mrf.mxu1 }
 0x772   : > { %v1456_v51 = vpop.f32.mrf.mxu1 }
 0x773   : > { %v7388_v52 = vpack.i.bf16 %v1456_v51, %v1453_v39 }
 0x774   : > { %v6964_v49 = vpop.f32.mrf.mxu1 }
 0x775   : > { %7389 = vrot.lane.b32.xlu1 %v7388_v52, %s8115_s22 }
 0x77e   : > { %v1574_v33 = vpop.f32.mrf.mxu1 }
 0x780   : > { %v6975_v58 = vpop.f32.mrf.mxu1 }
 0x782   : > { %v1577_v2 = vpop.f32.mrf.mxu1 }
 0x783   : > { %v7393_v63 = vpack.i.bf16 %v1577_v2, %v1574_v33  ;;  %v6438_v2 = vld [vmem:[%s9477_s10] ss:$0 sm:$0xff] }
 0x784   : > { %v6976_v6 = vpop.f32.mrf.mxu1 }
 0x785   : > { %7394 = vrot.lane.b32.xlu0 %v7393_v63, %s8114_s1 }
 0x786   : > { %v1695_v10 = vpop.f32.mrf.mxu1 }
 0x788   : > { %v6987_v53 = vpop.f32.mrf.mxu1 }
 0x78a   : > { %v1698_v44 = vpop.f32.mrf.mxu1 }
 0x78b   : > { %v7398_v14 = vpack.i.bf16 %v1698_v44, %v1695_v10  ;;  %v7943_v10 = vld [vmem:[%s8320_s30] sm:$0xff] }
 0x78c   : > { %v6988_v16 = vpop.f32.mrf.mxu1 }
 0x78d   : > { %7399 = vrot.lane.b32.xlu1 %v7398_v14, %s8113_s29 }
 0x78e   : > { %v1816_v18 = vpop.f32.mrf.mxu1 }
 0x790   : > { %v6999_v19 = vpop.f32.mrf.mxu1 }
 0x791   : > { %v7525_v19 = vld [vmem:[#allocation7 + $0x74] ss:$8 sps:$4 sm:$0xff]  }
 0x792   : > { %v1819_v57 = vpop.f32.mrf.mxu1  ;;  %2280 = vmatprep.subr.bf16.mxu1 %v7525_v19  ;;  %v2188_v19 = vld [vmem:[%s9480_s13] sm:$0x3] }
 0x793   : > { %v7403_v21 = vpack.i.bf16 %v1819_v57, %v1816_v18  ;;  %v7523_v18 = vld [vmem:[#allocation7 + $0x70] ss:$8 sps:$4 sm:$0xff]  }
 0x794   : > { %v7000_v22 = vpop.f32.mrf.mxu1  ;;  %2281 = vmatpush1.bf16.msra.mxu1 %v7523_v18  ;;  %v7562_v18 = vld [vmem:[#allocation9] sm:$0xff]  }
 0x795   : > { %7404 = vrot.lane.b32.xlu0 %v7403_v21, %s8112_s0 }
 0x796   : > { %v1937_v24 = vpop.f32.mrf.mxu1 }
 0x798   : > { %v7011_v27 = vpop.f32.mrf.mxu1 }
 0x79a   : > { %v1940_v28 = vpop.f32.mrf.mxu1 }
 0x79b   : > { %v7408_v59 = vpack.i.bf16 %v1940_v28, %v1937_v24 }
 0x79c   : > { %v7012_v62 = vpop.f32.mrf.mxu1 }
 0x79d   : > { %7409 = vrot.lane.b32.xlu1 %v7408_v59, %s8111_s27  ;;  %v7528_v62 = vld [vmem:[#allocation7 + $0x64] ss:$8 sps:$4 sm:$0xff]  }
 0x79e   : > { %2282 = vmatprep.subr.bf16.mxu1 %v7528_v62 }
 0x7c5   : > { %v7380_v30 = vpop.permute.xlu1 %7379 }
 0x7c6   : > { %v7382_v1 = vunpack.i.h.bf16 %v7380_v30  ;;  %v7381_v12 = vunpack.i.l.bf16 %v7380_v30  ;;  %v7526_v30 = vld [vmem:[#allocation7 + $0x60] ss:$8 sps:$4 sm:$0xff]  }
 0x7c7   : > { %2283 = vmatpush1.bf16.msra.mxu1 %v7526_v30 }
 0x7c8   : > { %v2001_v36 = vsel %vm979_vm1, %v8470_v17, %v7382_v1  ;;  %v2000_v46 = vsel %vm979_vm1, %v8468_v13, %v7381_v12  ;;  %v7534_v1 = vld [vmem:[#allocation7 + $0x44] ss:$8 sps:$4 sm:$0xff]   ;;  %v7537_v12 = vld [vmem:[#allocation7 + $0x34] ss:$8 sps:$4 sm:$0xff]  }
 0x7cd   : > { %v7385_v31 = vpop.permute.xlu0 %7384 }
 0x7ce   : > { %v7387_v9 = vunpack.i.h.bf16 %v7385_v31  ;;  %v7386_v40 = vunpack.i.l.bf16 %v7385_v31  ;;  %v7531_v31 = vld [vmem:[#allocation7 + $0x54] ss:$8 sps:$4 sm:$0xff]  }
 0x7cf   : > { %2284 = vmatprep.subr.bf16.mxu1 %v7531_v31 }
 0x7d0   : > { %v2004_v47 = vsel %vm2002_vm2, %v2001_v36, %v7387_v9  ;;  %v2003_v48 = vsel %vm2002_vm2, %v2000_v46, %v7386_v40  ;;  %v7535_v9 = vld [vmem:[#allocation7 + $0x30] ss:$8 sps:$4 sm:$0xff]   ;;  %v7540_v40 = vld [vmem:[#allocation7 + $0x24] ss:$8 sps:$4 sm:$0xff]  }
 0x7d1   : > { %v7548_v36 = vld [vmem:[#allocation9 + $0x38] sm:$0xff]   ;;  %v7549_v46 = vld [vmem:[#allocation9 + $0x70] sm:$0xff]  }
 0x7e7   : > { %v7390_v32 = vpop.permute.xlu1 %7389 }
 0x7e8   : > { %v7392_v4 = vunpack.i.h.bf16 %v7390_v32  ;;  %v7391_v42 = vunpack.i.l.bf16 %v7390_v32  ;;  %v7529_v32 = vld [vmem:[#allocation7 + $0x50] ss:$8 sps:$4 sm:$0xff]  }
 0x7e9   : > { %2285 = vmatpush1.bf16.msra.mxu1 %v7529_v32 }
 0x7ea   : > { %v2007_v25 = vsel %vm2005_vm3, %v2004_v47, %v7392_v4  ;;  %v2006_v7 = vsel %vm2005_vm3, %v2003_v48, %v7391_v42  ;;  %2286 = vmatprep.subr.bf16.mxu1 %v7534_v1  ;;  %v7543_v4 = vld [vmem:[#allocation7 + $0x14] ss:$8 sps:$4 sm:$0xff]   ;;  %v7541_v42 = vld [vmem:[#allocation7 + $0x10] ss:$8 sps:$4 sm:$0xff]   ;;  %v7552_v47 = vld [vmem:[#allocation9 + $0x28] sm:$0xff]  }
 0x7eb   : > { %v7553_v48 = vld [vmem:[#allocation9 + $0x60] sm:$0xff]  }
 0x7f7   : > { %v7395_v60 = vpop.permute.xlu0 %7394 }
 0x7f8   : > { %v7397_v45 = vunpack.i.h.bf16 %v7395_v60  ;;  %v7396_v34 = vunpack.i.l.bf16 %v7395_v60  ;;  %v7532_v60 = vld [vmem:[#allocation7 + $0x40] ss:$8 sps:$4 sm:$0xff]  }
 0x7f9   : > { %2287 = vmatpush1.bf16.msra.mxu1 %v7532_v60 }
 0x7fa   : > { %v2010_v39 = vsel %vm2008_vm4, %v2007_v25, %v7397_v45  ;;  %v2009_v17 = vsel %vm2008_vm4, %v2006_v7, %v7396_v34  ;;  %2288 = vmatprep.subr.bf16.mxu1 %v7537_v12  ;;  %v7544_v45 = vld [vmem:[#allocation7] ss:$8 sps:$4 sm:$0xff]   ;;  %v7547_v34 = vld [vmem:[#allocation9 + $0x78] sm:$0xff]  }
 0x7fb   : > { %6731 = vmatprep.subr.bf16.mxu0 %v7547_v34 }
 0x7fd   : > { %2289 = vmatpush1.bf16.msra.mxu1 %v7535_v9 }
 0x7fe   : > { %2290 = vmatprep.subr.bf16.mxu1 %v7540_v40 }
 0x7ff   : > { %v7400_v41 = vpop.permute.xlu1 %7399 }
 0x800   : > { %v7402_v37 = vunpack.i.h.bf16 %v7400_v41  ;;  %v7401_v38 = vunpack.i.l.bf16 %v7400_v41  ;;  %v7538_v41 = vld [vmem:[#allocation7 + $0x20] ss:$8 sps:$4 sm:$0xff]  }
 0x801   : > { %2291 = vmatpush1.bf16.msra.mxu1 %v7538_v41 }
 0x802   : > { %v2013_v20 = vsel %vm2011_vm5, %v2010_v39, %v7402_v37  ;;  %v2012_v51 = vsel %vm2011_vm5, %v2009_v17, %v7401_v38  ;;  %2292 = vmatprep.subr.bf16.mxu1 %v7543_v4  ;;  %v7550_v37 = vld [vmem:[#allocation9 + $0x30] sm:$0xff]   ;;  %v7551_v38 = vld [vmem:[#allocation9 + $0x68] sm:$0xff]  }
 0x805   : > { %2293 = vmatpush1.bf16.msra.mxu1 %v7541_v42 }
 0x807   : > { %v7405_v29 = vpop.permute.xlu0 %7404 }
 0x808   : > { %v7407_v50 = vunpack.i.h.bf16 %v7405_v29  ;;  %v7406_v43 = vunpack.i.l.bf16 %v7405_v29  ;;  %v7546_v29 = vld [vmem:[#allocation7 + $0x4] ss:$8 sps:$4 sm:$0xff]  }
 0x809   : > { %2294 = vmatprep.subr.bf16.mxu1 %v7546_v29 }
 0x80a   : > { %v2016_v56 = vsel %vm2014_vm6, %v2013_v20, %v7407_v50  ;;  %v2015_v55 = vsel %vm2014_vm6, %v2012_v51, %v7406_v43  ;;  %2295 = vmatpush1.bf16.msra.mxu1 %v7544_v45  ;;  %v7554_v50 = vld [vmem:[#allocation9 + $0x20] sm:$0xff]   ;;  %v7555_v43 = vld [vmem:[#allocation9 + $0x58] sm:$0xff]  }
 0x80b   : > { %v6465_v45 = vld [vmem:[%s9482_s15] ss:$0 sm:$0xff] }
 0x80f   : > { %v7410_v13 = vpop.permute.xlu1 %7409 }
 0x810   : > { %v7412_v52 = vunpack.i.h.bf16 %v7410_v13  ;;  %v7411_v49 = vunpack.i.l.bf16 %v7410_v13 }
 0x812   : > { %v2019_v33 = vsel %vm2017_vm7, %v2016_v56, %v7412_v52  ;;  %v2018_v58 = vsel %vm2017_vm7, %v2015_v55, %v7411_v49  ;;  %v6447_v49 = vld [vmem:[%s9478_s11] ss:$0 sm:$0xff] }
 0x813   : > { %v2020_v0 = vpack.c.bf16 %v2019_v33, %v2018_v58  ;;  %v6448_v58 = vld [vmem:[%s9478_s11 + $0x1] ss:$0 sm:$0xff] }
 0x815   : > { %7030 = vmatmul.mubr.bf16.vlgmr.msra.gmra.mxu0 %v2020_v0 }
 0x816   : > { %6732 = vmatpush3.bf16.msra.mxu0 %v7548_v36 }
 0x817   : > { %6733 = vmatprep.subr.bf16.mxu0 %v7549_v46 }
 0x81a   : > { %6734 = vmatpush3.bf16.msra.mxu0 %v7550_v37 }
 0x81b   : > { %6735 = vmatprep.subr.bf16.mxu0 %v7551_v38 }
 0x81e   : > { %6736 = vmatpush3.bf16.msra.mxu0 %v7552_v47 }
 0x81f   : > { %6737 = vmatprep.subr.bf16.mxu0 %v7553_v48 }
 0x822   : > { %6738 = vmatpush3.bf16.msra.mxu0 %v7554_v50 }
 0x823   : > { %6739 = vmatprep.subr.bf16.mxu0 %v7555_v43 }
 0x8d5   : > { %v2126_v63 = vpop.f32.mrf.mxu0 }
 0x8d6   : > { %v2127_v5 = vadd.f32 %v6438_v2, %v2126_v63 }
 0x8d7   : > { %v7031_v6 = vpop.f32.mrf.mxu0 }
 0x8d8   : > { %v8688_v53 = vadd.f32 %v7943_v10, %v2127_v5  ;;  %v7556_v6 = vld [vmem:[#allocation9 + $0x18] sm:$0xff]   ;;  %v7557_v10 = vld [vmem:[#allocation9 + $0x50] sm:$0xff]  }
 0x8d9   : > { %v2129_v11 = vpop.f32.mrf.mxu0  ;;  %6740 = vmatpush3.bf16.msra.mxu0 %v7556_v6  ;;  %v7576_v6 = vld [vmem:[#allocation2 + $0xc0] ss:$8 sps:$4 sm:$0xff]  }
 0x8da   : > { %v2130_v44 = vadd.f32 %v6438_v2, %v2129_v11  ;;  %2137 = vadd.xlane.f32.xlu0 %v8688_v53  ;;  %v7558_v11 = vld [vmem:[#allocation9 + $0x10] sm:$0xff]   ;;  %6741 = vmatprep.subr.bf16.mxu0 %v7557_v10 }
 0x8db   : > { %v7032_v14 = vpop.f32.mrf.mxu0  ;;  %v7582_v10 = vld [vmem:[#allocation2 + $0xb4] ss:$8 sps:$4 sm:$0xff]  }
 0x8dc   : > { %v8692_v16 = vadd.f32 %v7944_v15, %v2130_v44  ;;  %v7559_v44 = vld [vmem:[#allocation9 + $0x48] sm:$0xff]   ;;  %v7561_v15 = vld [vmem:[#allocation9 + $0x40] sm:$0xff]  }
 0x8dd   : > { %6742 = vmatpush3.bf16.msra.mxu0 %v7558_v11  ;;  %v7560_v14 = vld [vmem:[#allocation9 + $0x8] sm:$0xff]   ;;  %v7579_v11 = vld [vmem:[#allocation4 + $0x58] sm:$0xff]  }
 0x8de   : > { %2139 = vadd.xlane.f32.xlu1 %v8692_v16  ;;  %6743 = vmatprep.subr.bf16.mxu0 %v7559_v44  ;;  %v7580_v44 = vld [vmem:[#allocation2 + $0xb0] ss:$8 sps:$4 sm:$0xff]  }
 0x8e1   : > { %6744 = vmatpush3.bf16.msra.mxu0 %v7560_v14  ;;  %v7586_v14 = vld [vmem:[#allocation2 + $0xa4] ss:$8 sps:$4 sm:$0xff]  }
 0x8e2   : > { %6745 = vmatprep.subr.bf16.mxu0 %v7561_v15  ;;  %v7583_v15 = vld [vmem:[#allocation4 + $0x50] sm:$0xff]  }
 0x8e5   : > { %6746 = vmatpush3.bf16.msra.mxu0 %v7562_v18  ;;  %v7584_v18 = vld [vmem:[#allocation2 + $0xa0] ss:$8 sps:$4 sm:$0xff]  }
 0x8e6   : > { %7033 = vmatprep.subr.bf16.mxu0 %v8108_v3 }
 0x963   : > { %v2138_v54 = vpop.xlane.xlu0 %2137 }
 0x964   : > { %v2141_v57 = vmul.f32 0.0078125, %v2138_v54  ;;  %v2197_v54 = vrot.slane %v2188_v19, %v8365_v61 }
 0x966   : > { %v8696_v21 = vsub.f32 %v8688_v53, %v2141_v57  ;;  %v2193_v57 = vrot.slane %v2188_v19, %v8371_v8  ;;  %v7590_v19 = vld [vmem:[#allocation2 + $0x94] ss:$8 sps:$4 sm:$0xff]  }
 0x967   : > { %v2140_v22 = vpop.xlane.xlu1 %2139 }
 0x968   : > { %v2142_v24 = vmul.f32 0.0078125, %v2140_v22  ;;  %v2145_v27 = vmul.f32 %v8696_v21, %v8696_v21 }
 0x96a   : > { %2147 = vadd.xlane.f32.xlu0 %v2145_v27  ;;  %v2144_v28 = vsub.f32 %v8692_v16, %v2142_v24 }
 0x96c   : > { %v2146_v59 = vmul.f32 %v2144_v28, %v2144_v28 }
 0x96e   : > { %2149 = vadd.xlane.f32.xlu0 %v2146_v59 }
 0x9f3   : > { %v2148_v25 = vpop.xlane.xlu0 %2147 }
 0x9f4   : > { %v2151_v7 = vmul.f32 0.0078125, %v2148_v25  ;;  %v7563_v25 = vld [vmem:[#allocation4 + $0x78] sm:$0xff]  }
 0x9f6   : > { %v2153_v39 = vadd.f32 1e-05, %v2151_v7 }
 0x9f7   : > { %v2150_v17 = vpop.xlane.xlu0 %2149 }
 0x9f8   : > { %7791 = vrsqrt.f32 %v2153_v39  ;;  %v2152_v13 = vmul.f32 0.0078125, %v2150_v17 }
 0x9fa   : > { %v2154_v20 = vadd.f32 1e-05, %v2152_v13 }
 0x9fc   : > { %7793 = vrsqrt.f32 %v2154_v20 }
 0xa05   : > { %v7792_v51 = vpop.eup %7791 }
 0xa06   : > { %v2157_v52 = vmul.f32 %v7792_v51, %v8696_v21 }
 0xa08   : > { %v2163_v33 = vmul.f32 %v6447_v49, %v2157_v52  ;;  %v7566_v52 = vld [vmem:[#allocation2 + $0xf4] ss:$8 sps:$4 sm:$0xff]  }
 0xa09   : > { %v7794_v56 = vpop.eup %7793  ;;  %2665 = vmatprep.subr.bf16.mxu1 %v7566_v52 }
 0xa0a   : > { %v2158_v55 = vmul.f32 %v7794_v56, %v2144_v28  ;;  %v2169_v2 = vadd.f32 %v6448_v58, %v2163_v33  ;;  %v7567_v56 = vld [vmem:[#allocation4 + $0x70] sm:$0xff]   ;;  %v7568_v33 = vld [vmem:[#allocation2 + $0xe0] ss:$8 sps:$4 sm:$0xff]  }
 0xa0c   : > { %v2164_v0 = vmul.f32 %v6447_v49, %v2158_v55  ;;  %v7564_v49 = vld [vmem:[#allocation2 + $0xf0] ss:$8 sps:$4 sm:$0xff]   ;;  %v7570_v55 = vld [vmem:[#allocation2 + $0xe4] ss:$8 sps:$4 sm:$0xff]  }
 0xa0e   : > { %v2170_v63 = vadd.f32 %v6448_v58, %v2164_v0  ;;  %v7571_v58 = vld [vmem:[#allocation4 + $0x68] sm:$0xff]   ;;  %v7574_v0 = vld [vmem:[#allocation2 + $0xd4] ss:$8 sps:$4 sm:$0xff]  }
 0xa10   : > { %v2171_v5 = vpack.c.bf16 %v2170_v63, %v2169_v2  ;;  %v7572_v2 = vld [vmem:[#allocation2 + $0xd0] ss:$8 sps:$4 sm:$0xff]   ;;  %v7575_v63 = vld [vmem:[#allocation4 + $0x60] sm:$0xff]  }
 0xa12   : > { %2313 = vmatmul.mubr.bf16.vlgmr.msra.gmra.mxu1 %v2171_v5  ;;  %v7578_v5 = vld [vmem:[#allocation2 + $0xc4] ss:$8 sps:$4 sm:$0xff]  }
 0xa13   : > { %2697 = vmatprep.mubr.bf16.mxu1 %v8110_v35  ;;  %2666 = vmatpush1.bf16.msra.mxu1 %v7564_v49 }
 0xa14   : > { %2667 = vmatprep.subr.bf16.mxu1 %v7570_v55 }
 0xa17   : > { %2668 = vmatpush1.bf16.msra.mxu1 %v7568_v33  ;;  %v6504_v33 = vld [vmem:[%s9475_s8 + $0x1] ss:$0 sm:$0xff] }
 0xa18   : > { %2669 = vmatprep.subr.bf16.mxu1 %v7574_v0 }
 0xa1b   : > { %2670 = vmatpush1.bf16.msra.mxu1 %v7572_v2 }
 0xa1c   : > { %2671 = vmatprep.subr.bf16.mxu1 %v7578_v5 }
 0xa1f   : > { %2672 = vmatpush1.bf16.msra.mxu1 %v7576_v6 }
 0xa20   : > { %2673 = vmatprep.subr.bf16.mxu1 %v7582_v10 }
 0xa23   : > { %2674 = vmatpush1.bf16.msra.mxu1 %v7580_v44 }
 0xa24   : > { %2675 = vmatprep.subr.bf16.mxu1 %v7586_v14 }
 0xa27   : > { %2676 = vmatpush1.bf16.msra.mxu1 %v7584_v18 }
 0xa28   : > { %2677 = vmatprep.subr.bf16.mxu1 %v7590_v19 }
 0xad2   : > { %v2314_v21 = vpop.f32.mrf.mxu1 }
 0xad3   : > { %v2315_v27 = vadd.f32 %v2314_v21, %v2193_v57  ;;  %v7594_v21 = vld [vmem:[#allocation2 + $0x84] ss:$8 sps:$4 sm:$0xff]  }
 0xad4   : > { %v2316_v22 = vpop.f32.mrf.mxu1 }
 0xad5   : > { %v2317_v24 = vadd.f32 %v2316_v22, %v2197_v54  ;;  %v2327_v60 = vmul.f32 0.01, %v2315_v27  ;;  %vm2323_vm10 = vcmp.ge.f32.partialorder %v2315_v27, 0.0  ;;  %v7591_v22 = vld [vmem:[#allocation4 + $0x40] sm:$0xff]  }
 0xad6   : > { %v2318_v28 = vpop.f32.mrf.mxu1 }
 0xad7   : > { %v2319_v59 = vadd.f32 %v2318_v28, %v2193_v57  ;;  %v2328_v30 = vmul.f32 0.01, %v2317_v24  ;;  %vm2324_vm9 = vcmp.ge.f32.partialorder %v2317_v24, 0.0  ;;  %v2331_v41 = vsel %vm2323_vm10, %v2315_v27, %v2327_v60  ;;  %v7588_v57 = vld [vmem:[#allocation2 + $0x90] ss:$8 sps:$4 sm:$0xff]  }
 0xad8   : > { %v2320_v62 = vpop.f32.mrf.mxu1  ;;  %2678 = vmatpush1.bf16.msra.mxu1 %v7588_v57  ;;  %v6484_v60 = vld [vmem:[%s9471_s4 + $0x2] ss:$0 sm:$0xff] }
 0xad9   : > { %vm2325_vm8 = vcmp.ge.f32.partialorder %v2319_v59, 0.0  ;;  %v2329_v31 = vmul.f32 0.01, %v2319_v59  ;;  %v2321_v32 = vadd.f32 %v2320_v62, %v2197_v54  ;;  %v2332_v9 = vsel %vm2324_vm9, %v2317_v24, %v2328_v30  ;;  %v7587_v54 = vld [vmem:[#allocation4 + $0x48] sm:$0xff]   ;;  %2679 = vmatprep.subr.bf16.mxu1 %v7594_v21 }
 0xada   : > { %v7592_v24 = vld [vmem:[#allocation2 + $0x80] ss:$8 sps:$4 sm:$0xff]  }
 0xadb   : > { %vm2326_vm11 = vcmp.ge.f32.partialorder %v2321_v32, 0.0  ;;  %v2330_v1 = vmul.f32 0.01, %v2321_v32  ;;  %v2333_v12 = vsel %vm2325_vm8, %v2319_v59, %v2329_v31 }
 0xadc   : > { %v2335_v42 = vpack.c.bf16 %v2333_v12, %v2331_v41  ;;  %2680 = vmatpush1.bf16.msra.mxu1 %v7592_v24 }
 0xadd   : > { %v2334_v40 = vsel %vm2326_vm11, %v2321_v32, %v2330_v1  ;;  %7053 = vmatprep.subr.bf16.mxu1 %v8108_v3 }
 0xade   : > { %v2336_v4 = vpack.c.bf16 %v2334_v40, %v2332_v9  ;;  %v6485_v40 = vld [vmem:[%s9471_s4 + $0x3] ss:$0 sm:$0xff] }
 0xae0   : > { %2504 = vmatprep.mubr.bf16.mxu0 %v2336_v4 }
 0xae1   : > { %2505 = vmatmul.mubr.bf16.vlgmr.msra.gmra.mxu0 %v2335_v42 }
 0xae2   : > { %7049 = vmatprep.mubr.msk.bf16.mxu0 %vm8109_vm0, %v8108_v3  ;;  %7034 = vmatpush3.bf16.msra.mxu0 %v7563_v25 }
 0xae3   : > { %7035 = vmatprep.subr.bf16.mxu0 %v8108_v3 }
 0xae6   : > { %7036 = vmatpush3.bf16.msra.mxu0 %v7567_v56 }
 0xae7   : > { %7037 = vmatprep.subr.bf16.mxu0 %v8108_v3 }
 0xaea   : > { %7038 = vmatpush3.bf16.msra.mxu0 %v7571_v58 }
 0xaeb   : > { %7039 = vmatprep.subr.bf16.mxu0 %v8108_v3 }
 0xaee   : > { %7040 = vmatpush3.bf16.msra.mxu0 %v7575_v63 }
 0xaef   : > { %7041 = vmatprep.subr.bf16.mxu0 %v8108_v3 }
 0xaf2   : > { %7042 = vmatpush3.bf16.msra.mxu0 %v7579_v11 }
 0xaf3   : > { %7043 = vmatprep.subr.bf16.mxu0 %v8108_v3 }
 0xaf6   : > { %7044 = vmatpush3.bf16.msra.mxu0 %v7583_v15 }
 0xaf7   : > { %7045 = vmatprep.subr.bf16.mxu0 %v8108_v3 }
 0xafa   : > { %7046 = vmatpush3.bf16.msra.mxu0 %v7587_v54 }
 0xafb   : > { %7047 = vmatprep.subr.bf16.mxu0 %v8108_v3 }
 0xafe   : > { %7048 = vmatpush3.bf16.msra.mxu0 %v7591_v22 }
 0xaff   : > { %7077 = vmatprep.subr.bf16.mxu0 %v8108_v3 }
 0xba1   : > { %v6747_v29 = vpop.f32.mrf.mxu0 }
 0xba3   : > { %v6748_v34 = vpop.f32.mrf.mxu0 }
 0xba4   : > { %v6749_v36 = vadd.f32 %v6748_v34, %v6747_v29  ;;  %v7945_v34 = vld [vmem:[%s8356_s7] sm:$0xff] }
 0xba5   : > { %v6750_v46 = vpop.f32.mrf.mxu0 }
 0xba6   : > { %v2507_v37 = vadd.f32 %v6749_v36, %v6465_v45 }
 0xba7   : > { %v6751_v38 = vpop.f32.mrf.mxu0 }
 0xba8   : > { %v6752_v47 = vadd.f32 %v6751_v38, %v6750_v46  ;;  %v8721_v48 = vadd.f32 %v2507_v37, %v8688_v53  ;;  %v7946_v46 = vld [vmem:[%s8356_s7 + $0x8] sm:$0xff] }
 0xbaa   : > { %v2510_v50 = vadd.f32 %v6752_v47, %v6465_v45  ;;  %2518 = vadd.xlane.f32.xlu0 %v8721_v48 }
 0xbac   : > { %v8725_v43 = vadd.f32 %v2510_v50, %v8692_v16 }
 0xbae   : > { %2520 = vadd.xlane.f32.xlu1 %v8725_v43 }
 0xc33   : > { %v2519_v7 = vpop.xlane.xlu0 %2518 }
 0xc34   : > { %v2522_v39 = vmul.f32 0.0078125, %v2519_v7  ;;  %v6486_v7 = vld [vmem:[%s9473_s6 + $0x2] sm:$0x3] }
 0xc35   : > { %v2578_v56 = vrot.slane %v6486_v7, %v8371_v8 }
 0xc36   : > { %v8730_v17 = vsub.f32 %v8721_v48, %v2522_v39 }
 0xc37   : > { %v2521_v13 = vpop.xlane.xlu1 %2520 }
 0xc38   : > { %v2523_v53 = vmul.f32 0.0078125, %v2521_v13  ;;  %v2526_v20 = vmul.f32 %v8730_v17, %v8730_v17  ;;  %v2582_v13 = vrot.slane %v6486_v7, %v8365_v61 }
 0xc3a   : > { %2528 = vadd.xlane.f32.xlu0 %v2526_v20  ;;  %v8735_v16 = vsub.f32 %v8725_v43, %v2523_v53 }
 0xc3c   : > { %v2527_v51 = vmul.f32 %v8735_v16, %v8735_v16 }
 0xc3e   : > { %2530 = vadd.xlane.f32.xlu1 %v2527_v51 }
 0xcc3   : > { %v2529_v27 = vpop.xlane.xlu0 %2528 }
 0xcc4   : > { %v2532_v28 = vmul.f32 0.0078125, %v2529_v27 }
 0xcc6   : > { %v2534_v59 = vadd.f32 1e-05, %v2532_v28 }
 0xcc7   : > { %v2531_v62 = vpop.xlane.xlu1 %2530 }
 0xcc8   : > { %7795 = vrsqrt.f32 %v2534_v59  ;;  %v2533_v30 = vmul.f32 0.0078125, %v2531_v62 }
 0xcca   : > { %v2535_v31 = vadd.f32 1e-05, %v2533_v30 }
 0xccc   : > { %7797 = vrsqrt.f32 %v2535_v31 }
 0xcd5   : > { %v7796_v32 = vpop.eup %7795 }
 0xcd6   : > { %v2538_v1 = vmul.f32 %v7796_v32, %v8730_v17 }
 0xcd8   : > { %v2544_v12 = vmul.f32 %v6484_v60, %v2538_v1 }
 0xcd9   : > { %v7798_v9 = vpop.eup %7797 }
 0xcda   : > { %v2539_v41 = vmul.f32 %v7798_v9, %v8735_v16  ;;  %v2550_v42 = vadd.f32 %v6485_v40, %v2544_v12 }
 0xcdc   : > { %v2545_v4 = vmul.f32 %v6484_v60, %v2539_v41  ;;  %v2552_v36 = vadd.f32 %v7945_v34, %v2550_v42 }
 0xcde   : > { %v2551_v29 = vadd.f32 %v6485_v40, %v2545_v4 }
 0xce0   : > { %v2710_v45 = vpack.c.bf16 %v2551_v29, %v2550_v42  ;;  %v2553_v37 = vadd.f32 %v7946_v46, %v2551_v29 }
 0xce2   : > { %7050 = vmatmul.mubr.bf16.vlgmr.msra.gmra.mxu0 %v2710_v45  ;;  %v2554_v38 = vpack.c.bf16 %v2553_v37, %v2552_v36 }
 0xce3   : > { %7079 = vmatprep.mubr.msk.bf16.mxu0 %vm8109_vm0, %v8108_v3 }
 0xce4   : > { %2698 = vmatmul.mubr.bf16.vlgmr.msra.gmra.mxu1 %v2554_v38 }
 0xce5   : > { %7055 = vmatprep.mubr.msk.bf16.mxu1 %vm8109_vm0, %v8108_v3 }
 0xda2   : > { %v2818_v47 = vpop.f32.mrf.mxu0 }
 0xda3   : > { %v2819_v63 = vadd.f32 %v6504_v33, %v2818_v47 }
 0xda4   : > { %v2699_v50 = vpop.f32.mrf.mxu1  ;;  %v7051_v25 = vpop.f32.mrf.mxu0 }
 0xda5   : > { %v2700_v2 = vadd.f32 %v2699_v50, %v2578_v56 }
 0xda6   : > { %v2701_v39 = vpop.f32.mrf.mxu1  ;;  %v2821_v17 = vpop.f32.mrf.mxu0 }
 0xda7   : > { %v2702_v51 = vadd.f32 %v2701_v39, %v2582_v13  ;;  %v2822_v0 = vadd.f32 %v6504_v33, %v2821_v17 }
 0xda8   : > { %v2703_v53 = vpop.f32.mrf.mxu1  ;;  %v7052_v20 = vpop.f32.mrf.mxu0 }
 0xda9   : > { %v2704_v58 = vadd.f32 %v2703_v53, %v2578_v56  ;;  %v8771_v6 = vpack.c.bf16 %v2822_v0, %v2819_v63 }
 0xdaa   : > { %v2705_v16 = vpop.f32.mrf.mxu1 }
 0xdab   : > { %v2706_v52 = vadd.f32 %v2705_v16, %v2582_v13  ;;  %v2708_v5 = vpack.c.bf16 %v2704_v58, %v2700_v2 }
 0xdad   : > { %v2709_v49 = vpack.c.bf16 %v2706_v52, %v2702_v51 }
 0xdaf   : > { %v2830_v55 = vsel %vm979_vm1, %v2709_v49, 0 }
 0xdb0   : > { %7054 = vmatpush3.bf16.xpose.msra.mxu1 %v2830_v55 }
 0xdb1   : > { %7059 = vmatprep.subr.bf16.mxu1 %v8108_v3 }
 0xdb7   : > { %7056 = vmatmul.mubr.msk.bf16.vlgmr.msra.gmra.mxu1 %vm979_vm1, %v2708_v5 }
 0xdb8   : > { %7060 = vmatpush3.bf16.msra.mxu1 %v8771_v6  ;;  %7061 = vmatprep.mubr.msk.bf16.mxu1 %vm8109_vm0, %v8108_v3 }
 0xdb9   : > { %7065 = vmatprep.subr.bf16.mxu1 %v8108_v3 }
 0xe77   : > { %v2866_v10 = vpop.f32.mrf.mxu1 }
 0xe78   : > { %v2867_v11 = vadd.f32 %v2866_v10, %v8396_v23 }
 0xe79   : > { %v7057_v44 = vpop.f32.mrf.mxu1 }
 0xe7a   : > { %v2873_v14 = vsel %vm979_vm1, %v2867_v11, -inf }
 0xe7b   : > { %2874 = vmax.xlane.f32.xlu0 %v2873_v14  ;;  %v2869_v15 = vpop.f32.mrf.mxu1 }
 0xe7c   : > { %v2870_v18 = vadd.f32 %v2869_v15, %v8401_v26 }
 0xe7d   : > { %v7058_v19 = vpop.f32.mrf.mxu1 }
 0xe7e   : > { %v2876_v54 = vsel %vm979_vm1, %v2870_v18, -inf }
 0xe7f   : > { %2877 = vmax.xlane.f32.xlu1 %v2876_v54 }
 0xf04   : > { %v2875_v57 = vpop.xlane.xlu0 %2874 }
 0xf05   : > { %v2879_v21 = vsub.f32 %v2867_v11, %v2875_v57 }
 0xf07   : > { %v2881_v22 = vmul.f32 1.442695, %v2879_v21 }
 0xf08   : > { %v2878_v24 = vpop.xlane.xlu1 %2877 }
 0xf09   : > { %7799 = vpow2.f32 %v2881_v22  ;;  %v2880_v27 = vsub.f32 %v2870_v18, %v2878_v24 }
 0xf0b   : > { %v2883_v28 = vmul.f32 1.442695, %v2880_v27 }
 0xf0d   : > { %7801 = vpow2.f32 %v2883_v28 }
 0xf16   : > { %v7800_v59 = vpop.eup %7799 }
 0xf17   : > { %v2885_v62 = vsel %vm979_vm1, %v7800_v59, 0.0 }
 0xf18   : > { %2886 = vadd.xlane.f32.xlu0 %v2885_v62 }
 0xf1a   : > { %v7802_v30 = vpop.eup %7801 }
 0xf1b   : > { %v2888_v31 = vsel %vm979_vm1, %v7802_v30, 0.0 }
 0xf1c   : > { %2889 = vadd.xlane.f32.xlu1 %v2888_v31 }
 0xf2d   : > { %2941 = vrot.lane.b32.xlu1 %v2708_v5, %s8111_s27 }
 0xf2e   : > { %2944 = vrot.lane.b32.xlu0 %v2709_v49, %s8111_s27 }
 0xf31   : > { %3066 = vrot.lane.b32.xlu1 %v2709_v49, %s8112_s0 }
 0xf32   : > { %3187 = vrot.lane.b32.xlu0 %v2709_v49, %s8113_s29 }
 0xf35   : > { %3064 = vrot.lane.b32.xlu1 %v2708_v5, %s8112_s0 }
 0xf36   : > { %3308 = vrot.lane.b32.xlu0 %v2709_v49, %s8114_s1 }
 0xf39   : > { %3185 = vrot.lane.b32.xlu1 %v2708_v5, %s8113_s29 }
 0xf3a   : > { %3429 = vrot.lane.b32.xlu0 %v2709_v49, %s8115_s22 }
 0xf3d   : > { %3306 = vrot.lane.b32.xlu1 %v2708_v5, %s8114_s1 }
 0xf3e   : > { %3550 = vrot.lane.b32.xlu0 %v2709_v49, %s8116_s26 }
 0xf41   : > { %3427 = vrot.lane.b32.xlu1 %v2708_v5, %s8115_s22 }
 0xf42   : > { %3671 = vrot.lane.b32.xlu0 %v2709_v49, %s8117_s23 }
 0xf45   : > { %3548 = vrot.lane.b32.xlu1 %v2708_v5, %s8116_s26 }
 0xf49   : > { %3669 = vrot.lane.b32.xlu1 %v2708_v5, %s8117_s23 }
 0xfa1   : > { %v2887_v32 = vpop.xlane.xlu0 %2886 }
 0xfa2   : > { %7803 = vrcp.f32 %v2887_v32 }
 0xfa5   : > { %v2890_v60 = vpop.xlane.xlu1 %2889  ;;  %v2945_v12 = vpop.permute.xlu0 %2944 }
 0xfa6   : > { %7805 = vrcp.f32 %v2890_v60  ;;  %v2950_v37 = vsel %vm979_vm1, %v2945_v12, 0 }
 0xfa9   : > { %v2942_v1 = vpop.permute.xlu1 %2941  ;;  %v3188_v42 = vpop.permute.xlu0 %3187 }
 0xfaa   : > { %v3193_v36 = vsel %vm979_vm1, %v3188_v42, 0 }
 0xfad   : > { %v3067_v9 = vpop.permute.xlu1 %3066  ;;  %v3309_v38 = vpop.permute.xlu0 %3308 }
 0xfae   : > { %v3072_v40 = vsel %vm979_vm1, %v3067_v9, 0  ;;  %v3314_v50 = vsel %vm979_vm1, %v3309_v38, 0 }
 0xfaf   : > { %7078 = vmatpush3.bf16.xpose.msra.mxu0 %v3072_v40  ;;  %v7804_v41 = vpop.eup %7803 }
 0xfb0   : > { %7089 = vmatprep.subr.bf16.mxu0 %v8108_v3  ;;  %v2893_v29 = vmul.f32 %v7804_v41, %v7800_v59 }
 0xfb1   : > { %v3065_v34 = vpop.permute.xlu1 %3064  ;;  %v3430_v25 = vpop.permute.xlu0 %3429 }
 0xfb2   : > { %v3435_v39 = vsel %vm979_vm1, %v3430_v25, 0 }
 0xfb3   : > { %v7806_v4 = vpop.eup %7805 }
 0xfb4   : > { %v2894_v45 = vmul.f32 %v7806_v4, %v7802_v30 }
 0xfb5   : > { %v3186_v47 = vpop.permute.xlu1 %3185  ;;  %v3551_v17 = vpop.permute.xlu0 %3550 }
 0xfb6   : > { %7080 = vmatmul.mubr.msk.bf16.vlgmr.msra.gmra.mxu0 %vm979_vm1, %v3065_v34  ;;  %v2895_v46 = vpack.c.bf16 %v2894_v45, %v2893_v29  ;;  %v3556_v53 = vsel %vm979_vm1, %v3551_v17, 0 }
 0xfb7   : > { %7090 = vmatpush3.bf16.xpose.msra.mxu0 %v3193_v36  ;;  %7091 = vmatprep.mubr.msk.bf16.mxu0 %vm8109_vm0, %v8108_v3 }
 0xfb8   : > { %7062 = vmatmul.mubr.msk.bf16.vlgmr.msra.gmra.mxu1 %vm979_vm1, %v2895_v46  ;;  %7101 = vmatprep.subr.bf16.mxu0 %v8108_v3 }
 0xfb9   : > { %7066 = vmatpush3.bf16.xpose.msra.mxu1 %v2950_v37  ;;  %7067 = vmatprep.mubr.msk.bf16.mxu1 %vm8109_vm0, %v8108_v3  ;;  %v3307_v7 = vpop.permute.xlu1 %3306  ;;  %v3672_v20 = vpop.permute.xlu0 %3671 }
 0xfba   : > { %7071 = vmatprep.subr.bf16.mxu1 %v8108_v3  ;;  %v3677_v51 = vsel %vm979_vm1, %v3672_v20, 0 }
 0xfbd   : > { %v3428_v13 = vpop.permute.xlu1 %3427 }
 0xfbe   : > { %7092 = vmatmul.mubr.msk.bf16.vlgmr.msra.gmra.mxu0 %vm979_vm1, %v3186_v47 }
 0xfbf   : > { %7102 = vmatpush3.bf16.xpose.msra.mxu0 %v3314_v50  ;;  %7103 = vmatprep.mubr.msk.bf16.mxu0 %vm8109_vm0, %v8108_v3 }
 0xfc0   : > { %7068 = vmatmul.mubr.msk.bf16.vlgmr.msra.gmra.mxu1 %vm979_vm1, %v2942_v1  ;;  %7113 = vmatprep.subr.bf16.mxu0 %v8108_v3 }
 0xfc1   : > { %7073 = vmatprep.mubr.msk.bf16.mxu1 %vm8109_vm0, %v8108_v3  ;;  %v3549_v16 = vpop.permute.xlu1 %3548 }
 0xfc5   : > { %v3670_v52 = vpop.permute.xlu1 %3669 }
 0xfc6   : > { %7104 = vmatmul.mubr.msk.bf16.vlgmr.msra.gmra.mxu0 %vm979_vm1, %v3307_v7 }
 0xfc7   : > { %7114 = vmatpush3.bf16.xpose.msra.mxu0 %v3435_v39  ;;  %7115 = vmatprep.mubr.msk.bf16.mxu0 %vm8109_vm0, %v8108_v3 }
 0xfc8   : > { %7125 = vmatprep.subr.bf16.mxu0 %v8108_v3 }
 0xfce   : > { %7116 = vmatmul.mubr.msk.bf16.vlgmr.msra.gmra.mxu0 %vm979_vm1, %v3428_v13 }
 0xfcf   : > { %7126 = vmatpush3.bf16.xpose.msra.mxu0 %v3556_v53  ;;  %7127 = vmatprep.mubr.msk.bf16.mxu0 %vm8109_vm0, %v8108_v3 }
 0xfd0   : > { %7137 = vmatprep.subr.bf16.mxu0 %v8108_v3 }
 0xfd6   : > { %7128 = vmatmul.mubr.msk.bf16.vlgmr.msra.gmra.mxu0 %vm979_vm1, %v3549_v16 }
 0xfd7   : > { %7138 = vmatpush3.bf16.xpose.msra.mxu0 %v3677_v51  ;;  %7139 = vmatprep.mubr.msk.bf16.mxu0 %vm8109_vm0, %v8108_v3 }
 0xfd8   : > { %7149 = vmatprep.subr.bf16.mxu0 %v8108_v3 }
 0xfde   : > { %7140 = vmatmul.mubr.msk.bf16.vlgmr.msra.gmra.mxu0 %vm979_vm1, %v3670_v52 }
 0xfdf   : > { %7165 = vmatprep.mubr.msk.bf16.mxu0 %vm8109_vm0, %v8108_v3 }
0x1076   : > { %v3108_v49 = vpop.f32.mrf.mxu0 }
0x1077   : > { %v8844_v18 = vadd.f32 %v3108_v49, %v8396_v23 }
0x1078   : > { %v8836_v56 = vpop.f32.mrf.mxu1  ;;  %v7081_v55 = vpop.f32.mrf.mxu0 }
0x1079   : > { %v3115_v59 = vsel %vm979_vm1, %v8844_v18, -inf }
0x107a   : > { %v7063_v33 = vpop.f32.mrf.mxu1  ;;  %v3111_v58 = vpop.f32.mrf.mxu0 }
0x107b   : > { %v3112_v27 = vadd.f32 %v3111_v58, %v8401_v26 }
0x107c   : > { %v8838_v0 = vpop.f32.mrf.mxu1  ;;  %v7082_v2 = vpop.f32.mrf.mxu0 }
0x107d   : > { %v3118_v1 = vsel %vm979_vm1, %v3112_v27, -inf }
0x107e   : > { %v7064_v63 = vpop.f32.mrf.mxu1  ;;  %v3229_v5 = vpop.f32.mrf.mxu0 }
0x107f   : > { %v8858_v32 = vadd.f32 %v3229_v5, %v8396_v23 }
0x1080   : > { %v2986_v10 = vpop.f32.mrf.mxu1  ;;  %v7093_v11 = vpop.f32.mrf.mxu0 }
0x1081   : > { %v8841_v44 = vadd.f32 %v2986_v10, %v8396_v23  ;;  %v3236_v4 = vsel %vm979_vm1, %v8858_v32, -inf }
0x1082   : > { %v7069_v14 = vpop.f32.mrf.mxu1  ;;  %v3232_v15 = vpop.f32.mrf.mxu0 }
0x1083   : > { %v2993_v19 = vsel %vm979_vm1, %v8841_v44, -inf  ;;  %v3233_v28 = vadd.f32 %v3232_v15, %v8401_v26 }
0x1084   : > { %v7094_v54 = vpop.f32.mrf.mxu0  ;;  %2994 = vmax.xlane.f32.xlu0 %v2993_v19  ;;  %v2989_v57 = vpop.f32.mrf.mxu1 }
0x1085   : > { %v8849_v21 = vadd.f32 %v2989_v57, %v8401_v26  ;;  %v3239_v12 = vsel %vm979_vm1, %v3233_v28, -inf }
0x1086   : > { %v7070_v22 = vpop.f32.mrf.mxu1  ;;  %v3350_v24 = vpop.f32.mrf.mxu0 }
0x1087   : > { %v2996_v62 = vsel %vm979_vm1, %v8849_v21, -inf  ;;  %v8866_v41 = vadd.f32 %v3350_v24, %v8396_v23 }
0x1088   : > { %v7105_v30 = vpop.f32.mrf.mxu0  ;;  %3116 = vmax.xlane.f32.xlu0 %v3115_v59  ;;  %2997 = vmax.xlane.f32.xlu1 %v2996_v62 }
0x1089   : > { %v3357_v46 = vsel %vm979_vm1, %v8866_v41, -inf }
0x108a   : > { %v3353_v31 = vpop.f32.mrf.mxu0 }
0x108b   : > { %v8861_v60 = vadd.f32 %v3353_v31, %v8401_v26 }
0x108c   : > { %v7106_v9 = vpop.f32.mrf.mxu0  ;;  %3119 = vmax.xlane.f32.xlu0 %v3118_v1  ;;  %3240 = vmax.xlane.f32.xlu1 %v3239_v12 }
0x108d   : > { %v3360_v42 = vsel %vm979_vm1, %v8861_v60, -inf }
0x108e   : > { %v3471_v40 = vpop.f32.mrf.mxu0 }
0x108f   : > { %v8873_v34 = vadd.f32 %v3471_v40, %v8396_v23 }
0x1090   : > { %v7117_v29 = vpop.f32.mrf.mxu0  ;;  %3237 = vmax.xlane.f32.xlu0 %v3236_v4  ;;  %3361 = vmax.xlane.f32.xlu1 %v3360_v42 }
0x1091   : > { %v3478_v25 = vsel %vm979_vm1, %v8873_v34, -inf }
0x1092   : > { %v3474_v45 = vpop.f32.mrf.mxu0 }
0x1093   : > { %v8876_v36 = vadd.f32 %v3474_v45, %v8401_v26 }
0x1094   : > { %v7118_v37 = vpop.f32.mrf.mxu0  ;;  %3358 = vmax.xlane.f32.xlu0 %v3357_v46 }
0x1095   : > { %v3481_v38 = vsel %vm979_vm1, %v8876_v36, -inf }
0x1096   : > { %v3592_v47 = vpop.f32.mrf.mxu0  ;;  %3482 = vmax.xlane.f32.xlu1 %v3481_v38 }
0x1097   : > { %v8883_v50 = vadd.f32 %v3592_v47, %v8396_v23 }
0x1098   : > { %v7129_v7 = vpop.f32.mrf.mxu0  ;;  %3479 = vmax.xlane.f32.xlu0 %v3478_v25 }
0x1099   : > { %v3599_v13 = vsel %vm979_vm1, %v8883_v50, -inf }
0x109a   : > { %v3595_v39 = vpop.f32.mrf.mxu0 }
0x109b   : > { %v8888_v17 = vadd.f32 %v3595_v39, %v8401_v26 }
0x109c   : > { %v7130_v53 = vpop.f32.mrf.mxu0  ;;  %3600 = vmax.xlane.f32.xlu0 %v3599_v13 }
0x109d   : > { %v3602_v20 = vsel %vm979_vm1, %v8888_v17, -inf }
0x109e   : > { %v3713_v16 = vpop.f32.mrf.mxu0  ;;  %3603 = vmax.xlane.f32.xlu1 %v3602_v20 }
0x109f   : > { %v8895_v51 = vadd.f32 %v3713_v16, %v8396_v23 }
0x10a0   : > { %v7141_v52 = vpop.f32.mrf.mxu0 }
0x10a1   : > { %v3720_v49 = vsel %vm979_vm1, %v8895_v51, -inf }
0x10a2   : > { %v3716_v55 = vpop.f32.mrf.mxu0  ;;  %3721 = vmax.xlane.f32.xlu0 %v3720_v49 }
0x10a3   : > { %v8900_v33 = vadd.f32 %v3716_v55, %v8401_v26 }
0x10a4   : > { %v7142_v58 = vpop.f32.mrf.mxu0 }
0x10a5   : > { %v3723_v2 = vsel %vm979_vm1, %v8900_v33, -inf }
0x10a6   : > { %3724 = vmax.xlane.f32.xlu1 %v3723_v2 }
0x110d   : > { %v2995_v63 = vpop.xlane.xlu0 %2994 }
0x110e   : > { %v2999_v1 = vsub.f32 %v8841_v44, %v2995_v63 }
0x1111   : > { %v3117_v5 = vpop.xlane.xlu0 %3116  ;;  %v2998_v10 = vpop.xlane.xlu1 %2997 }
0x1112   : > { %v3121_v11 = vsub.f32 %v8844_v18, %v3117_v5  ;;  %v3000_v44 = vsub.f32 %v8849_v21, %v2998_v10 }
0x1114   : > { %v3123_v14 = vmul.f32 1.442695, %v3121_v11  ;;  %v3003_v38 = vmul.f32 1.442695, %v3000_v44 }
0x1115   : > { %v3120_v15 = vpop.xlane.xlu0 %3119  ;;  %v3241_v19 = vpop.xlane.xlu1 %3240 }
0x1116   : > { %7807 = vpow2.f32 %v3123_v14  ;;  %v3122_v54 = vsub.f32 %v3112_v27, %v3120_v15  ;;  %v3243_v57 = vsub.f32 %v3233_v28, %v3241_v19  ;;  %v3001_v27 = vmul.f32 1.442695, %v2999_v1 }
0x1118   : > { %v3125_v22 = vmul.f32 1.442695, %v3122_v54  ;;  %v3246_v24 = vmul.f32 1.442695, %v3243_v57 }
0x1119   : > { %v3238_v59 = vpop.xlane.xlu0 %3237  ;;  %v3362_v62 = vpop.xlane.xlu1 %3361 }
0x111a   : > { %7809 = vpow2.f32 %v3125_v22  ;;  %v3242_v30 = vsub.f32 %v8858_v32, %v3238_v59  ;;  %v3364_v31 = vsub.f32 %v8861_v60, %v3362_v62 }
0x111b   : > { %7811 = vpow2.f32 %v3246_v24 }
0x111c   : > { %v3244_v12 = vmul.f32 1.442695, %v3242_v30  ;;  %v3367_v18 = vmul.f32 1.442695, %v3364_v31 }
0x111d   : > { %v3359_v9 = vpop.xlane.xlu0 %3358 }
0x111e   : > { %7813 = vpow2.f32 %v3244_v12  ;;  %v3363_v40 = vsub.f32 %v8866_v41, %v3359_v9 }
0x111f   : > { %v3483_v28 = vpop.xlane.xlu1 %3482  ;;  %7815 = vpow2.f32 %v3367_v18 }
0x1120   : > { %v3365_v4 = vmul.f32 1.442695, %v3363_v40  ;;  %v3485_v42 = vsub.f32 %v8876_v36, %v3483_v28 }
0x1121   : > { %v3480_v29 = vpop.xlane.xlu0 %3479 }
0x1122   : > { %7817 = vpow2.f32 %v3365_v4  ;;  %v3484_v32 = vsub.f32 %v8873_v34, %v3480_v29  ;;  %v3488_v45 = vmul.f32 1.442695, %v3485_v42 }
0x1123   : > { %v8911_v60 = vpop.eup %7807  ;;  %7819 = vpow2.f32 %v3001_v27 }
0x1124   : > { %v3486_v46 = vmul.f32 1.442695, %v3484_v32  ;;  %v3127_v41 = vsel %vm979_vm1, %v8911_v60, 0.0 }
0x1125   : > { %3128 = vadd.xlane.f32.xlu0 %v3127_v41  ;;  %v3601_v5 = vpop.xlane.xlu0 %3600 }
0x1126   : > { %7821 = vpow2.f32 %v3486_v46  ;;  %v3605_v10 = vsub.f32 %v8883_v50, %v3601_v5 }
0x1127   : > { %v8916_v37 = vpop.eup %7809  ;;  %7823 = vpow2.f32 %v3488_v45  ;;  %v3604_v14 = vpop.xlane.xlu1 %3603 }
0x1128   : > { %v3130_v36 = vsel %vm979_vm1, %v8916_v37, 0.0  ;;  %v8920_v34 = vpop.eup %7811  ;;  %7825 = vpow2.f32 %v3003_v38  ;;  %v3607_v11 = vmul.f32 1.442695, %v3605_v10  ;;  %v3606_v15 = vsub.f32 %v8888_v17, %v3604_v14 }
0x1129   : > { %3131 = vadd.xlane.f32.xlu1 %v3130_v36  ;;  %v3251_v25 = vsel %vm979_vm1, %v8920_v34, 0.0 }
0x112a   : > { %7827 = vpow2.f32 %v3607_v11  ;;  %v3609_v54 = vmul.f32 1.442695, %v3606_v15 }
0x112b   : > { %v8922_v47 = vpop.eup %7813  ;;  %v3722_v19 = vpop.xlane.xlu0 %3721 }
0x112c   : > { %v3248_v21 = vsel %vm979_vm1, %v8922_v47, 0.0  ;;  %v8928_v7 = vpop.eup %7815  ;;  %v3726_v57 = vsub.f32 %v8895_v51, %v3722_v19  ;;  %7829 = vpow2.f32 %v3609_v54 }
0x112d   : > { %3249 = vadd.xlane.f32.xlu0 %v3248_v21  ;;  %3252 = vadd.xlane.f32.xlu1 %v3251_v25  ;;  %v3372_v20 = vsel %vm979_vm1, %v8928_v7, 0.0 }
0x112e   : > { %v3728_v24 = vmul.f32 1.442695, %v3726_v57 }
0x112f   : > { %v8930_v39 = vpop.eup %7817  ;;  %v3725_v22 = vpop.xlane.xlu1 %3724 }
0x1130   : > { %v8932_v13 = vpop.eup %7819  ;;  %v3369_v53 = vsel %vm979_vm1, %v8930_v39, 0.0  ;;  %v3727_v59 = vsub.f32 %v8900_v33, %v3725_v22  ;;  %7831 = vpow2.f32 %v3728_v24 }
0x1131   : > { %3370 = vadd.xlane.f32.xlu0 %v3369_v53  ;;  %3373 = vadd.xlane.f32.xlu1 %v3372_v20  ;;  %v3005_v52 = vsel %vm979_vm1, %v8932_v13, 0.0 }
0x1132   : > { %v3730_v62 = vmul.f32 1.442695, %v3727_v59 }
0x1133   : > { %v8938_v16 = vpop.eup %7821 }
0x1134   : > { %v3490_v49 = vsel %vm979_vm1, %v8938_v16, 0.0  ;;  %v8944_v55 = vpop.eup %7823  ;;  %7833 = vpow2.f32 %v3730_v62 }
0x1135   : > { %3006 = vadd.xlane.f32.xlu0 %v3005_v52  ;;  %3491 = vadd.xlane.f32.xlu1 %v3490_v49  ;;  %v3493_v58 = vsel %vm979_vm1, %v8944_v55, 0.0  ;;  %v7826_v2 = vpop.eup %7825 }
0x1136   : > { %v3008_v63 = vsel %vm979_vm1, %v7826_v2, 0.0 }
0x1137   : > { %v8957_v30 = vpop.eup %7827 }
0x1138   : > { %v3611_v50 = vsel %vm979_vm1, %v8957_v30, 0.0 }
0x1139   : > { %3494 = vadd.xlane.f32.xlu1 %v3493_v58  ;;  %v8961_v31 = vpop.eup %7829 }
0x113a   : > { %v3614_v17 = vsel %vm979_vm1, %v8961_v31, 0.0 }
0x113d   : > { %3009 = vadd.xlane.f32.xlu1 %v3008_v63  ;;  %v8965_v51 = vpop.eup %7831 }
0x113e   : > { %v3732_v33 = vsel %vm979_vm1, %v8965_v51, 0.0 }
0x1141   : > { %v8969_v1 = vpop.eup %7833 }
0x1142   : > { %v3735_v12 = vsel %vm979_vm1, %v8969_v1, 0.0 }
0x114b   : > { %3017 = vrot.lane.b32.xlu0 %v8771_v6, %s8111_s27 }
0x114e   : > { %3138 = vrot.lane.b32.xlu1 %v8771_v6, %s8112_s0 }
0x116a   : > { %3612 = vadd.xlane.f32.xlu0 %v3611_v50 }
0x1172   : > { %3615 = vadd.xlane.f32.xlu1 %v3614_v17 }
0x1176   : > { %3733 = vadd.xlane.f32.xlu1 %v3732_v33 }
0x117a   : > { %3736 = vadd.xlane.f32.xlu1 %v3735_v12 }
0x1180   : > { %3259 = vrot.lane.b32.xlu0 %v8771_v6, %s8113_s29 }
0x1184   : > { %3501 = vrot.lane.b32.xlu0 %v8771_v6, %s8115_s22 }
0x1188   : > { %3622 = vrot.lane.b32.xlu0 %v8771_v6, %s8116_s26 }
0x118b   : > { %3380 = vrot.lane.b32.xlu1 %v8771_v6, %s8114_s1 }
0x118c   : > { %3743 = vrot.lane.b32.xlu0 %v8771_v6, %s8117_s23 }
0x11ae   : > { %v3129_v18 = vpop.xlane.xlu0 %3128 }
0x11b2   : > { %v3132_v9 = vpop.xlane.xlu1 %3131 }
0x11b6   : > { %v3250_v40 = vpop.xlane.xlu0 %3249  ;;  %v3253_v27 = vpop.xlane.xlu1 %3252 }
0x11ba   : > { %v3371_v28 = vpop.xlane.xlu0 %3370  ;;  %v3374_v4 = vpop.xlane.xlu1 %3373 }
0x11be   : > { %v3007_v42 = vpop.xlane.xlu0 %3006  ;;  %v3492_v29 = vpop.xlane.xlu1 %3491 }
0x11bf   : > { %7835 = vrcp.f32 %v3007_v42 }
0x11c2   : > { %v3018_v32 = vpop.permute.xlu0 %3017  ;;  %v3495_v44 = vpop.xlane.xlu1 %3494 }
0x11c3   : > { %7072 = vmatpush3.bf16.msra.mxu1 %v3018_v32 }
0x11c4   : > { %7083 = vmatprep.subr.bf16.mxu1 %v8108_v3 }
0x11c6   : > { %v3010_v45 = vpop.xlane.xlu1 %3009 }
0x11c7   : > { %7837 = vrcp.f32 %v3010_v45 }
0x11c8   : > { %7839 = vrcp.f32 %v3132_v9 }
0x11c9   : > { %7841 = vrcp.f32 %v3129_v18 }
0x11ca   : > { %v3139_v25 = vpop.permute.xlu1 %3138  ;;  %7843 = vrcp.f32 %v3250_v40 }
0x11cb   : > { %7845 = vrcp.f32 %v3253_v27 }
0x11cc   : > { %v7836_v46 = vpop.eup %7835  ;;  %7847 = vrcp.f32 %v3371_v28 }
0x11cd   : > { %v3013_v41 = vmul.f32 %v7836_v46, %v8932_v13  ;;  %7849 = vrcp.f32 %v3374_v4 }
0x11ce   : > { %7851 = vrcp.f32 %v3495_v44 }
0x11cf   : > { %7853 = vrcp.f32 %v3492_v29 }
0x11d4   : > { %v7838_v6 = vpop.eup %7837 }
0x11d5   : > { %v3014_v38 = vmul.f32 %v7838_v6, %v7826_v2  ;;  %v7840_v21 = vpop.eup %7839 }
0x11d6   : > { %v7842_v53 = vpop.eup %7841  ;;  %v3136_v20 = vmul.f32 %v7840_v21, %v8916_v37 }
0x11d7   : > { %v3015_v36 = vpack.c.bf16 %v3014_v38, %v3013_v41  ;;  %v3135_v52 = vmul.f32 %v7842_v53, %v8911_v60  ;;  %v7844_v13 = vpop.eup %7843  ;;  %v7596_v53 = vld [vmem:[#allocation6 + $0x70] sm:$0xff]  }
0x11d8   : > { %v7846_v58 = vpop.eup %7845  ;;  %v3256_v63 = vmul.f32 %v7844_v13, %v8922_v47  ;;  %v7598_v13 = vld [vmem:[#allocation6 + $0x60] sm:$0xff]  }
0x11d9   : > { %7074 = vmatmul.mubr.msk.bf16.vlgmr.msra.gmra.mxu1 %vm979_vm1, %v3015_v36  ;;  %v3137_v49 = vpack.c.bf16 %v3136_v20, %v3135_v52  ;;  %v3257_v37 = vmul.f32 %v7846_v58, %v8920_v34  ;;  %v7848_v14 = vpop.eup %7847  ;;  %v7597_v20 = vld [vmem:[#allocation6 + $0x68] sm:$0xff]  }
0x11da   : > { %7084 = vmatpush3.bf16.msra.mxu1 %v3139_v25  ;;  %7085 = vmatprep.mubr.msk.bf16.mxu1 %vm8109_vm0, %v8108_v3  ;;  %v7850_v15 = vpop.eup %7849  ;;  %v3377_v34 = vmul.f32 %v7848_v14, %v8930_v39 }
0x11db   : > { %7095 = vmatprep.subr.bf16.mxu1 %v8108_v3  ;;  %v3258_v60 = vpack.c.bf16 %v3257_v37, %v3256_v63  ;;  %v3378_v47 = vmul.f32 %v7850_v15, %v8928_v7  ;;  %v7852_v22 = vpop.eup %7851  ;;  %v7599_v63 = vld [vmem:[#allocation6 + $0x58] sm:$0xff]   ;;  %v7601_v15 = vld [vmem:[#allocation6 + $0x48] sm:$0xff]  }
0x11dc   : > { %v7854_v59 = vpop.eup %7853  ;;  %v3499_v7 = vmul.f32 %v7852_v22, %v8944_v55 }
0x11dd   : > { %v3379_v57 = vpack.c.bf16 %v3378_v47, %v3377_v34  ;;  %v3498_v39 = vmul.f32 %v7854_v59, %v8938_v16 }
0x11df   : > { %v3500_v62 = vpack.c.bf16 %v3499_v7, %v3498_v39 }
0x11e1   : > { %7086 = vmatmul.mubr.msk.bf16.vlgmr.msra.gmra.mxu1 %vm979_vm1, %v3137_v49 }
0x11e2   : > { %7097 = vmatprep.mubr.msk.bf16.mxu1 %vm8109_vm0, %v8108_v3 }
0x11f3   : > { %v3613_v2 = vpop.xlane.xlu0 %3612 }
0x11f7   : > { %v3260_v5 = vpop.permute.xlu0 %3259 }
0x11f8   : > { %7096 = vmatpush3.bf16.msra.mxu1 %v3260_v5 }
0x11f9   : > { %7107 = vmatprep.subr.bf16.mxu1 %v8108_v3 }
0x11fb   : > { %7098 = vmatmul.mubr.msk.bf16.vlgmr.msra.gmra.mxu1 %vm979_vm1, %v3258_v60  ;;  %v3616_v10 = vpop.xlane.xlu1 %3615  ;;  %v3502_v24 = vpop.permute.xlu0 %3501 }
0x11fc   : > { %7109 = vmatprep.mubr.msk.bf16.mxu1 %vm8109_vm0, %v8108_v3  ;;  %7855 = vrcp.f32 %v3616_v10  ;;  %v7600_v10 = vld [vmem:[#allocation6 + $0x50] sm:$0xff]  }
0x11fd   : > { %7857 = vrcp.f32 %v3613_v2 }
0x11ff   : > { %v3734_v11 = vpop.xlane.xlu1 %3733  ;;  %v3623_v17 = vpop.permute.xlu0 %3622 }
0x1203   : > { %v3737_v19 = vpop.xlane.xlu1 %3736  ;;  %v3744_v40 = vpop.permute.xlu0 %3743 }
0x1204   : > { %7859 = vrcp.f32 %v3737_v19 }
0x1205   : > { %7861 = vrcp.f32 %v3734_v11 }
0x1207   : > { %v3381_v54 = vpop.permute.xlu1 %3380 }
0x1208   : > { %7108 = vmatpush3.bf16.msra.mxu1 %v3381_v54  ;;  %v7602_v54 = vld [vmem:[#allocation6 + $0x40] sm:$0xff]  }
0x1209   : > { %7119 = vmatprep.subr.bf16.mxu1 %v8108_v3  ;;  %v7856_v50 = vpop.eup %7855 }
0x120a   : > { %v7858_v33 = vpop.eup %7857  ;;  %v3620_v12 = vmul.f32 %v7856_v50, %v8961_v31 }
0x120b   : > { %7110 = vmatmul.mubr.msk.bf16.vlgmr.msra.gmra.mxu1 %vm979_vm1, %v3379_v57  ;;  %v3619_v18 = vmul.f32 %v7858_v33, %v8957_v30 }
0x120c   : > { %7120 = vmatpush3.bf16.msra.mxu1 %v3502_v24  ;;  %7121 = vmatprep.mubr.msk.bf16.mxu1 %vm8109_vm0, %v8108_v3 }
0x120d   : > { %7131 = vmatprep.subr.bf16.mxu1 %v8108_v3  ;;  %v3621_v55 = vpack.c.bf16 %v3620_v12, %v3619_v18 }
0x1211   : > { %v7860_v9 = vpop.eup %7859 }
0x1212   : > { %v7862_v16 = vpop.eup %7861  ;;  %v3741_v27 = vmul.f32 %v7860_v9, %v8969_v1 }
0x1213   : > { %7122 = vmatmul.mubr.msk.bf16.vlgmr.msra.gmra.mxu1 %vm979_vm1, %v3500_v62  ;;  %v3740_v28 = vmul.f32 %v7862_v16, %v8965_v51  ;;  %v7595_v51 = vld [vmem:[#allocation6 + $0x78] sm:$0xff]  }
0x1214   : > { %7132 = vmatpush3.bf16.msra.mxu1 %v3623_v17  ;;  %7133 = vmatprep.mubr.msk.bf16.mxu1 %vm8109_vm0, %v8108_v3 }
0x1215   : > { %7143 = vmatprep.subr.bf16.mxu1 %v8108_v3  ;;  %v3742_v4 = vpack.c.bf16 %v3741_v27, %v3740_v28  ;;  %7150 = vmatpush3.bf16.msra.mxu0 %v7595_v51 }
0x1216   : > { %7151 = vmatprep.subr.bf16.mxu0 %v8108_v3 }
0x1219   : > { %7152 = vmatpush3.bf16.msra.mxu0 %v7596_v53 }
0x121a   : > { %7153 = vmatprep.subr.bf16.mxu0 %v8108_v3 }
0x121b   : > { %7134 = vmatmul.mubr.msk.bf16.vlgmr.msra.gmra.mxu1 %vm979_vm1, %v3621_v55 }
0x121c   : > { %7144 = vmatpush3.bf16.msra.mxu1 %v3744_v40  ;;  %7145 = vmatprep.mubr.msk.bf16.mxu1 %vm8109_vm0, %v8108_v3 }
0x121d   : > { %7154 = vmatpush3.bf16.msra.mxu0 %v7597_v20 }
0x121e   : > { %7155 = vmatprep.subr.bf16.mxu0 %v8108_v3 }
0x1221   : > { %7156 = vmatpush3.bf16.msra.mxu0 %v7598_v13 }
0x1222   : > { %7157 = vmatprep.subr.bf16.mxu0 %v8108_v3 }
0x1223   : > { %7146 = vmatmul.mubr.msk.bf16.vlgmr.msra.gmra.mxu1 %vm979_vm1, %v3742_v4 }
0x1224   : > { %4157 = vmatprep.mubr.bf16.mxu1 %v8110_v35 }
0x1225   : > { %7158 = vmatpush3.bf16.msra.mxu0 %v7599_v63  ;;  %v6530_v63 = vld [vmem:[%s9477_s10 + $0x1] ss:$0 sm:$0xff] }
0x1226   : > { %7159 = vmatprep.subr.bf16.mxu0 %v8108_v3 }
0x1229   : > { %7160 = vmatpush3.bf16.msra.mxu0 %v7600_v10 }
0x122a   : > { %7161 = vmatprep.subr.bf16.mxu0 %v8108_v3 }
0x122d   : > { %7162 = vmatpush3.bf16.msra.mxu0 %v7601_v15 }
0x122e   : > { %7163 = vmatprep.subr.bf16.mxu0 %v8108_v3 }
0x1231   : > { %7164 = vmatpush3.bf16.msra.mxu0 %v7602_v54 }
0x1299   : > { %v3057_v30 = vpop.f32.mrf.mxu1 }
0x129b   : > { %v7075_v31 = vpop.f32.mrf.mxu1 }
0x129d   : > { %v3060_v42 = vpop.f32.mrf.mxu1 }
0x129e   : > { %v7413_v29 = vpack.i.bf16 %v3060_v42, %v3057_v30 }
0x129f   : > { %v7076_v32 = vpop.f32.mrf.mxu1 }
0x12a0   : > { %7414 = vrot.lane.b32.xlu1 %v7413_v29, %s8117_s23 }
0x12a1   : > { %v3178_v44 = vpop.f32.mrf.mxu1 }
0x12a3   : > { %v7087_v45 = vpop.f32.mrf.mxu1 }
0x12a5   : > { %v3181_v46 = vpop.f32.mrf.mxu1 }
0x12a6   : > { %v7418_v6 = vpack.i.bf16 %v3181_v46, %v3178_v44 }
0x12a7   : > { %v7088_v41 = vpop.f32.mrf.mxu1 }
0x12a8   : > { %7419 = vrot.lane.b32.xlu0 %v7418_v6, %s8116_s26 }
0x12bb   : > { %v3299_v1 = vpop.f32.mrf.mxu1 }
0x12bd   : > { %v7099_v38 = vpop.f32.mrf.mxu1 }
0x12bf   : > { %v3302_v36 = vpop.f32.mrf.mxu1 }
0x12c0   : > { %v7423_v21 = vpack.i.bf16 %v3302_v36, %v3299_v1 }
0x12c1   : > { %v7100_v25 = vpop.f32.mrf.mxu1 }
0x12c2   : > { %7424 = vrot.lane.b32.xlu1 %v7423_v21, %s8115_s22 }
0x12cb   : > { %v3420_v52 = vpop.f32.mrf.mxu1 }
0x12cd   : > { %v7111_v49 = vpop.f32.mrf.mxu1 }
0x12cf   : > { %v3423_v58 = vpop.f32.mrf.mxu1 }
0x12d0   : > { %v7428_v2 = vpack.i.bf16 %v3423_v58, %v3420_v52 }
0x12d1   : > { %v7112_v37 = vpop.f32.mrf.mxu1 }
0x12d2   : > { %7429 = vrot.lane.b32.xlu0 %v7428_v2, %s8114_s1 }
0x12d3   : > { %v3541_v5 = vpop.f32.mrf.mxu1 }
0x12d5   : > { %v7123_v60 = vpop.f32.mrf.mxu1 }
0x12d7   : > { %v3544_v11 = vpop.f32.mrf.mxu1 }
0x12d8   : > { %v7433_v14 = vpack.i.bf16 %v3544_v11, %v3541_v5 }
0x12d9   : > { %v7124_v19 = vpop.f32.mrf.mxu1 }
0x12da   : > { %7434 = vrot.lane.b32.xlu1 %v7433_v14, %s8113_s29 }
0x12db   : > { %v3662_v34 = vpop.f32.mrf.mxu1 }
0x12dd   : > { %v7135_v47 = vpop.f32.mrf.mxu1 }
0x12de   : > { %v7605_v47 = vld [vmem:[#allocation7 + $0xf4] ss:$8 sps:$4 sm:$0xff]  }
0x12df   : > { %v3665_v57 = vpop.f32.mrf.mxu1  ;;  %4125 = vmatprep.subr.bf16.mxu1 %v7605_v47  ;;  %v6543_v47 = vld [vmem:[%s9480_s13 + $0x2] sm:$0x3] }
0x12e0   : > { %v7438_v22 = vpack.i.bf16 %v3665_v57, %v3662_v34  ;;  %v7603_v34 = vld [vmem:[#allocation7 + $0xf0] ss:$8 sps:$4 sm:$0xff]  }
0x12e1   : > { %v7136_v24 = vpop.f32.mrf.mxu1  ;;  %4126 = vmatpush1.bf16.msra.mxu1 %v7603_v34  ;;  %v7642_v34 = vld [vmem:[#allocation9 + $0x80] sm:$0xff]  }
0x12e2   : > { %7439 = vrot.lane.b32.xlu0 %v7438_v22, %s8112_s0 }
0x12e3   : > { %v3783_v59 = vpop.f32.mrf.mxu1 }
0x12e5   : > { %v7147_v7 = vpop.f32.mrf.mxu1 }
0x12e7   : > { %v3786_v39 = vpop.f32.mrf.mxu1 }
0x12e8   : > { %v7443_v62 = vpack.i.bf16 %v3786_v39, %v3783_v59  ;;  %v7608_v39 = vld [vmem:[#allocation7 + $0xe4] ss:$8 sps:$4 sm:$0xff]  }
0x12e9   : > { %v7148_v50 = vpop.f32.mrf.mxu1  ;;  %4127 = vmatprep.subr.bf16.mxu1 %v7608_v39 }
0x12ea   : > { %7444 = vrot.lane.b32.xlu1 %v7443_v62, %s8111_s27  ;;  %v7606_v62 = vld [vmem:[#allocation7 + $0xe0] ss:$8 sps:$4 sm:$0xff]   ;;  %v7611_v50 = vld [vmem:[#allocation7 + $0xd4] ss:$8 sps:$4 sm:$0xff]  }
0x12eb   : > { %4128 = vmatpush1.bf16.msra.mxu1 %v7606_v62 }
0x12ec   : > { %4129 = vmatprep.subr.bf16.mxu1 %v7611_v50 }
0x1312   : > { %v7415_v17 = vpop.permute.xlu1 %7414 }
0x1313   : > { %v7417_v55 = vunpack.i.h.bf16 %v7415_v17  ;;  %v7416_v9 = vunpack.i.l.bf16 %v7415_v17  ;;  %v7609_v17 = vld [vmem:[#allocation7 + $0xd0] ss:$8 sps:$4 sm:$0xff]  }
0x1314   : > { %4130 = vmatpush1.bf16.msra.mxu1 %v7609_v17 }
0x1315   : > { %v3847_v29 = vsel %vm979_vm1, %v8838_v0, %v7417_v55  ;;  %v3846_v32 = vsel %vm979_vm1, %v8836_v56, %v7416_v9  ;;  %v7615_v55 = vld [vmem:[#allocation7 + $0xb0] ss:$8 sps:$4 sm:$0xff]   ;;  %v7620_v9 = vld [vmem:[#allocation7 + $0xa4] ss:$8 sps:$4 sm:$0xff]  }
0x131a   : > { %v7420_v33 = vpop.permute.xlu0 %7419 }
0x131b   : > { %v7422_v40 = vunpack.i.h.bf16 %v7420_v33  ;;  %v7421_v16 = vunpack.i.l.bf16 %v7420_v33  ;;  %v7612_v33 = vld [vmem:[#allocation7 + $0xc0] ss:$8 sps:$4 sm:$0xff]  }
0x131d   : > { %v3849_v46 = vsel %vm2002_vm2, %v3847_v29, %v7422_v40  ;;  %v3848_v6 = vsel %vm2002_vm2, %v3846_v32, %v7421_v16  ;;  %v7618_v40 = vld [vmem:[#allocation7 + $0xa0] ss:$8 sps:$4 sm:$0xff]   ;;  %v7623_v16 = vld [vmem:[#allocation7 + $0x94] ss:$8 sps:$4 sm:$0xff]  }
0x131e   : > { %v7630_v29 = vld [vmem:[#allocation9 + $0xb0] sm:$0xff]   ;;  %v7631_v32 = vld [vmem:[#allocation9 + $0xe8] sm:$0xff]  }
0x1334   : > { %v7425_v12 = vpop.permute.xlu1 %7424 }
0x1335   : > { %v7427_v28 = vunpack.i.h.bf16 %v7425_v12  ;;  %v7426_v4 = vunpack.i.l.bf16 %v7425_v12  ;;  %v7614_v12 = vld [vmem:[#allocation7 + $0xc4] ss:$8 sps:$4 sm:$0xff]  }
0x1336   : > { %4131 = vmatprep.subr.bf16.mxu1 %v7614_v12 }
0x1337   : > { %v3851_v1 = vsel %vm2005_vm3, %v3849_v46, %v7427_v28  ;;  %v3850_v38 = vsel %vm2005_vm3, %v3848_v6, %v7426_v4  ;;  %4132 = vmatpush1.bf16.msra.mxu1 %v7612_v33  ;;  %v7626_v28 = vld [vmem:[#allocation7 + $0x84] ss:$8 sps:$4 sm:$0xff]   ;;  %v7624_v4 = vld [vmem:[#allocation7 + $0x80] ss:$8 sps:$4 sm:$0xff]   ;;  %v7635_v6 = vld [vmem:[#allocation9 + $0xd8] sm:$0xff]  }
0x1338   : > { %v7634_v46 = vld [vmem:[#allocation9 + $0xa0] sm:$0xff]  }
0x1344   : > { %v7430_v18 = vpop.permute.xlu0 %7429 }
0x1345   : > { %v7432_v31 = vunpack.i.h.bf16 %v7430_v18  ;;  %v7431_v42 = vunpack.i.l.bf16 %v7430_v18  ;;  %v7617_v18 = vld [vmem:[#allocation7 + $0xb4] ss:$8 sps:$4 sm:$0xff]  }
0x1346   : > { %4133 = vmatprep.subr.bf16.mxu1 %v7617_v18 }
0x1347   : > { %v3853_v36 = vsel %vm2008_vm4, %v3851_v1, %v7432_v31  ;;  %v3852_v21 = vsel %vm2008_vm4, %v3850_v38, %v7431_v42  ;;  %4134 = vmatpush1.bf16.msra.mxu1 %v7615_v55  ;;  %v7628_v31 = vld [vmem:[#allocation9 + $0xb8] sm:$0xff]   ;;  %v7629_v42 = vld [vmem:[#allocation9 + $0xf0] sm:$0xff]  }
0x1348   : > { %4135 = vmatprep.subr.bf16.mxu1 %v7620_v9 }
0x134b   : > { %4136 = vmatpush1.bf16.msra.mxu1 %v7618_v40 }
0x134c   : > { %v7435_v27 = vpop.permute.xlu1 %7434  ;;  %4137 = vmatprep.subr.bf16.mxu1 %v7623_v16 }
0x134d   : > { %v7437_v44 = vunpack.i.h.bf16 %v7435_v27  ;;  %v7436_v45 = vunpack.i.l.bf16 %v7435_v27  ;;  %v7621_v27 = vld [vmem:[#allocation7 + $0x90] ss:$8 sps:$4 sm:$0xff]  }
0x134f   : > { %v3855_v25 = vsel %vm2011_vm5, %v3853_v36, %v7437_v44  ;;  %v3854_v56 = vsel %vm2011_vm5, %v3852_v21, %v7436_v45  ;;  %4138 = vmatpush1.bf16.msra.mxu1 %v7621_v27  ;;  %v7632_v44 = vld [vmem:[#allocation9 + $0xa8] sm:$0xff]   ;;  %v7633_v45 = vld [vmem:[#allocation9 + $0xe0] sm:$0xff]  }
0x1350   : > { %4139 = vmatprep.subr.bf16.mxu1 %v7626_v28 }
0x1353   : > { %4140 = vmatpush1.bf16.msra.mxu1 %v7624_v4  ;;  %v6561_v4 = vld [vmem:[%s9482_s15 + $0x1] ss:$0 sm:$0xff] }
0x1354   : > { %v7440_v30 = vpop.permute.xlu0 %7439 }
0x1355   : > { %v7442_v41 = vunpack.i.h.bf16 %v7440_v30  ;;  %v7441_v51 = vunpack.i.l.bf16 %v7440_v30  ;;  %v7627_v30 = vld [vmem:[#allocation9 + $0xf8] sm:$0xff]  }
0x1356   : > { %6803 = vmatprep.subr.bf16.mxu0 %v7627_v30 }
0x1357   : > { %v3857_v52 = vsel %vm2014_vm6, %v3855_v25, %v7442_v41  ;;  %v3856_v49 = vsel %vm2014_vm6, %v3854_v56, %v7441_v51  ;;  %v6541_v56 = vld [vmem:[%s9478_s11 + $0x2] ss:$0 sm:$0xff] }
0x135c   : > { %v7445_v0 = vpop.permute.xlu1 %7444 }
0x135d   : > { %v7447_v53 = vunpack.i.h.bf16 %v7445_v0  ;;  %v7446_v20 = vunpack.i.l.bf16 %v7445_v0 }
0x135f   : > { %v3859_v13 = vsel %vm2017_vm7, %v3857_v52, %v7447_v53  ;;  %v3858_v58 = vsel %vm2017_vm7, %v3856_v49, %v7446_v20  ;;  %v6542_v49 = vld [vmem:[%s9478_s11 + $0x3] ss:$0 sm:$0xff] }
0x1360   : > { %v3860_v2 = vpack.c.bf16 %v3859_v13, %v3858_v58 }
0x1362   : > { %7166 = vmatmul.mubr.bf16.vlgmr.msra.gmra.mxu0 %v3860_v2 }
0x1363   : > { %6804 = vmatpush3.bf16.msra.mxu0 %v7628_v31 }
0x1364   : > { %6805 = vmatprep.subr.bf16.mxu0 %v7629_v42 }
0x1367   : > { %6806 = vmatpush3.bf16.msra.mxu0 %v7630_v29 }
0x1368   : > { %6807 = vmatprep.subr.bf16.mxu0 %v7631_v32 }
0x136b   : > { %6808 = vmatpush3.bf16.msra.mxu0 %v7632_v44 }
0x136c   : > { %6809 = vmatprep.subr.bf16.mxu0 %v7633_v45 }
0x136f   : > { %6810 = vmatpush3.bf16.msra.mxu0 %v7634_v46 }
0x1370   : > { %6811 = vmatprep.subr.bf16.mxu0 %v7635_v6 }
0x1422   : > { %v3968_v37 = vpop.f32.mrf.mxu0 }
0x1423   : > { %v3969_v5 = vadd.f32 %v6530_v63, %v3968_v37  ;;  %v7636_v37 = vld [vmem:[#allocation9 + $0x98] sm:$0xff]  }
0x1424   : > { %v7167_v60 = vpop.f32.mrf.mxu0  ;;  %6812 = vmatpush3.bf16.msra.mxu0 %v7636_v37  ;;  %v7656_v37 = vld [vmem:[#allocation2 + $0x140] ss:$8 sps:$4 sm:$0xff]  }
0x1425   : > { %v9056_v10 = vadd.f32 %v3969_v5, %v8721_v48  ;;  %v7637_v5 = vld [vmem:[#allocation9 + $0xd0] sm:$0xff]  }
0x1426   : > { %v3971_v11 = vpop.f32.mrf.mxu0  ;;  %v7638_v60 = vld [vmem:[#allocation9 + $0x90] sm:$0xff]   ;;  %6813 = vmatprep.subr.bf16.mxu0 %v7637_v5 }
0x1427   : > { %v3972_v14 = vadd.f32 %v6530_v63, %v3971_v11  ;;  %3980 = vadd.xlane.f32.xlu0 %v9056_v10  ;;  %v7639_v11 = vld [vmem:[#allocation9 + $0xc8] sm:$0xff]   ;;  %v7662_v5 = vld [vmem:[#allocation2 + $0x134] ss:$8 sps:$4 sm:$0xff]  }
0x1428   : > { %v7168_v15 = vpop.f32.mrf.mxu0  ;;  %6814 = vmatpush3.bf16.msra.mxu0 %v7638_v60  ;;  %v7659_v60 = vld [vmem:[#allocation4 + $0x98] sm:$0xff]  }
0x1429   : > { %v9060_v19 = vadd.f32 %v3972_v14, %v8725_v43  ;;  %v7640_v14 = vld [vmem:[#allocation9 + $0x88] sm:$0xff]   ;;  %6815 = vmatprep.subr.bf16.mxu0 %v7639_v11  ;;  %v7641_v15 = vld [vmem:[#allocation9 + $0xc0] sm:$0xff]   ;;  %v7660_v11 = vld [vmem:[#allocation2 + $0x130] ss:$8 sps:$4 sm:$0xff]  }
0x142b   : > { %3982 = vadd.xlane.f32.xlu1 %v9060_v19 }
0x142c   : > { %6816 = vmatpush3.bf16.msra.mxu0 %v7640_v14  ;;  %v7666_v14 = vld [vmem:[#allocation2 + $0x124] ss:$8 sps:$4 sm:$0xff]  }
0x142d   : > { %6817 = vmatprep.subr.bf16.mxu0 %v7641_v15  ;;  %v7663_v15 = vld [vmem:[#allocation4 + $0x90] sm:$0xff]  }
0x1430   : > { %6818 = vmatpush3.bf16.msra.mxu0 %v7642_v34  ;;  %v7664_v34 = vld [vmem:[#allocation2 + $0x120] ss:$8 sps:$4 sm:$0xff]  }
0x1431   : > { %7169 = vmatprep.subr.bf16.mxu0 %v8108_v3 }
0x14b0   : > { %v3981_v54 = vpop.xlane.xlu0 %3980 }
0x14b1   : > { %v3984_v57 = vmul.f32 0.0078125, %v3981_v54  ;;  %v4042_v54 = vrot.slane %v6543_v47, %v8365_v61 }
0x14b3   : > { %v9064_v22 = vsub.f32 %v9056_v10, %v3984_v57  ;;  %v4038_v57 = vrot.slane %v6543_v47, %v8371_v8  ;;  %v7670_v47 = vld [vmem:[#allocation2 + $0x114] ss:$8 sps:$4 sm:$0xff]  }
0x14b4   : > { %v3983_v48 = vpop.xlane.xlu1 %3982 }
0x14b5   : > { %v3985_v24 = vmul.f32 0.0078125, %v3983_v48  ;;  %v3988_v59 = vmul.f32 %v9064_v22, %v9064_v22 }
0x14b7   : > { %v3987_v7 = vsub.f32 %v9060_v19, %v3985_v24  ;;  %3990 = vadd.xlane.f32.xlu0 %v3988_v59 }
0x14b9   : > { %v3989_v43 = vmul.f32 %v3987_v7, %v3987_v7 }
0x14bb   : > { %3992 = vadd.xlane.f32.xlu0 %v3989_v43 }
0x1540   : > { %v3991_v41 = vpop.xlane.xlu0 %3990 }
0x1541   : > { %v3994_v51 = vmul.f32 0.0078125, %v3991_v41  ;;  %v7643_v41 = vld [vmem:[#allocation4 + $0xb8] sm:$0xff]  }
0x1543   : > { %v3996_v1 = vadd.f32 1e-05, %v3994_v51 }
0x1544   : > { %v3993_v38 = vpop.xlane.xlu0 %3992 }
0x1545   : > { %7863 = vrsqrt.f32 %v3996_v1  ;;  %v3995_v36 = vmul.f32 0.0078125, %v3993_v38 }
0x1547   : > { %v3997_v21 = vadd.f32 1e-05, %v3995_v36 }
0x1549   : > { %7865 = vrsqrt.f32 %v3997_v21 }
0x1552   : > { %v7864_v0 = vpop.eup %7863 }
0x1553   : > { %v4000_v25 = vmul.f32 %v7864_v0, %v9064_v22 }
0x1555   : > { %v4006_v52 = vmul.f32 %v6541_v56, %v4000_v25  ;;  %v7646_v25 = vld [vmem:[#allocation2 + $0x174] ss:$8 sps:$4 sm:$0xff]  }
0x1556   : > { %v7866_v53 = vpop.eup %7865  ;;  %4512 = vmatprep.subr.bf16.mxu1 %v7646_v25 }
0x1557   : > { %v4001_v20 = vmul.f32 %v7866_v53, %v3987_v7  ;;  %v4012_v58 = vadd.f32 %v6542_v49, %v4006_v52  ;;  %v7647_v53 = vld [vmem:[#allocation4 + $0xb0] sm:$0xff]   ;;  %v7648_v52 = vld [vmem:[#allocation2 + $0x160] ss:$8 sps:$4 sm:$0xff]  }
0x1559   : > { %v4007_v13 = vmul.f32 %v6541_v56, %v4001_v20  ;;  %v7644_v56 = vld [vmem:[#allocation2 + $0x170] ss:$8 sps:$4 sm:$0xff]   ;;  %v7650_v20 = vld [vmem:[#allocation2 + $0x164] ss:$8 sps:$4 sm:$0xff]  }
0x155b   : > { %v4013_v2 = vadd.f32 %v6542_v49, %v4007_v13  ;;  %v7651_v49 = vld [vmem:[#allocation4 + $0xa8] sm:$0xff]   ;;  %v7654_v13 = vld [vmem:[#allocation2 + $0x154] ss:$8 sps:$4 sm:$0xff]  }
0x155d   : > { %v4014_v63 = vpack.c.bf16 %v4013_v2, %v4012_v58  ;;  %v7652_v58 = vld [vmem:[#allocation2 + $0x150] ss:$8 sps:$4 sm:$0xff]   ;;  %v7655_v2 = vld [vmem:[#allocation4 + $0xa0] sm:$0xff]  }
0x155f   : > { %4158 = vmatmul.mubr.bf16.vlgmr.msra.gmra.mxu1 %v4014_v63  ;;  %v7658_v63 = vld [vmem:[#allocation2 + $0x144] ss:$8 sps:$4 sm:$0xff]  }
0x1560   : > { %4544 = vmatprep.mubr.bf16.mxu1 %v8110_v35  ;;  %4513 = vmatpush1.bf16.msra.mxu1 %v7644_v56 }
0x1561   : > { %4514 = vmatprep.subr.bf16.mxu1 %v7650_v20 }
0x1564   : > { %4515 = vmatpush1.bf16.msra.mxu1 %v7648_v52  ;;  %v6600_v52 = vld [vmem:[%s9475_s8 + $0x2] ss:$0 sm:$0xff] }
0x1565   : > { %4516 = vmatprep.subr.bf16.mxu1 %v7654_v13 }
0x1568   : > { %4517 = vmatpush1.bf16.msra.mxu1 %v7652_v58 }
0x1569   : > { %4518 = vmatprep.subr.bf16.mxu1 %v7658_v63 }
0x156c   : > { %4519 = vmatpush1.bf16.msra.mxu1 %v7656_v37 }
0x156d   : > { %4520 = vmatprep.subr.bf16.mxu1 %v7662_v5 }
0x1570   : > { %4521 = vmatpush1.bf16.msra.mxu1 %v7660_v11 }
0x1571   : > { %4522 = vmatprep.subr.bf16.mxu1 %v7666_v14 }
0x1574   : > { %4523 = vmatpush1.bf16.msra.mxu1 %v7664_v34 }
0x1575   : > { %4524 = vmatprep.subr.bf16.mxu1 %v7670_v47 }
0x161f   : > { %v4159_v22 = vpop.f32.mrf.mxu1 }
0x1620   : > { %v4160_v59 = vadd.f32 %v4159_v22, %v4038_v57  ;;  %v7674_v22 = vld [vmem:[#allocation2 + $0x104] ss:$8 sps:$4 sm:$0xff]  }
0x1621   : > { %v4161_v48 = vpop.f32.mrf.mxu1 }
0x1622   : > { %v4162_v24 = vadd.f32 %v4161_v48, %v4042_v54  ;;  %v4172_v33 = vmul.f32 0.01, %v4160_v59  ;;  %vm4168_vm14 = vcmp.ge.f32.partialorder %v4160_v59, 0.0  ;;  %v7671_v48 = vld [vmem:[#allocation4 + $0x80] sm:$0xff]  }
0x1623   : > { %v4163_v7 = vpop.f32.mrf.mxu1 }
0x1624   : > { %v4164_v43 = vadd.f32 %v4163_v7, %v4038_v57  ;;  %v4173_v62 = vmul.f32 0.01, %v4162_v24  ;;  %vm4169_vm13 = vcmp.ge.f32.partialorder %v4162_v24, 0.0  ;;  %v4176_v40 = vsel %vm4168_vm14, %v4160_v59, %v4172_v33  ;;  %v7668_v57 = vld [vmem:[#allocation2 + $0x110] ss:$8 sps:$4 sm:$0xff]  }
0x1625   : > { %v4165_v39 = vpop.f32.mrf.mxu1  ;;  %4525 = vmatpush1.bf16.msra.mxu1 %v7668_v57  ;;  %v6580_v33 = vld [vmem:[%s9471_s4 + $0x4] ss:$0 sm:$0xff] }
0x1626   : > { %vm4170_vm12 = vcmp.ge.f32.partialorder %v4164_v43, 0.0  ;;  %v4174_v50 = vmul.f32 0.01, %v4164_v43  ;;  %v4166_v17 = vadd.f32 %v4165_v39, %v4042_v54  ;;  %v4177_v55 = vsel %vm4169_vm13, %v4162_v24, %v4173_v62  ;;  %v7667_v54 = vld [vmem:[#allocation4 + $0x88] sm:$0xff]   ;;  %4526 = vmatprep.subr.bf16.mxu1 %v7674_v22 }
0x1627   : > { %v7672_v24 = vld [vmem:[#allocation2 + $0x100] ss:$8 sps:$4 sm:$0xff]  }
0x1628   : > { %vm4171_vm15 = vcmp.ge.f32.partialorder %v4166_v17, 0.0  ;;  %v4175_v12 = vmul.f32 0.01, %v4166_v17  ;;  %v4178_v18 = vsel %vm4170_vm12, %v4164_v43, %v4174_v50 }
0x1629   : > { %v4180_v27 = vpack.c.bf16 %v4178_v18, %v4176_v40  ;;  %4527 = vmatpush1.bf16.msra.mxu1 %v7672_v24 }
0x162a   : > { %v4179_v9 = vsel %vm4171_vm15, %v4166_v17, %v4175_v12  ;;  %7189 = vmatprep.subr.bf16.mxu1 %v8108_v3 }
0x162b   : > { %v4181_v16 = vpack.c.bf16 %v4179_v9, %v4177_v55  ;;  %v6581_v9 = vld [vmem:[%s9471_s4 + $0x5] ss:$0 sm:$0xff] }
0x162d   : > { %4351 = vmatprep.mubr.bf16.mxu0 %v4181_v16 }
0x162e   : > { %4352 = vmatmul.mubr.bf16.vlgmr.msra.gmra.mxu0 %v4180_v27 }
0x162f   : > { %7185 = vmatprep.mubr.msk.bf16.mxu0 %vm8109_vm0, %v8108_v3  ;;  %7170 = vmatpush3.bf16.msra.mxu0 %v7643_v41 }
0x1630   : > { %7171 = vmatprep.subr.bf16.mxu0 %v8108_v3 }
0x1633   : > { %7172 = vmatpush3.bf16.msra.mxu0 %v7647_v53 }
0x1634   : > { %7173 = vmatprep.subr.bf16.mxu0 %v8108_v3 }
0x1637   : > { %7174 = vmatpush3.bf16.msra.mxu0 %v7651_v49 }
0x1638   : > { %7175 = vmatprep.subr.bf16.mxu0 %v8108_v3 }
0x163b   : > { %7176 = vmatpush3.bf16.msra.mxu0 %v7655_v2 }
0x163c   : > { %7177 = vmatprep.subr.bf16.mxu0 %v8108_v3 }
0x163f   : > { %7178 = vmatpush3.bf16.msra.mxu0 %v7659_v60 }
0x1640   : > { %7179 = vmatprep.subr.bf16.mxu0 %v8108_v3 }
0x1643   : > { %7180 = vmatpush3.bf16.msra.mxu0 %v7663_v15 }
0x1644   : > { %7181 = vmatprep.subr.bf16.mxu0 %v8108_v3 }
0x1647   : > { %7182 = vmatpush3.bf16.msra.mxu0 %v7667_v54 }
0x1648   : > { %7183 = vmatprep.subr.bf16.mxu0 %v8108_v3 }
0x164b   : > { %7184 = vmatpush3.bf16.msra.mxu0 %v7671_v48 }
0x164c   : > { %7213 = vmatprep.subr.bf16.mxu0 %v8108_v3 }
0x16ee   : > { %v6819_v28 = vpop.f32.mrf.mxu0 }
0x16f0   : > { %v6820_v30 = vpop.f32.mrf.mxu0 }
0x16f1   : > { %v6821_v31 = vadd.f32 %v6820_v30, %v6819_v28  ;;  %v7947_v30 = vld [vmem:[%s8356_s7] sm:$0xff] }
0x16f2   : > { %v6822_v42 = vpop.f32.mrf.mxu0 }
0x16f3   : > { %v4354_v29 = vadd.f32 %v6821_v31, %v6561_v4 }
0x16f4   : > { %v6823_v32 = vpop.f32.mrf.mxu0 }
0x16f5   : > { %v6824_v44 = vadd.f32 %v6823_v32, %v6822_v42  ;;  %v9089_v45 = vadd.f32 %v4354_v29, %v9056_v10  ;;  %v7948_v42 = vld [vmem:[%s8356_s7 + $0x8] sm:$0xff] }
0x16f7   : > { %v4357_v46 = vadd.f32 %v6824_v44, %v6561_v4  ;;  %4365 = vadd.xlane.f32.xlu0 %v9089_v45 }
0x16f9   : > { %v9093_v6 = vadd.f32 %v4357_v46, %v9060_v19 }
0x16fb   : > { %4367 = vadd.xlane.f32.xlu1 %v9093_v6 }
0x1780   : > { %v4366_v51 = vpop.xlane.xlu0 %4365 }
0x1781   : > { %v4369_v1 = vmul.f32 0.0078125, %v4366_v51  ;;  %v6582_v51 = vld [vmem:[%s9473_s6 + $0x4] sm:$0x3] }
0x1782   : > { %v4425_v53 = vrot.slane %v6582_v51, %v8371_v8 }
0x1783   : > { %v9098_v38 = vsub.f32 %v9089_v45, %v4369_v1 }
0x1784   : > { %v4368_v36 = vpop.xlane.xlu1 %4367 }
0x1785   : > { %v4370_v10 = vmul.f32 0.0078125, %v4368_v36  ;;  %v4373_v21 = vmul.f32 %v9098_v38, %v9098_v38  ;;  %v4429_v36 = vrot.slane %v6582_v51, %v8365_v61 }
0x1787   : > { %v9103_v0 = vsub.f32 %v9093_v6, %v4370_v10  ;;  %4375 = vadd.xlane.f32.xlu0 %v4373_v21 }
0x1789   : > { %v4374_v19 = vmul.f32 %v9103_v0, %v9103_v0 }
0x178b   : > { %4377 = vadd.xlane.f32.xlu1 %v4374_v19 }
0x1810   : > { %v4376_v59 = vpop.xlane.xlu0 %4375 }
0x1811   : > { %v4379_v7 = vmul.f32 0.0078125, %v4376_v59 }
0x1813   : > { %v4381_v43 = vadd.f32 1e-05, %v4379_v7 }
0x1814   : > { %v4378_v39 = vpop.xlane.xlu1 %4377 }
0x1815   : > { %7867 = vrsqrt.f32 %v4381_v43  ;;  %v4380_v62 = vmul.f32 0.0078125, %v4378_v39 }
0x1817   : > { %v4382_v50 = vadd.f32 1e-05, %v4380_v62 }
0x1819   : > { %7869 = vrsqrt.f32 %v4382_v50 }
0x1822   : > { %v7868_v17 = vpop.eup %7867 }
0x1823   : > { %v4385_v12 = vmul.f32 %v7868_v17, %v9098_v38 }
0x1825   : > { %v4391_v18 = vmul.f32 %v6580_v33, %v4385_v12 }
0x1826   : > { %v7870_v55 = vpop.eup %7869 }
0x1827   : > { %v4386_v40 = vmul.f32 %v7870_v55, %v9103_v0  ;;  %v4397_v27 = vadd.f32 %v6581_v9, %v4391_v18 }
0x1829   : > { %v4392_v16 = vmul.f32 %v6580_v33, %v4386_v40  ;;  %v4399_v31 = vadd.f32 %v7947_v30, %v4397_v27 }
0x182b   : > { %v4398_v28 = vadd.f32 %v6581_v9, %v4392_v16 }
0x182d   : > { %v4557_v4 = vpack.c.bf16 %v4398_v28, %v4397_v27  ;;  %v4400_v29 = vadd.f32 %v7948_v42, %v4398_v28 }
0x182f   : > { %7186 = vmatmul.mubr.bf16.vlgmr.msra.gmra.mxu0 %v4557_v4  ;;  %v4401_v32 = vpack.c.bf16 %v4400_v29, %v4399_v31 }
0x1830   : > { %7215 = vmatprep.mubr.msk.bf16.mxu0 %vm8109_vm0, %v8108_v3 }
0x1831   : > { %4545 = vmatmul.mubr.bf16.vlgmr.msra.gmra.mxu1 %v4401_v32 }
0x1832   : > { %7191 = vmatprep.mubr.msk.bf16.mxu1 %vm8109_vm0, %v8108_v3 }
0x18ef   : > { %v4665_v44 = vpop.f32.mrf.mxu0 }
0x18f0   : > { %v4666_v2 = vadd.f32 %v6600_v52, %v4665_v44 }
0x18f1   : > { %v4546_v46 = vpop.f32.mrf.mxu1  ;;  %v7187_v41 = vpop.f32.mrf.mxu0 }
0x18f2   : > { %v4547_v58 = vadd.f32 %v4546_v46, %v4425_v53 }
0x18f3   : > { %v4548_v1 = vpop.f32.mrf.mxu1  ;;  %v4668_v38 = vpop.f32.mrf.mxu0 }
0x18f4   : > { %v4549_v19 = vadd.f32 %v4548_v1, %v4429_v36  ;;  %v4669_v13 = vadd.f32 %v6600_v52, %v4668_v38 }
0x18f5   : > { %v4550_v10 = vpop.f32.mrf.mxu1  ;;  %v7188_v21 = vpop.f32.mrf.mxu0 }
0x18f6   : > { %v4551_v49 = vadd.f32 %v4550_v10, %v4425_v53  ;;  %v9139_v37 = vpack.c.bf16 %v4669_v13, %v4666_v2 }
0x18f7   : > { %v4552_v0 = vpop.f32.mrf.mxu1 }
0x18f8   : > { %v4553_v25 = vadd.f32 %v4552_v0, %v4429_v36  ;;  %v4555_v63 = vpack.c.bf16 %v4551_v49, %v4547_v58 }
0x18fa   : > { %v4556_v56 = vpack.c.bf16 %v4553_v25, %v4549_v19 }
0x18fc   : > { %v4677_v20 = vsel %vm979_vm1, %v4556_v56, 0 }
0x18fd   : > { %7190 = vmatpush3.bf16.xpose.msra.mxu1 %v4677_v20 }
0x18fe   : > { %7195 = vmatprep.subr.bf16.mxu1 %v8108_v3 }
0x1904   : > { %7192 = vmatmul.mubr.msk.bf16.vlgmr.msra.gmra.mxu1 %vm979_vm1, %v4555_v63 }
0x1905   : > { %7196 = vmatpush3.bf16.msra.mxu1 %v9139_v37  ;;  %7197 = vmatprep.mubr.msk.bf16.mxu1 %vm8109_vm0, %v8108_v3 }
0x1906   : > { %7201 = vmatprep.subr.bf16.mxu1 %v8108_v3 }
0x19c4   : > { %v4713_v5 = vpop.f32.mrf.mxu1 }
0x19c5   : > { %v4714_v60 = vadd.f32 %v4713_v5, %v8396_v23 }
0x19c6   : > { %v7193_v11 = vpop.f32.mrf.mxu1 }
0x19c7   : > { %v4720_v14 = vsel %vm979_vm1, %v4714_v60, -inf }
0x19c8   : > { %4721 = vmax.xlane.f32.xlu0 %v4720_v14  ;;  %v4716_v15 = vpop.f32.mrf.mxu1 }
0x19c9   : > { %v4717_v34 = vadd.f32 %v4716_v15, %v8401_v26 }
0x19ca   : > { %v7194_v47 = vpop.f32.mrf.mxu1 }
0x19cb   : > { %v4723_v54 = vsel %vm979_vm1, %v4717_v34, -inf }
0x19cc   : > { %4724 = vmax.xlane.f32.xlu1 %v4723_v54 }
0x1a51   : > { %v4722_v57 = vpop.xlane.xlu0 %4721 }
0x1a52   : > { %v4726_v22 = vsub.f32 %v4714_v60, %v4722_v57 }
0x1a54   : > { %v4728_v48 = vmul.f32 1.442695, %v4726_v22 }
0x1a55   : > { %v4725_v24 = vpop.xlane.xlu1 %4724 }
0x1a56   : > { %7871 = vpow2.f32 %v4728_v48  ;;  %v4727_v59 = vsub.f32 %v4717_v34, %v4725_v24 }
0x1a58   : > { %v4730_v7 = vmul.f32 1.442695, %v4727_v59 }
0x1a5a   : > { %7873 = vpow2.f32 %v4730_v7 }
0x1a63   : > { %v7872_v43 = vpop.eup %7871 }
0x1a64   : > { %v4732_v39 = vsel %vm979_vm1, %v7872_v43, 0.0 }
0x1a65   : > { %4733 = vadd.xlane.f32.xlu0 %v4732_v39 }
0x1a67   : > { %v7874_v62 = vpop.eup %7873 }
0x1a68   : > { %v4735_v50 = vsel %vm979_vm1, %v7874_v62, 0.0 }
0x1a69   : > { %4736 = vadd.xlane.f32.xlu1 %v4735_v50 }
0x1a7a   : > { %4788 = vrot.lane.b32.xlu1 %v4555_v63, %s8111_s27 }
0x1a7b   : > { %4791 = vrot.lane.b32.xlu0 %v4556_v56, %s8111_s27 }
0x1a7e   : > { %4913 = vrot.lane.b32.xlu1 %v4556_v56, %s8112_s0 }
0x1a7f   : > { %5034 = vrot.lane.b32.xlu0 %v4556_v56, %s8113_s29 }
0x1a82   : > { %4911 = vrot.lane.b32.xlu1 %v4555_v63, %s8112_s0 }
0x1a83   : > { %5155 = vrot.lane.b32.xlu0 %v4556_v56, %s8114_s1 }
0x1a86   : > { %5032 = vrot.lane.b32.xlu1 %v4555_v63, %s8113_s29 }
0x1a87   : > { %5276 = vrot.lane.b32.xlu0 %v4556_v56, %s8115_s22 }
0x1a8a   : > { %5153 = vrot.lane.b32.xlu1 %v4555_v63, %s8114_s1 }
0x1a8b   : > { %5397 = vrot.lane.b32.xlu0 %v4556_v56, %s8116_s26 }
0x1a8e   : > { %5274 = vrot.lane.b32.xlu1 %v4555_v63, %s8115_s22 }
0x1a8f   : > { %5518 = vrot.lane.b32.xlu0 %v4556_v56, %s8117_s23 }
0x1a92   : > { %5395 = vrot.lane.b32.xlu1 %v4555_v63, %s8116_s26 }
0x1a96   : > { %5516 = vrot.lane.b32.xlu1 %v4555_v63, %s8117_s23 }
0x1aee   : > { %v4734_v17 = vpop.xlane.xlu0 %4733 }
0x1aef   : > { %7875 = vrcp.f32 %v4734_v17 }
0x1af2   : > { %v4737_v33 = vpop.xlane.xlu1 %4736  ;;  %v4792_v18 = vpop.permute.xlu0 %4791 }
0x1af3   : > { %7877 = vrcp.f32 %v4737_v33  ;;  %v4797_v29 = vsel %vm979_vm1, %v4792_v18, 0 }
0x1af6   : > { %v4789_v12 = vpop.permute.xlu1 %4788  ;;  %v5035_v27 = vpop.permute.xlu0 %5034 }
0x1af7   : > { %v5040_v31 = vsel %vm979_vm1, %v5035_v27, 0 }
0x1afa   : > { %v4914_v55 = vpop.permute.xlu1 %4913  ;;  %v5156_v32 = vpop.permute.xlu0 %5155 }
0x1afb   : > { %v4919_v9 = vsel %vm979_vm1, %v4914_v55, 0  ;;  %v5161_v46 = vsel %vm979_vm1, %v5156_v32, 0 }
0x1afc   : > { %7214 = vmatpush3.bf16.xpose.msra.mxu0 %v4919_v9  ;;  %v7876_v40 = vpop.eup %7875 }
0x1afd   : > { %7225 = vmatprep.subr.bf16.mxu0 %v8108_v3  ;;  %v4740_v28 = vmul.f32 %v7876_v40, %v7872_v43 }
0x1afe   : > { %v4912_v30 = vpop.permute.xlu1 %4911  ;;  %v5277_v41 = vpop.permute.xlu0 %5276 }
0x1aff   : > { %v5282_v1 = vsel %vm979_vm1, %v5277_v41, 0 }
0x1b00   : > { %v7878_v16 = vpop.eup %7877 }
0x1b01   : > { %v4741_v4 = vmul.f32 %v7878_v16, %v7874_v62 }
0x1b02   : > { %v5033_v44 = vpop.permute.xlu1 %5032  ;;  %v5398_v38 = vpop.permute.xlu0 %5397 }
0x1b03   : > { %7216 = vmatmul.mubr.msk.bf16.vlgmr.msra.gmra.mxu0 %vm979_vm1, %v4912_v30  ;;  %v4742_v42 = vpack.c.bf16 %v4741_v4, %v4740_v28  ;;  %v5403_v10 = vsel %vm979_vm1, %v5398_v38, 0 }
0x1b04   : > { %7226 = vmatpush3.bf16.xpose.msra.mxu0 %v5040_v31  ;;  %7227 = vmatprep.mubr.msk.bf16.mxu0 %vm8109_vm0, %v8108_v3 }
0x1b05   : > { %7198 = vmatmul.mubr.msk.bf16.vlgmr.msra.gmra.mxu1 %vm979_vm1, %v4742_v42  ;;  %7237 = vmatprep.subr.bf16.mxu0 %v8108_v3 }
0x1b06   : > { %7202 = vmatpush3.bf16.xpose.msra.mxu1 %v4797_v29  ;;  %7203 = vmatprep.mubr.msk.bf16.mxu1 %vm8109_vm0, %v8108_v3  ;;  %v5154_v51 = vpop.permute.xlu1 %5153  ;;  %v5519_v21 = vpop.permute.xlu0 %5518 }
0x1b07   : > { %7207 = vmatprep.subr.bf16.mxu1 %v8108_v3  ;;  %v5524_v19 = vsel %vm979_vm1, %v5519_v21, 0 }
0x1b0a   : > { %v5275_v36 = vpop.permute.xlu1 %5274 }
0x1b0b   : > { %7228 = vmatmul.mubr.msk.bf16.vlgmr.msra.gmra.mxu0 %vm979_vm1, %v5033_v44 }
0x1b0c   : > { %7238 = vmatpush3.bf16.xpose.msra.mxu0 %v5161_v46  ;;  %7239 = vmatprep.mubr.msk.bf16.mxu0 %vm8109_vm0, %v8108_v3 }
0x1b0d   : > { %7204 = vmatmul.mubr.msk.bf16.vlgmr.msra.gmra.mxu1 %vm979_vm1, %v4789_v12  ;;  %7249 = vmatprep.subr.bf16.mxu0 %v8108_v3 }
0x1b0e   : > { %7209 = vmatprep.mubr.msk.bf16.mxu1 %vm8109_vm0, %v8108_v3  ;;  %v5396_v0 = vpop.permute.xlu1 %5395 }
0x1b12   : > { %v5517_v25 = vpop.permute.xlu1 %5516 }
0x1b13   : > { %7240 = vmatmul.mubr.msk.bf16.vlgmr.msra.gmra.mxu0 %vm979_vm1, %v5154_v51 }
0x1b14   : > { %7250 = vmatpush3.bf16.xpose.msra.mxu0 %v5282_v1  ;;  %7251 = vmatprep.mubr.msk.bf16.mxu0 %vm8109_vm0, %v8108_v3 }
0x1b15   : > { %7261 = vmatprep.subr.bf16.mxu0 %v8108_v3 }
0x1b1b   : > { %7252 = vmatmul.mubr.msk.bf16.vlgmr.msra.gmra.mxu0 %vm979_vm1, %v5275_v36 }
0x1b1c   : > { %7262 = vmatpush3.bf16.xpose.msra.mxu0 %v5403_v10  ;;  %7263 = vmatprep.mubr.msk.bf16.mxu0 %vm8109_vm0, %v8108_v3 }
0x1b1d   : > { %7273 = vmatprep.subr.bf16.mxu0 %v8108_v3 }
0x1b23   : > { %7264 = vmatmul.mubr.msk.bf16.vlgmr.msra.gmra.mxu0 %vm979_vm1, %v5396_v0 }
0x1b24   : > { %7274 = vmatpush3.bf16.xpose.msra.mxu0 %v5524_v19  ;;  %7275 = vmatprep.mubr.msk.bf16.mxu0 %vm8109_vm0, %v8108_v3 }
0x1b25   : > { %7285 = vmatprep.subr.bf16.mxu0 %v8108_v3 }
0x1b2b   : > { %7276 = vmatmul.mubr.msk.bf16.vlgmr.msra.gmra.mxu0 %vm979_vm1, %v5517_v25 }
0x1b2c   : > { %7301 = vmatprep.mubr.msk.bf16.mxu0 %vm8109_vm0, %v8108_v3 }
0x1bc3   : > { %v4955_v56 = vpop.f32.mrf.mxu0 }
0x1bc4   : > { %v9212_v34 = vadd.f32 %v4955_v56, %v8396_v23 }
0x1bc5   : > { %v9204_v53 = vpop.f32.mrf.mxu1  ;;  %v7217_v20 = vpop.f32.mrf.mxu0 }
0x1bc6   : > { %v4962_v43 = vsel %vm979_vm1, %v9212_v34, -inf }
0x1bc7   : > { %v7199_v52 = vpop.f32.mrf.mxu1  ;;  %v4958_v49 = vpop.f32.mrf.mxu0 }
0x1bc8   : > { %v4959_v59 = vadd.f32 %v4958_v49, %v8401_v26 }
0x1bc9   : > { %v9206_v13 = vpop.f32.mrf.mxu1  ;;  %v7218_v58 = vpop.f32.mrf.mxu0 }
0x1bca   : > { %v4965_v12 = vsel %vm979_vm1, %v4959_v59, -inf }
0x1bcb   : > { %v7200_v2 = vpop.f32.mrf.mxu1  ;;  %v5076_v63 = vpop.f32.mrf.mxu0 }
0x1bcc   : > { %v9226_v17 = vadd.f32 %v5076_v63, %v8396_v23 }
0x1bcd   : > { %v4833_v5 = vpop.f32.mrf.mxu1  ;;  %v7229_v60 = vpop.f32.mrf.mxu0 }
0x1bce   : > { %v9209_v11 = vadd.f32 %v4833_v5, %v8396_v23  ;;  %v5083_v16 = vsel %vm979_vm1, %v9226_v17, -inf }
0x1bcf   : > { %v7205_v14 = vpop.f32.mrf.mxu1  ;;  %v5079_v15 = vpop.f32.mrf.mxu0 }
0x1bd0   : > { %v4840_v47 = vsel %vm979_vm1, %v9209_v11, -inf  ;;  %v5080_v7 = vadd.f32 %v5079_v15, %v8401_v26 }
0x1bd1   : > { %v7230_v54 = vpop.f32.mrf.mxu0  ;;  %4841 = vmax.xlane.f32.xlu0 %v4840_v47  ;;  %v4836_v57 = vpop.f32.mrf.mxu1 }
0x1bd2   : > { %v9217_v22 = vadd.f32 %v4836_v57, %v8401_v26  ;;  %v5086_v18 = vsel %vm979_vm1, %v5080_v7, -inf }
0x1bd3   : > { %v7206_v48 = vpop.f32.mrf.mxu1  ;;  %v5197_v24 = vpop.f32.mrf.mxu0 }
0x1bd4   : > { %v4843_v39 = vsel %vm979_vm1, %v9217_v22, -inf  ;;  %v9234_v40 = vadd.f32 %v5197_v24, %v8396_v23 }
0x1bd5   : > { %v7241_v62 = vpop.f32.mrf.mxu0  ;;  %4963 = vmax.xlane.f32.xlu0 %v4962_v43  ;;  %4844 = vmax.xlane.f32.xlu1 %v4843_v39 }
0x1bd6   : > { %v5204_v42 = vsel %vm979_vm1, %v9234_v40, -inf }
0x1bd7   : > { %v5200_v50 = vpop.f32.mrf.mxu0 }
0x1bd8   : > { %v9229_v33 = vadd.f32 %v5200_v50, %v8401_v26 }
0x1bd9   : > { %v7242_v55 = vpop.f32.mrf.mxu0  ;;  %4966 = vmax.xlane.f32.xlu0 %v4965_v12  ;;  %5087 = vmax.xlane.f32.xlu1 %v5086_v18 }
0x1bda   : > { %v5207_v27 = vsel %vm979_vm1, %v9229_v33, -inf }
0x1bdb   : > { %v5318_v9 = vpop.f32.mrf.mxu0 }
0x1bdc   : > { %v9241_v30 = vadd.f32 %v5318_v9, %v8396_v23 }
0x1bdd   : > { %v7253_v28 = vpop.f32.mrf.mxu0  ;;  %5084 = vmax.xlane.f32.xlu0 %v5083_v16  ;;  %5208 = vmax.xlane.f32.xlu1 %v5207_v27 }
0x1bde   : > { %v5325_v41 = vsel %vm979_vm1, %v9241_v30, -inf }
0x1bdf   : > { %v5321_v4 = vpop.f32.mrf.mxu0 }
0x1be0   : > { %v9244_v31 = vadd.f32 %v5321_v4, %v8401_v26 }
0x1be1   : > { %v7254_v29 = vpop.f32.mrf.mxu0  ;;  %5205 = vmax.xlane.f32.xlu0 %v5204_v42 }
0x1be2   : > { %v5328_v32 = vsel %vm979_vm1, %v9244_v31, -inf }
0x1be3   : > { %v5439_v44 = vpop.f32.mrf.mxu0  ;;  %5329 = vmax.xlane.f32.xlu1 %v5328_v32 }
0x1be4   : > { %v9251_v46 = vadd.f32 %v5439_v44, %v8396_v23 }
0x1be5   : > { %v7265_v51 = vpop.f32.mrf.mxu0  ;;  %5326 = vmax.xlane.f32.xlu0 %v5325_v41 }
0x1be6   : > { %v5446_v36 = vsel %vm979_vm1, %v9251_v46, -inf }
0x1be7   : > { %v5442_v1 = vpop.f32.mrf.mxu0 }
0x1be8   : > { %v9256_v38 = vadd.f32 %v5442_v1, %v8401_v26 }
0x1be9   : > { %v7266_v10 = vpop.f32.mrf.mxu0  ;;  %5447 = vmax.xlane.f32.xlu0 %v5446_v36 }
0x1bea   : > { %v5449_v21 = vsel %vm979_vm1, %v9256_v38, -inf }
0x1beb   : > { %v5560_v0 = vpop.f32.mrf.mxu0  ;;  %5450 = vmax.xlane.f32.xlu1 %v5449_v21 }
0x1bec   : > { %v9263_v19 = vadd.f32 %v5560_v0, %v8396_v23 }
0x1bed   : > { %v7277_v25 = vpop.f32.mrf.mxu0 }
0x1bee   : > { %v5567_v56 = vsel %vm979_vm1, %v9263_v19, -inf }
0x1bef   : > { %v5563_v20 = vpop.f32.mrf.mxu0  ;;  %5568 = vmax.xlane.f32.xlu0 %v5567_v56 }
0x1bf0   : > { %v9268_v52 = vadd.f32 %v5563_v20, %v8401_v26 }
0x1bf1   : > { %v7278_v49 = vpop.f32.mrf.mxu0 }
0x1bf2   : > { %v5570_v58 = vsel %vm979_vm1, %v9268_v52, -inf }
0x1bf3   : > { %5571 = vmax.xlane.f32.xlu1 %v5570_v58 }
0x1c5a   : > { %v4842_v2 = vpop.xlane.xlu0 %4841 }
0x1c5b   : > { %v4846_v62 = vsub.f32 %v9209_v11, %v4842_v2 }
0x1c5e   : > { %v4964_v63 = vpop.xlane.xlu0 %4963  ;;  %v4845_v5 = vpop.xlane.xlu1 %4844 }
0x1c5f   : > { %v4968_v23 = vsub.f32 %v9212_v34, %v4964_v63  ;;  %v4847_v11 = vsub.f32 %v9217_v22, %v4845_v5 }
0x1c61   : > { %v4970_v60 = vmul.f32 1.442695, %v4968_v23  ;;  %v4850_v42 = vmul.f32 1.442695, %v4847_v11 }
0x1c62   : > { %v4967_v14 = vpop.xlane.xlu0 %4966  ;;  %v5088_v15 = vpop.xlane.xlu1 %5087 }
0x1c63   : > { %7879 = vpow2.f32 %v4970_v60  ;;  %v4969_v47 = vsub.f32 %v4959_v59, %v4967_v14  ;;  %v5090_v54 = vsub.f32 %v5080_v7, %v5088_v15  ;;  %v4848_v59 = vmul.f32 1.442695, %v4846_v62 }
0x1c65   : > { %v4972_v57 = vmul.f32 1.442695, %v4969_v47  ;;  %v5093_v48 = vmul.f32 1.442695, %v5090_v54 }
0x1c66   : > { %v5085_v26 = vpop.xlane.xlu0 %5084  ;;  %v5209_v24 = vpop.xlane.xlu1 %5208 }
0x1c67   : > { %7881 = vpow2.f32 %v4972_v57  ;;  %v5089_v43 = vsub.f32 %v9226_v17, %v5085_v26  ;;  %v5211_v39 = vsub.f32 %v9229_v33, %v5209_v24 }
0x1c68   : > { %7883 = vpow2.f32 %v5093_v48 }
0x1c69   : > { %v5091_v50 = vmul.f32 1.442695, %v5089_v43  ;;  %v5214_v34 = vmul.f32 1.442695, %v5211_v39 }
0x1c6a   : > { %v5206_v12 = vpop.xlane.xlu0 %5205 }
0x1c6b   : > { %7885 = vpow2.f32 %v5091_v50  ;;  %v5210_v18 = vsub.f32 %v9234_v40, %v5206_v12 }
0x1c6c   : > { %v5330_v7 = vpop.xlane.xlu1 %5329  ;;  %7887 = vpow2.f32 %v5214_v34 }
0x1c6d   : > { %v5212_v55 = vmul.f32 1.442695, %v5210_v18  ;;  %v5332_v9 = vsub.f32 %v9244_v31, %v5330_v7 }
0x1c6e   : > { %v5327_v16 = vpop.xlane.xlu0 %5326 }
0x1c6f   : > { %7889 = vpow2.f32 %v5212_v55  ;;  %v5331_v17 = vsub.f32 %v9241_v30, %v5327_v16  ;;  %v5335_v27 = vmul.f32 1.442695, %v5332_v9 }
0x1c70   : > { %v9279_v33 = vpop.eup %7879  ;;  %7891 = vpow2.f32 %v4848_v59 }
0x1c71   : > { %v5333_v28 = vmul.f32 1.442695, %v5331_v17  ;;  %v4974_v40 = vsel %vm979_vm1, %v9279_v33, 0.0 }
0x1c72   : > { %4975 = vadd.xlane.f32.xlu0 %v4974_v40  ;;  %v5448_v58 = vpop.xlane.xlu0 %5447 }
0x1c73   : > { %7893 = vpow2.f32 %v5333_v28  ;;  %v5452_v2 = vsub.f32 %v9251_v46, %v5448_v58 }
0x1c74   : > { %v9284_v4 = vpop.eup %7881  ;;  %7895 = vpow2.f32 %v5335_v27  ;;  %v5451_v5 = vpop.xlane.xlu1 %5450 }
0x1c75   : > { %v4977_v31 = vsel %vm979_vm1, %v9284_v4, 0.0  ;;  %v9288_v30 = vpop.eup %7883  ;;  %7897 = vpow2.f32 %v4850_v42  ;;  %v5454_v63 = vmul.f32 1.442695, %v5452_v2  ;;  %v5453_v23 = vsub.f32 %v9256_v38, %v5451_v5 }
0x1c76   : > { %4978 = vadd.xlane.f32.xlu1 %v4977_v31  ;;  %v5098_v32 = vsel %vm979_vm1, %v9288_v30, 0.0 }
0x1c77   : > { %7899 = vpow2.f32 %v5454_v63  ;;  %v5456_v14 = vmul.f32 1.442695, %v5453_v23 }
0x1c78   : > { %v9290_v29 = vpop.eup %7885  ;;  %v5569_v60 = vpop.xlane.xlu0 %5568 }
0x1c79   : > { %v5095_v22 = vsel %vm979_vm1, %v9290_v29, 0.0  ;;  %v9296_v44 = vpop.eup %7887  ;;  %v5573_v15 = vsub.f32 %v9263_v19, %v5569_v60  ;;  %7901 = vpow2.f32 %v5456_v14 }
0x1c7a   : > { %5096 = vadd.xlane.f32.xlu0 %v5095_v22  ;;  %5099 = vadd.xlane.f32.xlu1 %v5098_v32  ;;  %v5219_v36 = vsel %vm979_vm1, %v9296_v44, 0.0 }
0x1c7b   : > { %v5575_v54 = vmul.f32 1.442695, %v5573_v15 }
0x1c7c   : > { %v9298_v41 = vpop.eup %7889  ;;  %v5572_v47 = vpop.xlane.xlu1 %5571 }
0x1c7d   : > { %v9300_v51 = vpop.eup %7891  ;;  %v5216_v1 = vsel %vm979_vm1, %v9298_v41, 0.0  ;;  %v5574_v57 = vsub.f32 %v9268_v52, %v5572_v47  ;;  %7903 = vpow2.f32 %v5575_v54 }
0x1c7e   : > { %5217 = vadd.xlane.f32.xlu0 %v5216_v1  ;;  %5220 = vadd.xlane.f32.xlu1 %v5219_v36  ;;  %v4852_v21 = vsel %vm979_vm1, %v9300_v51, 0.0 }
0x1c7f   : > { %v5577_v48 = vmul.f32 1.442695, %v5574_v57 }
0x1c80   : > { %v9306_v10 = vpop.eup %7893 }
0x1c81   : > { %v5337_v0 = vsel %vm979_vm1, %v9306_v10, 0.0  ;;  %v9312_v25 = vpop.eup %7895  ;;  %7905 = vpow2.f32 %v5577_v48 }
0x1c82   : > { %4853 = vadd.xlane.f32.xlu0 %v4852_v21  ;;  %5338 = vadd.xlane.f32.xlu1 %v5337_v0  ;;  %v5340_v56 = vsel %vm979_vm1, %v9312_v25, 0.0  ;;  %v7898_v20 = vpop.eup %7897 }
0x1c83   : > { %v4855_v49 = vsel %vm979_vm1, %v7898_v20, 0.0 }
0x1c84   : > { %v9325_v26 = vpop.eup %7899 }
0x1c85   : > { %v5458_v46 = vsel %vm979_vm1, %v9325_v26, 0.0 }
0x1c86   : > { %5341 = vadd.xlane.f32.xlu1 %v5340_v56  ;;  %v9329_v24 = vpop.eup %7901 }
0x1c87   : > { %v5461_v38 = vsel %vm979_vm1, %v9329_v24, 0.0 }
0x1c8a   : > { %4856 = vadd.xlane.f32.xlu1 %v4855_v49  ;;  %v9333_v19 = vpop.eup %7903 }
0x1c8b   : > { %v5579_v52 = vsel %vm979_vm1, %v9333_v19, 0.0 }
0x1c8e   : > { %v9337_v43 = vpop.eup %7905 }
0x1c8f   : > { %v5582_v39 = vsel %vm979_vm1, %v9337_v43, 0.0 }
0x1c98   : > { %4864 = vrot.lane.b32.xlu0 %v9139_v37, %s8111_s27 }
0x1c9b   : > { %4985 = vrot.lane.b32.xlu1 %v9139_v37, %s8112_s0 }
0x1cb7   : > { %5459 = vadd.xlane.f32.xlu0 %v5458_v46 }
0x1cbf   : > { %5462 = vadd.xlane.f32.xlu1 %v5461_v38 }
0x1cc3   : > { %5580 = vadd.xlane.f32.xlu1 %v5579_v52 }
0x1cc7   : > { %5583 = vadd.xlane.f32.xlu1 %v5582_v39 }
0x1ccd   : > { %5106 = vrot.lane.b32.xlu0 %v9139_v37, %s8113_s29 }
0x1cd1   : > { %5348 = vrot.lane.b32.xlu0 %v9139_v37, %s8115_s22 }
0x1cd5   : > { %5469 = vrot.lane.b32.xlu0 %v9139_v37, %s8116_s26 }
0x1cd8   : > { %5227 = vrot.lane.b32.xlu1 %v9139_v37, %s8114_s1 }
0x1cd9   : > { %5590 = vrot.lane.b32.xlu0 %v9139_v37, %s8117_s23 }
0x1cfb   : > { %v4976_v62 = vpop.xlane.xlu0 %4975 }
0x1cff   : > { %v4979_v50 = vpop.xlane.xlu1 %4978 }
0x1d03   : > { %v5097_v34 = vpop.xlane.xlu0 %5096  ;;  %v5100_v12 = vpop.xlane.xlu1 %5099 }
0x1d07   : > { %v5218_v18 = vpop.xlane.xlu0 %5217  ;;  %v5221_v59 = vpop.xlane.xlu1 %5220 }
0x1d0b   : > { %v4854_v7 = vpop.xlane.xlu0 %4853  ;;  %v5339_v55 = vpop.xlane.xlu1 %5338 }
0x1d0c   : > { %7907 = vrcp.f32 %v4854_v7 }
0x1d0f   : > { %v4865_v9 = vpop.permute.xlu0 %4864  ;;  %v5342_v16 = vpop.xlane.xlu1 %5341 }
0x1d10   : > { %7208 = vmatpush3.bf16.msra.mxu1 %v4865_v9 }
0x1d11   : > { %7219 = vmatprep.subr.bf16.mxu1 %v8108_v3 }
0x1d13   : > { %v4857_v17 = vpop.xlane.xlu1 %4856 }
0x1d14   : > { %7909 = vrcp.f32 %v4857_v17 }
0x1d15   : > { %7911 = vrcp.f32 %v4979_v50 }
0x1d16   : > { %7913 = vrcp.f32 %v4976_v62 }
0x1d17   : > { %v4986_v31 = vpop.permute.xlu1 %4985  ;;  %7915 = vrcp.f32 %v5097_v34 }
0x1d18   : > { %7917 = vrcp.f32 %v5100_v12 }
0x1d19   : > { %v7908_v11 = vpop.eup %7907  ;;  %7919 = vrcp.f32 %v5218_v18 }
0x1d1a   : > { %v4860_v27 = vmul.f32 %v7908_v11, %v9300_v51  ;;  %7921 = vrcp.f32 %v5221_v59 }
0x1d1b   : > { %7923 = vrcp.f32 %v5342_v16 }
0x1d1c   : > { %7925 = vrcp.f32 %v5339_v55 }
0x1d21   : > { %v7910_v37 = vpop.eup %7909 }
0x1d22   : > { %v4861_v28 = vmul.f32 %v7910_v37, %v7898_v20  ;;  %v7912_v42 = vpop.eup %7911 }
0x1d23   : > { %v7914_v22 = vpop.eup %7913  ;;  %v4983_v32 = vmul.f32 %v7912_v42, %v9284_v4  ;;  %v7677_v42 = vld [vmem:[#allocation6 + $0xa8] sm:$0xff]  }
0x1d24   : > { %v4862_v40 = vpack.c.bf16 %v4861_v28, %v4860_v27  ;;  %v4982_v1 = vmul.f32 %v7914_v22, %v9279_v33  ;;  %v7916_v51 = vpop.eup %7915 }
0x1d25   : > { %v7918_v21 = vpop.eup %7917  ;;  %v5103_v56 = vmul.f32 %v7916_v51, %v9290_v29  ;;  %v7679_v51 = vld [vmem:[#allocation6 + $0x98] sm:$0xff]  }
0x1d26   : > { %7210 = vmatmul.mubr.msk.bf16.vlgmr.msra.gmra.mxu1 %vm979_vm1, %v4862_v40  ;;  %v4984_v36 = vpack.c.bf16 %v4983_v32, %v4982_v1  ;;  %v5104_v4 = vmul.f32 %v7918_v21, %v9288_v30  ;;  %v7920_v2 = vpop.eup %7919  ;;  %v7676_v40 = vld [vmem:[#allocation6 + $0xb0] sm:$0xff]   ;;  %v7678_v32 = vld [vmem:[#allocation6 + $0xa0] sm:$0xff]  }
0x1d27   : > { %7220 = vmatpush3.bf16.msra.mxu1 %v4986_v31  ;;  %7221 = vmatprep.mubr.msk.bf16.mxu1 %vm8109_vm0, %v8108_v3  ;;  %v7922_v63 = vpop.eup %7921  ;;  %v5224_v30 = vmul.f32 %v7920_v2, %v9298_v41 }
0x1d28   : > { %7231 = vmatprep.subr.bf16.mxu1 %v8108_v3  ;;  %v5105_v33 = vpack.c.bf16 %v5104_v4, %v5103_v56  ;;  %v5225_v5 = vmul.f32 %v7922_v63, %v9296_v44  ;;  %v7924_v14 = vpop.eup %7923  ;;  %v7680_v4 = vld [vmem:[#allocation6 + $0x90] sm:$0xff]  }
0x1d29   : > { %v7926_v47 = vpop.eup %7925  ;;  %v5346_v41 = vmul.f32 %v7924_v14, %v9312_v25 }
0x1d2a   : > { %v5226_v60 = vpack.c.bf16 %v5225_v5, %v5224_v30  ;;  %v5345_v44 = vmul.f32 %v7926_v47, %v9306_v10 }
0x1d2c   : > { %v5347_v54 = vpack.c.bf16 %v5346_v41, %v5345_v44 }
0x1d2e   : > { %7222 = vmatmul.mubr.msk.bf16.vlgmr.msra.gmra.mxu1 %vm979_vm1, %v4984_v36 }
0x1d2f   : > { %7233 = vmatprep.mubr.msk.bf16.mxu1 %vm8109_vm0, %v8108_v3 }
0x1d40   : > { %v5460_v0 = vpop.xlane.xlu0 %5459 }
0x1d44   : > { %v5107_v20 = vpop.permute.xlu0 %5106 }
0x1d45   : > { %7232 = vmatpush3.bf16.msra.mxu1 %v5107_v20 }
0x1d46   : > { %7243 = vmatprep.subr.bf16.mxu1 %v8108_v3 }
0x1d48   : > { %7234 = vmatmul.mubr.msk.bf16.vlgmr.msra.gmra.mxu1 %vm979_vm1, %v5105_v33  ;;  %v5463_v49 = vpop.xlane.xlu1 %5462  ;;  %v5349_v15 = vpop.permute.xlu0 %5348 }
0x1d49   : > { %7245 = vmatprep.mubr.msk.bf16.mxu1 %vm8109_vm0, %v8108_v3  ;;  %7927 = vrcp.f32 %v5463_v49  ;;  %v7681_v49 = vld [vmem:[#allocation6 + $0x88] sm:$0xff]  }
0x1d4a   : > { %7929 = vrcp.f32 %v5460_v0 }
0x1d4c   : > { %v5581_v58 = vpop.xlane.xlu1 %5580  ;;  %v5470_v48 = vpop.permute.xlu0 %5469 }
0x1d50   : > { %v5584_v29 = vpop.xlane.xlu1 %5583  ;;  %v5591_v10 = vpop.permute.xlu0 %5590 }
0x1d51   : > { %7931 = vrcp.f32 %v5584_v29  ;;  %v7682_v29 = vld [vmem:[#allocation6 + $0x80] sm:$0xff]  }
0x1d52   : > { %7933 = vrcp.f32 %v5581_v58 }
0x1d54   : > { %v5228_v23 = vpop.permute.xlu1 %5227 }
0x1d55   : > { %7244 = vmatpush3.bf16.msra.mxu1 %v5228_v23 }
0x1d56   : > { %7255 = vmatprep.subr.bf16.mxu1 %v8108_v3  ;;  %v7928_v57 = vpop.eup %7927 }
0x1d57   : > { %v7930_v46 = vpop.eup %7929  ;;  %v5467_v38 = vmul.f32 %v7928_v57, %v9329_v24 }
0x1d58   : > { %7246 = vmatmul.mubr.msk.bf16.vlgmr.msra.gmra.mxu1 %vm979_vm1, %v5226_v60  ;;  %v5466_v25 = vmul.f32 %v7930_v46, %v9325_v26 }
0x1d59   : > { %7256 = vmatpush3.bf16.msra.mxu1 %v5349_v15  ;;  %7257 = vmatprep.mubr.msk.bf16.mxu1 %vm8109_vm0, %v8108_v3 }
0x1d5a   : > { %7267 = vmatprep.subr.bf16.mxu1 %v8108_v3  ;;  %v5468_v52 = vpack.c.bf16 %v5467_v38, %v5466_v25 }
0x1d5e   : > { %v7932_v39 = vpop.eup %7931 }
0x1d5f   : > { %v7934_v62 = vpop.eup %7933  ;;  %v5588_v50 = vmul.f32 %v7932_v39, %v9337_v43 }
0x1d60   : > { %7258 = vmatmul.mubr.msk.bf16.vlgmr.msra.gmra.mxu1 %vm979_vm1, %v5347_v54  ;;  %v5587_v34 = vmul.f32 %v7934_v62, %v9333_v19  ;;  %v7675_v19 = vld [vmem:[#allocation6 + $0xb8] sm:$0xff]  }
0x1d61   : > { %7268 = vmatpush3.bf16.msra.mxu1 %v5470_v48  ;;  %7269 = vmatprep.mubr.msk.bf16.mxu1 %vm8109_vm0, %v8108_v3 }
0x1d62   : > { %7279 = vmatprep.subr.bf16.mxu1 %v8108_v3  ;;  %v5589_v12 = vpack.c.bf16 %v5588_v50, %v5587_v34  ;;  %7286 = vmatpush3.bf16.msra.mxu0 %v7675_v19 }
0x1d63   : > { %7287 = vmatprep.subr.bf16.mxu0 %v8108_v3 }
0x1d66   : > { %7288 = vmatpush3.bf16.msra.mxu0 %v7676_v40 }
0x1d67   : > { %7289 = vmatprep.subr.bf16.mxu0 %v8108_v3 }
0x1d68   : > { %7270 = vmatmul.mubr.msk.bf16.vlgmr.msra.gmra.mxu1 %vm979_vm1, %v5468_v52 }
0x1d69   : > { %7280 = vmatpush3.bf16.msra.mxu1 %v5591_v10  ;;  %7281 = vmatprep.mubr.msk.bf16.mxu1 %vm8109_vm0, %v8108_v3 }
0x1d6a   : > { %7290 = vmatpush3.bf16.msra.mxu0 %v7677_v42 }
0x1d6b   : > { %7291 = vmatprep.subr.bf16.mxu0 %v8108_v3 }
0x1d6e   : > { %7292 = vmatpush3.bf16.msra.mxu0 %v7678_v32 }
0x1d6f   : > { %7293 = vmatprep.subr.bf16.mxu0 %v8108_v3 }
0x1d70   : > { %7282 = vmatmul.mubr.msk.bf16.vlgmr.msra.gmra.mxu1 %vm979_vm1, %v5589_v12 }
0x1d71   : > { %6004 = vmatprep.mubr.bf16.mxu1 %v8110_v35 }
0x1d72   : > { %7294 = vmatpush3.bf16.msra.mxu0 %v7679_v51 }
0x1d73   : > { %7295 = vmatprep.subr.bf16.mxu0 %v8108_v3 }
0x1d76   : > { %7296 = vmatpush3.bf16.msra.mxu0 %v7680_v4 }
0x1d77   : > { %7297 = vmatprep.subr.bf16.mxu0 %v8108_v3 }
0x1d7a   : > { %7298 = vmatpush3.bf16.msra.mxu0 %v7681_v49 }
0x1d7b   : > { %7299 = vmatprep.subr.bf16.mxu0 %v8108_v3 }
0x1d7e   : > { %7300 = vmatpush3.bf16.msra.mxu0 %v7682_v29 }
0x1de6   : > { %v4904_v26 = vpop.f32.mrf.mxu1 }
0x1de8   : > { %v7211_v24 = vpop.f32.mrf.mxu1 }
0x1dea   : > { %v4907_v18 = vpop.f32.mrf.mxu1 }
0x1deb   : > { %v7448_v59 = vpack.i.bf16 %v4907_v18, %v4904_v26 }
0x1dec   : > { %v7212_v7 = vpop.f32.mrf.mxu1 }
0x1ded   : > { %7449 = vrot.lane.b32.xlu1 %v7448_v59, %s8117_s23 }
0x1dee   : > { %v5025_v55 = vpop.f32.mrf.mxu1 }
0x1df0   : > { %v7223_v9 = vpop.f32.mrf.mxu1 }
0x1df2   : > { %v5028_v16 = vpop.f32.mrf.mxu1 }
0x1df3   : > { %v7453_v17 = vpack.i.bf16 %v5028_v16, %v5025_v55 }
0x1df4   : > { %v7224_v11 = vpop.f32.mrf.mxu1 }
0x1df5   : > { %7454 = vrot.lane.b32.xlu0 %v7453_v17, %s8116_s26 }
0x1e08   : > { %v5146_v43 = vpop.f32.mrf.mxu1 }
0x1e0a   : > { %v7235_v35 = vpop.f32.mrf.mxu1 }
0x1e0c   : > { %v5149_v37 = vpop.f32.mrf.mxu1 }
0x1e0d   : > { %v7458_v27 = vpack.i.bf16 %v5149_v37, %v5146_v43 }
0x1e0e   : > { %v7236_v28 = vpop.f32.mrf.mxu1 }
0x1e0f   : > { %7459 = vrot.lane.b32.xlu1 %v7458_v27, %s8115_s22 }
0x1e18   : > { %v5267_v31 = vpop.f32.mrf.mxu1 }
0x1e1a   : > { %v7247_v22 = vpop.f32.mrf.mxu1 }
0x1e1b   : > { %v6626_v22 = vld [vmem:[%s9477_s10 + $0x2] ss:$0 sm:$0xff] }
0x1e1c   : > { %v5270_v1 = vpop.f32.mrf.mxu1 }
0x1e1d   : > { %v7463_v36 = vpack.i.bf16 %v5270_v1, %v5267_v31 }
0x1e1e   : > { %v7248_v21 = vpop.f32.mrf.mxu1 }
0x1e1f   : > { %7464 = vrot.lane.b32.xlu0 %v7463_v36, %s8114_s1 }
0x1e20   : > { %v5388_v0 = vpop.f32.mrf.mxu1 }
0x1e22   : > { %v7259_v56 = vpop.f32.mrf.mxu1 }
0x1e24   : > { %v5391_v20 = vpop.f32.mrf.mxu1 }
0x1e25   : > { %v7468_v33 = vpack.i.bf16 %v5391_v20, %v5388_v0  ;;  %v7683_v20 = vld [vmem:[#allocation7 + $0x170] ss:$8 sps:$4 sm:$0xff]  }
0x1e26   : > { %v7260_v58 = vpop.f32.mrf.mxu1 }
0x1e27   : > { %7469 = vrot.lane.b32.xlu1 %v7468_v33, %s8113_s29  ;;  %v7685_v33 = vld [vmem:[#allocation7 + $0x174] ss:$8 sps:$4 sm:$0xff]   ;;  %s655_s29 = scalar_lea.vmem %s9484_s17, %s8314_s28 }
0x1e28   : > { %v5509_v2 = vpop.f32.mrf.mxu1  ;;  %5972 = vmatprep.subr.bf16.mxu1 %v7685_v33 }
0x1e29   : > { %5973 = vmatpush1.bf16.msra.mxu1 %v7683_v20 }
0x1e2a   : > { %v7271_v63 = vpop.f32.mrf.mxu1 }
0x1e2c   : > { %v5512_v30 = vpop.f32.mrf.mxu1 }
0x1e2d   : > { %v7473_v5 = vpack.i.bf16 %v5512_v30, %v5509_v2 }
0x1e2e   : > { %v7272_v23 = vpop.f32.mrf.mxu1 }
0x1e2f   : > { %7474 = vrot.lane.b32.xlu0 %v7473_v5, %s8112_s0  ;;  %v7688_v5 = vld [vmem:[#allocation7 + $0x164] ss:$8 sps:$4 sm:$0xff]   ;;  %v7686_v23 = vld [vmem:[#allocation7 + $0x160] ss:$8 sps:$4 sm:$0xff]  }
0x1e30   : > { %v5630_v60 = vpop.f32.mrf.mxu1  ;;  %5974 = vmatprep.subr.bf16.mxu1 %v7688_v5 }
0x1e31   : > { %5975 = vmatpush1.bf16.msra.mxu1 %v7686_v23 }
0x1e32   : > { %v7283_v14 = vpop.f32.mrf.mxu1 }
0x1e33   : > { %v7689_v14 = vld [vmem:[#allocation7 + $0x150] ss:$8 sps:$4 sm:$0xff]  }
0x1e34   : > { %v5633_v15 = vpop.f32.mrf.mxu1 }
0x1e35   : > { %v7478_v47 = vpack.i.bf16 %v5633_v15, %v5630_v60  ;;  %v7691_v60 = vld [vmem:[#allocation7 + $0x154] ss:$8 sps:$4 sm:$0xff]   ;;  %v7694_v15 = vld [vmem:[#allocation7 + $0x144] ss:$8 sps:$4 sm:$0xff]  }
0x1e36   : > { %v7284_v41 = vpop.f32.mrf.mxu1  ;;  %5976 = vmatprep.subr.bf16.mxu1 %v7691_v60 }
0x1e37   : > { %7479 = vrot.lane.b32.xlu1 %v7478_v47, %s8111_s27  ;;  %5977 = vmatpush1.bf16.msra.mxu1 %v7689_v14  ;;  %v7692_v47 = vld [vmem:[#allocation7 + $0x140] ss:$8 sps:$4 sm:$0xff]   ;;  %v7697_v41 = vld [vmem:[#allocation7 + $0x134] ss:$8 sps:$4 sm:$0xff]  }
0x1e38   : > { %5978 = vmatprep.subr.bf16.mxu1 %v7694_v15 }
0x1e3b   : > { %5979 = vmatpush1.bf16.msra.mxu1 %v7692_v47 }
0x1e3c   : > { %5980 = vmatprep.subr.bf16.mxu1 %v7697_v41 }
0x1e5f   : > { %v7450_v44 = vpop.permute.xlu1 %7449 }
0x1e60   : > { %v7452_v46 = vunpack.i.h.bf16 %v7450_v44  ;;  %v7451_v3 = vunpack.i.l.bf16 %v7450_v44  ;;  %v7695_v44 = vld [vmem:[#allocation7 + $0x130] ss:$8 sps:$4 sm:$0xff]  }
0x1e61   : > { %5981 = vmatpush1.bf16.msra.mxu1 %v7695_v44  ;;  %v6657_v44 = vld [vmem:[%s9482_s15 + $0x2] ss:$0 sm:$0xff] }
0x1e62   : > { %v5694_v12 = vsel %vm979_vm1, %v9206_v13, %v7452_v46  ;;  %v5693_v26 = vsel %vm979_vm1, %v9204_v53, %v7451_v3  ;;  %v7701_v46 = vld [vmem:[#allocation7 + $0x110] ss:$8 sps:$4 sm:$0xff]   ;;  %v7706_v3 = vld [vmem:[#allocation7 + $0x104] ss:$8 sps:$4 sm:$0xff]  }
0x1e67   : > { %v7455_v54 = vpop.permute.xlu0 %7454 }
0x1e68   : > { %v7457_v38 = vunpack.i.h.bf16 %v7455_v54  ;;  %v7456_v25 = vunpack.i.l.bf16 %v7455_v54  ;;  %v7700_v54 = vld [vmem:[#allocation7 + $0x124] ss:$8 sps:$4 sm:$0xff]  }
0x1e69   : > { %5982 = vmatprep.subr.bf16.mxu1 %v7700_v54 }
0x1e6a   : > { %v5696_v59 = vsel %vm2002_vm2, %v5694_v12, %v7457_v38  ;;  %v5695_v7 = vsel %vm2002_vm2, %v5693_v26, %v7456_v25  ;;  %v7704_v38 = vld [vmem:[#allocation7 + $0x100] ss:$8 sps:$4 sm:$0xff]   ;;  %v7707_v25 = vld [vmem:[#allocation9 + $0x178] sm:$0xff]  }
0x1e6b   : > { %6875 = vmatprep.subr.bf16.mxu0 %v7707_v25  ;;  %v7714_v12 = vld [vmem:[#allocation9 + $0x120] sm:$0xff]   ;;  %v7715_v26 = vld [vmem:[#allocation9 + $0x158] sm:$0xff]  }
0x1e81   : > { %v7460_v57 = vpop.permute.xlu1 %7459 }
0x1e82   : > { %v7462_v39 = vunpack.i.h.bf16 %v7460_v57  ;;  %v7461_v10 = vunpack.i.l.bf16 %v7460_v57  ;;  %v7698_v57 = vld [vmem:[#allocation7 + $0x120] ss:$8 sps:$4 sm:$0xff]  }
0x1e83   : > { %5983 = vmatpush1.bf16.msra.mxu1 %v7698_v57 }
0x1e84   : > { %v5698_v16 = vsel %vm2005_vm3, %v5696_v59, %v7462_v39  ;;  %v5697_v17 = vsel %vm2005_vm3, %v5695_v7, %v7461_v10  ;;  %v7709_v39 = vld [vmem:[#allocation9 + $0x170] sm:$0xff]  }
0x1e85   : > { %v7710_v10 = vld [vmem:[#allocation9 + $0x130] sm:$0xff]  }
0x1e91   : > { %v7465_v48 = vpop.permute.xlu0 %7464 }
0x1e92   : > { %v7467_v50 = vunpack.i.h.bf16 %v7465_v48  ;;  %v7466_v34 = vunpack.i.l.bf16 %v7465_v48  ;;  %v7703_v48 = vld [vmem:[#allocation7 + $0x114] ss:$8 sps:$4 sm:$0xff]  }
0x1e93   : > { %5984 = vmatprep.subr.bf16.mxu1 %v7703_v48 }
0x1e94   : > { %v5700_v11 = vsel %vm2008_vm4, %v5698_v16, %v7467_v50  ;;  %v5699_v19 = vsel %vm2008_vm4, %v5697_v17, %v7466_v34  ;;  %5985 = vmatpush1.bf16.msra.mxu1 %v7701_v46  ;;  %v7712_v50 = vld [vmem:[#allocation9 + $0x128] sm:$0xff]   ;;  %v7713_v34 = vld [vmem:[#allocation9 + $0x160] sm:$0xff]  }
0x1e95   : > { %5986 = vmatprep.subr.bf16.mxu1 %v7706_v3 }
0x1e98   : > { %5987 = vmatpush1.bf16.msra.mxu1 %v7704_v38 }
0x1e99   : > { %v7470_v52 = vpop.permute.xlu1 %7469 }
0x1e9a   : > { %v7472_v24 = vunpack.i.h.bf16 %v7470_v52  ;;  %v7471_v18 = vunpack.i.l.bf16 %v7470_v52  ;;  %v7708_v52 = vld [vmem:[#allocation9 + $0x138] sm:$0xff]  }
0x1e9c   : > { %v5702_v43 = vsel %vm2011_vm5, %v5700_v11, %v7472_v24  ;;  %v5701_v53 = vsel %vm2011_vm5, %v5699_v19, %v7471_v18  ;;  %v6637_v11 = vld [vmem:[%s9478_s11 + $0x4] ss:$0 sm:$0xff] }
0x1ea1   : > { %v7475_v62 = vpop.permute.xlu0 %7474 }
0x1ea2   : > { %v7477_v55 = vunpack.i.h.bf16 %v7475_v62  ;;  %v7476_v9 = vunpack.i.l.bf16 %v7475_v62  ;;  %v7711_v62 = vld [vmem:[#allocation9 + $0x168] sm:$0xff]  }
0x1ea4   : > { %v5704_v27 = vsel %vm2014_vm6, %v5702_v43, %v7477_v55  ;;  %v5703_v28 = vsel %vm2014_vm6, %v5701_v53, %v7476_v9  ;;  %v6638_v53 = vld [vmem:[%s9478_s11 + $0x5] ss:$0 sm:$0xff] }
0x1ea9   : > { %v7480_v13 = vpop.permute.xlu1 %7479 }
0x1eaa   : > { %v7482_v35 = vunpack.i.h.bf16 %v7480_v13  ;;  %v7481_v37 = vunpack.i.l.bf16 %v7480_v13 }
0x1eac   : > { %v5706_v40 = vsel %vm2017_vm7, %v5704_v27, %v7482_v35  ;;  %v5705_v42 = vsel %vm2017_vm7, %v5703_v28, %v7481_v37 }
0x1ead   : > { %v5707_v31 = vpack.c.bf16 %v5706_v40, %v5705_v42  ;;  %v7716_v40 = vld [vmem:[#allocation9 + $0x118] sm:$0xff]   ;;  %v7717_v42 = vld [vmem:[#allocation9 + $0x150] sm:$0xff]  }
0x1eaf   : > { %7302 = vmatmul.mubr.bf16.vlgmr.msra.gmra.mxu0 %v5707_v31  ;;  %v7718_v31 = vld [vmem:[#allocation9 + $0x110] sm:$0xff]  }
0x1eb0   : > { %6876 = vmatpush3.bf16.msra.mxu0 %v7708_v52 }
0x1eb1   : > { %6877 = vmatprep.subr.bf16.mxu0 %v7709_v39 }
0x1eb4   : > { %6878 = vmatpush3.bf16.msra.mxu0 %v7710_v10 }
0x1eb5   : > { %6879 = vmatprep.subr.bf16.mxu0 %v7711_v62 }
0x1eb8   : > { %6880 = vmatpush3.bf16.msra.mxu0 %v7712_v50 }
0x1eb9   : > { %6881 = vmatprep.subr.bf16.mxu0 %v7713_v34 }
0x1ebc   : > { %6882 = vmatpush3.bf16.msra.mxu0 %v7714_v12 }
0x1ebd   : > { %6883 = vmatprep.subr.bf16.mxu0 %v7715_v26 }
0x1ec0   : > { %6884 = vmatpush3.bf16.msra.mxu0 %v7716_v40 }
0x1ec1   : > { %6885 = vmatprep.subr.bf16.mxu0 %v7717_v42 }
0x1ec4   : > { %6886 = vmatpush3.bf16.msra.mxu0 %v7718_v31 }
0x1f6f   : > { %v5815_v32 = vpop.f32.mrf.mxu0 }
0x1f70   : > { %v5816_v1 = vadd.f32 %v6626_v22, %v5815_v32  ;;  %v7720_v32 = vld [vmem:[#allocation9 + $0x108] sm:$0xff]  }
0x1f71   : > { %v7303_v36 = vpop.f32.mrf.mxu0 }
0x1f72   : > { %v9424_v51 = vadd.f32 %v5816_v1, %v9089_v45  ;;  %v7721_v1 = vld [vmem:[#allocation9 + $0x140] sm:$0xff]  }
0x1f73   : > { %v5818_v21 = vpop.f32.mrf.mxu0  ;;  %v7722_v36 = vld [vmem:[#allocation9 + $0x100] sm:$0xff]  }
0x1f74   : > { %v5819_v0 = vadd.f32 %v6626_v22, %v5818_v21  ;;  %5827 = vadd.xlane.f32.xlu0 %v9424_v51  ;;  %v7719_v22 = vld [vmem:[#allocation9 + $0x148] sm:$0xff]   ;;  %v6639_v21 = vld [vmem:[%s9480_s13 + $0x4] sm:$0x3] }
0x1f75   : > { %v7304_v56 = vpop.f32.mrf.mxu0  ;;  %6887 = vmatprep.subr.bf16.mxu0 %v7719_v22 }
0x1f76   : > { %v9428_v4 = vadd.f32 %v5819_v0, %v9093_v6  ;;  %6888 = vmatpush3.bf16.msra.mxu0 %v7720_v32  ;;  %v5889_v0 = vrot.slane %v6639_v21, %v8365_v61  ;;  %v5885_v56 = vrot.slane %v6639_v21, %v8371_v8 }
0x1f77   : > { %6889 = vmatprep.subr.bf16.mxu0 %v7721_v1 }
0x1f78   : > { %5829 = vadd.xlane.f32.xlu1 %v9428_v4 }
0x1f7a   : > { %6890 = vmatpush3.bf16.msra.mxu0 %v7722_v36 }
0x1ffd   : > { %v5828_v49 = vpop.xlane.xlu0 %5827 }
0x1ffe   : > { %v5831_v58 = vmul.f32 0.0078125, %v5828_v49 }
0x2000   : > { %v9432_v2 = vsub.f32 %v9424_v51, %v5831_v58 }
0x2001   : > { %v5830_v45 = vpop.xlane.xlu1 %5829 }
0x2002   : > { %v5832_v63 = vmul.f32 0.0078125, %v5830_v45  ;;  %v5835_v29 = vmul.f32 %v9432_v2, %v9432_v2 }
0x2004   : > { %v5834_v30 = vsub.f32 %v9428_v4, %v5832_v63  ;;  %5837 = vadd.xlane.f32.xlu0 %v5835_v29 }
0x2006   : > { %v5836_v6 = vmul.f32 %v5834_v30, %v5834_v30 }
0x2008   : > { %5839 = vadd.xlane.f32.xlu0 %v5836_v6 }
0x208d   : > { %v5838_v24 = vpop.xlane.xlu0 %5837 }
0x208e   : > { %v5841_v18 = vmul.f32 0.0078125, %v5838_v24 }
0x2090   : > { %v5843_v59 = vadd.f32 1e-05, %v5841_v18 }
0x2091   : > { %v5840_v7 = vpop.xlane.xlu0 %5839 }
0x2092   : > { %7935 = vrsqrt.f32 %v5843_v59  ;;  %v5842_v55 = vmul.f32 0.0078125, %v5840_v7 }
0x2094   : > { %v5844_v9 = vadd.f32 1e-05, %v5842_v55 }
0x2096   : > { %7937 = vrsqrt.f32 %v5844_v9 }
0x209f   : > { %v7936_v16 = vpop.eup %7935 }
0x20a0   : > { %v5847_v17 = vmul.f32 %v7936_v16, %v9432_v2 }
0x20a2   : > { %v5853_v43 = vmul.f32 %v6637_v11, %v5847_v17  ;;  %v6674_v17 = vld [vmem:[%s9483_s16] ss:$0 sm:$0xff] }
0x20a3   : > { %v7938_v19 = vpop.eup %7937 }
0x20a4   : > { %v5848_v13 = vmul.f32 %v7938_v19, %v5834_v30  ;;  %v5859_v37 = vadd.f32 %v6638_v53, %v5853_v43  ;;  %v6675_v19 = vld [vmem:[%s9483_s16 + $0x1] ss:$0 sm:$0xff] }
0x20a6   : > { %v5854_v35 = vmul.f32 %v6637_v11, %v5848_v13 }
0x20a8   : > { %v5860_v27 = vadd.f32 %v6638_v53, %v5854_v35 }
0x20aa   : > { %v5861_v28 = vpack.c.bf16 %v5860_v27, %v5859_v37 }
0x20ac   : > { %6005 = vmatmul.mubr.bf16.vlgmr.msra.gmra.mxu1 %v5861_v28 }
0x216c   : > { %v6006_v20 = vpop.f32.mrf.mxu1 }
0x216d   : > { %v6007_v58 = vadd.f32 %v6006_v20, %v5885_v56 }
0x216e   : > { %v6008_v33 = vpop.f32.mrf.mxu1 }
0x216f   : > { %v6009_v49 = vadd.f32 %v6008_v33, %v5889_v0  ;;  %v6019_v5 = vmul.f32 0.01, %v6007_v58  ;;  %vm6015_vm2 = vcmp.ge.f32.partialorder %v6007_v58, 0.0 }
0x2170   : > { %v6010_v2 = vpop.f32.mrf.mxu1 }
0x2171   : > { %v6011_v45 = vadd.f32 %v6010_v2, %v5885_v56  ;;  %v6020_v29 = vmul.f32 0.01, %v6009_v49  ;;  %vm6016_vm1 = vcmp.ge.f32.partialorder %v6009_v49, 0.0  ;;  %v6023_v8 = vsel %vm6015_vm2, %v6007_v58, %v6019_v5 }
0x2172   : > { %v6012_v63 = vpop.f32.mrf.mxu1 }
0x2173   : > { %vm6017_vm0 = vcmp.ge.f32.partialorder %v6011_v45, 0.0  ;;  %v6021_v30 = vmul.f32 0.01, %v6011_v45  ;;  %v6013_v6 = vadd.f32 %v6012_v63, %v5889_v0  ;;  %v6024_v61 = vsel %vm6016_vm1, %v6009_v49, %v6020_v29 }
0x2175   : > { %vm6018_vm3 = vcmp.ge.f32.partialorder %v6013_v6, 0.0  ;;  %v6022_v23 = vmul.f32 0.01, %v6013_v6  ;;  %v6025_v60 = vsel %vm6017_vm0, %v6011_v45, %v6021_v30 }
0x2176   : > { %v6027_v47 = vpack.c.bf16 %v6025_v60, %v6023_v8 }
0x2177   : > { %v6026_v14 = vsel %vm6018_vm3, %v6013_v6, %v6022_v23 }
0x2178   : > { %v6028_v15 = vpack.c.bf16 %v6026_v14, %v6024_v61 }
0x217a   : > { %6198 = vmatprep.mubr.bf16.mxu0 %v6028_v15 }
0x217b   : > { %6199 = vmatmul.mubr.bf16.vlgmr.msra.gmra.mxu0 %v6027_v47 }
0x223b   : > { %v6891_v41 = vpop.f32.mrf.mxu0 }
0x223d   : > { %v6892_v54 = vpop.f32.mrf.mxu0 }
0x223e   : > { %v6893_v57 = vadd.f32 %v6892_v54, %v6891_v41 }
0x223f   : > { %v6894_v48 = vpop.f32.mrf.mxu0 }
0x2240   : > { %v6201_v46 = vadd.f32 %v6893_v57, %v6657_v44 }
0x2241   : > { %v6895_v3 = vpop.f32.mrf.mxu0 }
0x2242   : > { %v6896_v38 = vadd.f32 %v6895_v3, %v6894_v48  ;;  %v6207_v25 = vadd.f32 %v6201_v46, %v9424_v51 }
0x2244   : > { %v6204_v52 = vadd.f32 %v6896_v38, %v6657_v44  ;;  %6211 = vadd.xlane.f32.xlu0 %v6207_v25 }
0x2246   : > { %v6208_v39 = vadd.f32 %v6204_v52, %v9428_v4 }
0x2248   : > { %6213 = vadd.xlane.f32.xlu1 %v6208_v39 }
0x22cd   : > { %v6212_v10 = vpop.xlane.xlu0 %6211 }
0x22ce   : > { %v6215_v62 = vmul.f32 0.0078125, %v6212_v10 }
0x22d0   : > { %v6217_v50 = vsub.f32 %v6207_v25, %v6215_v62 }
0x22d1   : > { %v6214_v34 = vpop.xlane.xlu1 %6213 }
0x22d2   : > { %v6216_v12 = vmul.f32 0.0078125, %v6214_v34  ;;  %v6219_v26 = vmul.f32 %v6217_v50, %v6217_v50 }
0x22d4   : > { %v6218_v24 = vsub.f32 %v6208_v39, %v6216_v12  ;;  %6221 = vadd.xlane.f32.xlu0 %v6219_v26 }
0x22d6   : > { %v6220_v18 = vmul.f32 %v6218_v24, %v6218_v24 }
0x22d8   : > { %6223 = vadd.xlane.f32.xlu1 %v6220_v18 }
0x235d   : > { %v6222_v59 = vpop.xlane.xlu0 %6221 }
0x235e   : > { %v6225_v7 = vmul.f32 0.0078125, %v6222_v59 }
0x2360   : > { %v6227_v55 = vadd.f32 1e-05, %v6225_v7 }
0x2361   : > { %v6224_v51 = vpop.xlane.xlu1 %6223 }
0x2362   : > { %7939 = vrsqrt.f32 %v6227_v55  ;;  %v6226_v9 = vmul.f32 0.0078125, %v6224_v51 }
0x2364   : > { %v6228_v16 = vadd.f32 1e-05, %v6226_v9 }
0x2366   : > { %7941 = vrsqrt.f32 %v6228_v16 }
0x236f   : > { %v7940_v4 = vpop.eup %7939 }
0x2370   : > { %v6231_v11 = vmul.f32 %v7940_v4, %v6217_v50 }
0x2372   : > { %v6237_v13 = vmul.f32 %v6674_v17, %v6231_v11 }
0x2373   : > { %v7942_v43 = vpop.eup %7941 }
0x2374   : > { %v6243_v53 = vadd.f32 %v6675_v19, %v6237_v13  ;;  %v6232_v35 = vmul.f32 %v7942_v43, %v6218_v24 }
0x2376   : > { %6245 = vst [vmem:[%s655_s29] sm:$0xff] %v6243_v53  ;;  %v6238_v37 = vmul.f32 %v6674_v17, %v6232_v35 }
0x2378   : > { %v6244_v27 = vadd.f32 %v6675_v19, %v6238_v37 }
0x237a   : > { %6246 = vst [vmem:[%s655_s29 + $0x8] sm:$0xff] %v6244_v27 }
0x237b PF: > { %s30_s24 = sadd.s32 1, %s8097_s24  }
0x237c   : > { %p27_p2 = scmp.ge.s32.totalorder %s30_s24, 4  }
0x237e   :  { %29 = sbr.rel (!%p27_p2) target bundleno = 7 (0x7), region = 169 }
0x2383   :  { %6268 = vsyncpa [#allocation3], 1 }
0x2384   :  { %6270 = vsyncpa [#allocation3 + $0x1], 1 }
0x2385   :  { %6271 = vsyncpa [#allocation5], 1 }
0x2386   :  { %6272 = vsyncpa [#allocation8], 1 }

</bundles_post_ra>
